<compile_context>
chip_gen: v6e
topology: v6e:2x2x1
jax: 0.10.0
libtpu: 0.0.40
codegen_flags: <defaults>
</compile_context>

<pallas_src>
import math

import jax
import jax.numpy as jnp
from jax.experimental import pallas as pl
from jax.experimental.pallas import tpu as pltpu

EPS = 1e-5


def _gelu_exact(x):
    # nn.GELU() default is the exact erf-based GELU.
    return 0.5 * x * (1.0 + jax.lax.erf(x * (1.0 / math.sqrt(2.0))))


def _layernorm(x, gamma, beta):
    # LayerNorm over the last axis, biased variance, eps=1e-5 (PyTorch default).
    mean = jnp.mean(x, axis=-1, keepdims=True)
    xc = x - mean
    var = jnp.mean(xc * xc, axis=-1, keepdims=True)
    return xc * jax.lax.rsqrt(var + EPS) * gamma + beta


def mixer_block_kernel(
    x_ref,                 # (TB, P, D)  f32
    g1_ref, b1_ref,        # (1, D) f32                 layernorm1 weight / bias
    w1_ref, bt1_ref,       # (K, P) bf16, (K, 1) f32    token fc1 (PyTorch layout)
    w2_ref, bt2_ref,       # (P, K) bf16, (P, 1) f32    token fc2 (PyTorch layout)
    g2_ref, b2_ref,        # (1, D) f32                 layernorm2 weight / bias
    w3t_ref, bc1_ref,      # (D, C) bf16, (1, C) f32    channel fc1 (pre-transposed)
    w4t_ref, bc2_ref,      # (C, D) bf16, (1, D) f32    channel fc2 (pre-transposed)
    o_ref,                 # (TB, P, D)  f32
):
    TB, P, D = x_ref.shape
    K = w1_ref.shape[0]

    x = x_ref[...]                                                # (TB, P, D) f32

    # ---- token-mixing branch (transpose-free, single batched contraction) ----
    ln1 = _layernorm(x, g1_ref[...], b1_ref[...])                 # (TB, P, D) f32
    ln1_bf = ln1.astype(jnp.bfloat16)

    # Broadcast the small token-MLP weights across the TB batch dim once
    # (bf16, a few KiB) so both matmuls are true batched dot_generals that
    # keep D in the lane dimension -> no XLU transposes anywhere.
    w1_b = jnp.broadcast_to(w1_ref[...], (TB, K, P))              # bf16
    h = jnp.einsum('tkp,tpd->tkd', w1_b, ln1_bf,
                   preferred_element_type=jnp.float32)            # (TB, K, D) f32
    h = _gelu_exact(h + bt1_ref[...][None])                       # bias (1, K, 1), added once

    w2_b = jnp.broadcast_to(w2_ref[...], (TB, P, K))              # bf16
    tok = jnp.einsum('tpk,tkd->tpd', w2_b, h.astype(jnp.bfloat16),
                     preferred_element_type=jnp.float32)          # (TB, P, D) f32
    x1 = x + tok + bt2_ref[...][None]                             # bias (1, P, 1), added once

    # ---- channel-mixing branch (lane-contracting matmuls on the full slab) ----
    x1_flat = x1.reshape(TB * P, D)                               # free reshape
    ln2 = _layernorm(x1_flat, g2_ref[...], b2_ref[...])
    h2 = jnp.dot(ln2.astype(jnp.bfloat16), w3t_ref[...],
                 preferred_element_type=jnp.float32) + bc1_ref[...]
    h2 = _gelu_exact(h2)                                          # (TB*P, C) f32
    chn = jnp.dot(h2.astype(jnp.bfloat16), w4t_ref[...],
                  preferred_element_type=jnp.float32) + bc2_ref[...]

    o_ref[...] = (x1_flat + chn).reshape(TB, P, D)


def _pick_block_batch(B, P, row_target=256):
    """Largest-enough batch tile: slab rows >= row_target (MXU fill) while
    keeping >= 2 grid steps when possible (v7x has 2 TensorCores)."""
    divisors = [d for d in range(1, B + 1) if B % d == 0]
    cands = [d for d in divisors if B // d >= 2] or divisors
    for d in cands:                     # smallest tile that already fills the MXU
        if d * P >= row_target:
            return d
    return cands[-1]                    # otherwise: biggest tile that keeps 2 steps


def mixer_block(x, params, *, block_batch=None):
    """x: (B, P, D) float32. params: dict of weights (see init_params)."""
    B, P, D = x.shape
    if block_batch is None:
        block_batch = _pick_block_batch(B, P)
    assert B % block_batch == 0, "batch must be divisible by block_batch"

    g1 = params["norm1_w"].reshape(1, D)
    b1 = params["norm1_b"].reshape(1, D)
    g2 = params["norm2_w"].reshape(1, D)
    b2 = params["norm2_b"].reshape(1, D)

    # Token-MLP weights stay in PyTorch (out, in) layout -> transpose-free kernel.
    w1 = params["tok_fc1_w"].astype(jnp.bfloat16)           # (token_dim, P)
    bt1 = params["tok_fc1_b"].reshape(-1, 1)                # (token_dim, 1)
    w2 = params["tok_fc2_w"].astype(jnp.bfloat16)           # (P, token_dim)
    bt2 = params["tok_fc2_b"].reshape(-1, 1)                # (P, 1)

    # Channel-MLP weights pre-transposed once, outside the kernel.
    w3t = params["chn_fc1_w"].T.astype(jnp.bfloat16)        # (D, channel_dim)
    bc1 = params["chn_fc1_b"].reshape(1, -1)
    w4t = params["chn_fc2_w"].T.astype(jnp.bfloat16)        # (channel_dim, D)
    bc2 = params["chn_fc2_b"].reshape(1, -1)

    def const_spec(arr):
        # Constant across the grid -> single buffer (no useless double-buffering).
        nd = arr.ndim
        return pl.BlockSpec(arr.shape, lambda b, _nd=nd: (0,) * _nd,
                            pipeline_mode=pl.Buffered(1))

    x_spec = pl.BlockSpec((block_batch, P, D), lambda b: (b, 0, 0))

    operands = (x, g1, b1, w1, bt1, w2, bt2, g2, b2, w3t, bc1, w4t, bc2)
    in_specs = [x_spec] + [const_spec(a) for a in operands[1:]]

    return pl.pallas_call(
        mixer_block_kernel,
        out_shape=jax.ShapeDtypeStruct((B, P, D), x.dtype),
        grid_spec=pltpu.PrefetchScalarGridSpec(
            num_scalar_prefetch=0,
            grid=(B // block_batch,),
            in_specs=in_specs,
            out_specs=x_spec,
        ),
        compiler_params=pltpu.CompilerParams(
            dimension_semantics=("parallel",),
            vmem_limit_bytes=48 * 1024 * 1024,
        ),
    )(*operands)


def init_params(key, num_patches, dim, token_dim, channel_dim):
    ks = jax.random.split(key, 4)

    def lin(k, out_f, in_f):
        # shapes match nn.Linear(in_f, out_f): weight (out, in), bias (out,)
        bound = 1.0 / math.sqrt(in_f)
        kw, kb = jax.random.split(k)
        w = jax.random.uniform(kw, (out_f, in_f), jnp.float32, -bound, bound)
        b = jax.random.uniform(kb, (out_f,), jnp.float32, -bound, bound)
        return w, b

    tok1_w, tok1_b = lin(ks[0], token_dim, num_patches)
    tok2_w, tok2_b = lin(ks[1], num_patches, token_dim)
    chn1_w, chn1_b = lin(ks[2], channel_dim, dim)
    chn2_w, chn2_b = lin(ks[3], dim, channel_dim)
    return {
        "norm1_w": jnp.ones((dim,), jnp.float32),
        "norm1_b": jnp.zeros((dim,), jnp.float32),
        "norm2_w": jnp.ones((dim,), jnp.float32),
        "norm2_b": jnp.zeros((dim,), jnp.float32),
        "tok_fc1_w": tok1_w, "tok_fc1_b": tok1_b,
        "tok_fc2_w": tok2_w, "tok_fc2_b": tok2_b,
        "chn_fc1_w": chn1_w, "chn_fc1_b": chn1_b,
        "chn_fc2_w": chn2_w, "chn_fc2_b": chn2_b,
    }


def mixer_block_ref(x, p, matmul_dtype=jnp.float32):
    """Pure-JAX reference matching the PyTorch forward.

    matmul_dtype lets us build a reference whose matmul operand precision
    matches the kernel's bf16 MXU feed (accumulation stays f32)."""
    def ln(v, w, b):
        m = jnp.mean(v, -1, keepdims=True)
        var = jnp.mean((v - m) ** 2, -1, keepdims=True)
        return (v - m) * jax.lax.rsqrt(var + EPS) * w + b

    def mm(a, b):
        return jnp.matmul(a.astype(matmul_dtype), b.astype(matmul_dtype),
                          preferred_element_type=jnp.float32)

    y = ln(x, p["norm1_w"], p["norm1_b"]).transpose(0, 2, 1)              # (B, D, P)
    h = _gelu_exact(mm(y, p["tok_fc1_w"].T) + p["tok_fc1_b"])
    tok = (mm(h, p["tok_fc2_w"].T) + p["tok_fc2_b"]).transpose(0, 2, 1)   # (B, P, D)
    x = x + tok
    z = ln(x, p["norm2_w"], p["norm2_b"])
    h2 = _gelu_exact(mm(z, p["chn_fc1_w"].T) + p["chn_fc1_b"])
    x = x + (mm(h2, p["chn_fc2_w"].T) + p["chn_fc2_b"])
    return x


if __name__ == "__main__":
    # Small but MXU-friendly shapes: block_batch auto-picks 16 -> channel slab
    # of 256 rows per grid step, grid length 2 (both v7x TensorCores busy).
    B, P, D = 32, 16, 128            # batch, num_patches, dim (lane-dense D)
    token_dim, channel_dim = 64, 256

    key = jax.random.PRNGKey(0)
    kx, kp = jax.random.split(key)
    x = jax.random.normal(kx, (B, P, D), jnp.float32)
    params = init_params(kp, P, D, token_dim, channel_dim)

    out = mixer_block(x, params)     # auto block_batch -> (16,16,128) blocks, grid=(2,)
    out = jax.block_until_ready(out)
    assert out.shape == (B, P, D)

    # Tight check vs. a reference using the same bf16 matmul-operand precision.
    ref_bf16 = mixer_block_ref(x, params, matmul_dtype=jnp.bfloat16)
    assert jnp.allclose(out, ref_bf16, atol=5e-3, rtol=5e-3), (
        float(jnp.max(jnp.abs(out - ref_bf16))))

    # Loose sanity check vs. full-f32 PyTorch-equivalent math.
    ref_f32 = mixer_block_ref(x, params)
    assert jnp.allclose(out, ref_f32, atol=1e-1, rtol=1e-1), (
        float(jnp.max(jnp.abs(out - ref_f32))))

    print("KERNEL_OK")
</pallas_src>

<mosaic_0001>
module attributes {stable_mosaic.version = 11 : i64} {
  func.func @mixer_block_kernel(%arg0: i32, %arg1: memref<16x16x128xf32, #tpu.memory_space<vmem>>, %arg2: memref<1x128xf32, #tpu.memory_space<vmem>>, %arg3: memref<1x128xf32, #tpu.memory_space<vmem>>, %arg4: memref<64x16xbf16, #tpu.memory_space<vmem>>, %arg5: memref<64x1xf32, #tpu.memory_space<vmem>>, %arg6: memref<16x64xbf16, #tpu.memory_space<vmem>>, %arg7: memref<16x1xf32, #tpu.memory_space<vmem>>, %arg8: memref<1x128xf32, #tpu.memory_space<vmem>>, %arg9: memref<1x128xf32, #tpu.memory_space<vmem>>, %arg10: memref<128x256xbf16, #tpu.memory_space<vmem>>, %arg11: memref<1x256xf32, #tpu.memory_space<vmem>>, %arg12: memref<256x128xbf16, #tpu.memory_space<vmem>>, %arg13: memref<1x128xf32, #tpu.memory_space<vmem>>, %arg14: memref<16x16x128xf32, #tpu.memory_space<vmem>>) attributes {dimension_semantics = [#tpu.dimension_semantics<parallel>], iteration_bounds = array<i64: 2>, scalar_prefetch = 0 : i64, scratch_operands = 0 : i64, tpu.core_type = #tpu.core_type<tc>, window_params = [{transform_indices = @transform_0, window_bounds = array<i64: 16, 16, 128>}, {pipeline_mode = #tpu.pipeline_mode<synchronous>, transform_indices = @transform_1, window_bounds = array<i64: 1, 128>}, {pipeline_mode = #tpu.pipeline_mode<synchronous>, transform_indices = @transform_2, window_bounds = array<i64: 1, 128>}, {pipeline_mode = #tpu.pipeline_mode<synchronous>, transform_indices = @transform_3, window_bounds = array<i64: 64, 16>}, {pipeline_mode = #tpu.pipeline_mode<synchronous>, transform_indices = @transform_4, window_bounds = array<i64: 64, 1>}, {pipeline_mode = #tpu.pipeline_mode<synchronous>, transform_indices = @transform_5, window_bounds = array<i64: 16, 64>}, {pipeline_mode = #tpu.pipeline_mode<synchronous>, transform_indices = @transform_6, window_bounds = array<i64: 16, 1>}, {pipeline_mode = #tpu.pipeline_mode<synchronous>, transform_indices = @transform_7, window_bounds = array<i64: 1, 128>}, {pipeline_mode = #tpu.pipeline_mode<synchronous>, transform_indices = @transform_8, window_bounds = array<i64: 1, 128>}, {pipeline_mode = #tpu.pipeline_mode<synchronous>, transform_indices = @transform_9, window_bounds = array<i64: 128, 256>}, {pipeline_mode = #tpu.pipeline_mode<synchronous>, transform_indices = @transform_10, window_bounds = array<i64: 1, 256>}, {pipeline_mode = #tpu.pipeline_mode<synchronous>, transform_indices = @transform_11, window_bounds = array<i64: 256, 128>}, {pipeline_mode = #tpu.pipeline_mode<synchronous>, transform_indices = @transform_12, window_bounds = array<i64: 1, 128>}, {transform_indices = @transform_13, window_bounds = array<i64: 16, 16, 128>}]} {
    %c0 = arith.constant 0 : index
    %c0_0 = arith.constant 0 : index
    %c0_1 = arith.constant 0 : index
    %0 = vector.load %arg1[%c0, %c0_0, %c0_1] : memref<16x16x128xf32, #tpu.memory_space<vmem>>, vector<16x16x128xf32>
    %c0_2 = arith.constant 0 : index
    %c0_3 = arith.constant 0 : index
    %1 = vector.load %arg2[%c0_2, %c0_3] : memref<1x128xf32, #tpu.memory_space<vmem>>, vector<1x128xf32>
    %c0_4 = arith.constant 0 : index
    %c0_5 = arith.constant 0 : index
    %2 = vector.load %arg3[%c0_4, %c0_5] : memref<1x128xf32, #tpu.memory_space<vmem>>, vector<1x128xf32>
    %cst = arith.constant dense<0.000000e+00> : vector<16x16xf32>
    %3 = vector.multi_reduction <add>, %0, %cst [2] : vector<16x16x128xf32> to vector<16x16xf32>
    %4 = vector.shape_cast %3 : vector<16x16xf32> to vector<16x16x1xf32>
    %cst_6 = arith.constant 1.280000e+02 : f32
    %5 = vector.broadcast %cst_6 : f32 to vector<16x16x1xf32>
    %6 = arith.divf %4, %5 : vector<16x16x1xf32>
    %7 = vector.broadcast %6 : vector<16x16x1xf32> to vector<16x16x128xf32>
    %8 = arith.subf %0, %7 : vector<16x16x128xf32>
    %9 = arith.mulf %8, %8 : vector<16x16x128xf32>
    %cst_7 = arith.constant dense<0.000000e+00> : vector<16x16xf32>
    %10 = vector.multi_reduction <add>, %9, %cst_7 [2] : vector<16x16x128xf32> to vector<16x16xf32>
    %11 = vector.shape_cast %10 : vector<16x16xf32> to vector<16x16x1xf32>
    %cst_8 = arith.constant 1.280000e+02 : f32
    %12 = vector.broadcast %cst_8 : f32 to vector<16x16x1xf32>
    %13 = arith.divf %11, %12 : vector<16x16x1xf32>
    %cst_9 = arith.constant 9.99999974E-6 : f32
    %14 = vector.broadcast %cst_9 : f32 to vector<16x16x1xf32>
    %15 = arith.addf %13, %14 : vector<16x16x1xf32>
    %16 = math.rsqrt %15 : vector<16x16x1xf32>
    %17 = vector.broadcast %16 : vector<16x16x1xf32> to vector<16x16x128xf32>
    %18 = arith.mulf %8, %17 : vector<16x16x128xf32>
    %19 = vector.shape_cast %1 : vector<1x128xf32> to vector<1x1x128xf32>
    %20 = vector.broadcast %19 : vector<1x1x128xf32> to vector<16x16x128xf32>
    %21 = arith.mulf %18, %20 : vector<16x16x128xf32>
    %22 = vector.shape_cast %2 : vector<1x128xf32> to vector<1x1x128xf32>
    %23 = vector.broadcast %22 : vector<1x1x128xf32> to vector<16x16x128xf32>
    %24 = arith.addf %21, %23 : vector<16x16x128xf32>
    %25 = arith.truncf %24 : vector<16x16x128xf32> to vector<16x16x128xbf16>
    %c0_10 = arith.constant 0 : index
    %c0_11 = arith.constant 0 : index
    %26 = vector.load %arg4[%c0_10, %c0_11] : memref<64x16xbf16, #tpu.memory_space<vmem>>, vector<64x16xbf16>
    %27 = vector.shape_cast %26 : vector<64x16xbf16> to vector<1x64x16xbf16>
    %28 = vector.broadcast %27 : vector<1x64x16xbf16> to vector<16x64x16xbf16>
    "tpu.trace_start"() <{level = 10 : i32, message = "tkp,tpd->tkd"}> : () -> ()
    %cst_12 = arith.constant dense<0.000000e+00> : vector<16x64x128xf32>
    %29 = tpu.matmul %28, %25, %cst_12 {dimension_numbers = #tpu.dot_dimension_numbers<[2], [1], [1], [2], [0, 0, 0, 1, 1, 2], [0], [0]>} : vector<16x64x16xbf16>, vector<16x16x128xbf16>, vector<16x64x128xf32> -> vector<16x64x128xf32>
    "tpu.trace_stop"() : () -> ()
    %c0_13 = arith.constant 0 : index
    %c0_14 = arith.constant 0 : index
    %30 = vector.load %arg5[%c0_13, %c0_14] : memref<64x1xf32, #tpu.memory_space<vmem>>, vector<64x1xf32>
    %31 = vector.shape_cast %30 : vector<64x1xf32> to vector<1x64x1xf32>
    %32 = vector.broadcast %31 : vector<1x64x1xf32> to vector<16x64x128xf32>
    %33 = arith.addf %29, %32 : vector<16x64x128xf32>
    %cst_15 = arith.constant 5.000000e-01 : f32
    %34 = vector.broadcast %cst_15 : f32 to vector<16x64x128xf32>
    %35 = arith.mulf %34, %33 : vector<16x64x128xf32>
    %cst_16 = arith.constant 0.707106769 : f32
    %36 = vector.broadcast %cst_16 : f32 to vector<16x64x128xf32>
    %37 = arith.mulf %33, %36 : vector<16x64x128xf32>
    %38 = math.erf %37 : vector<16x64x128xf32>
    %cst_17 = arith.constant 1.000000e+00 : f32
    %39 = vector.broadcast %cst_17 : f32 to vector<16x64x128xf32>
    %40 = arith.addf %39, %38 : vector<16x64x128xf32>
    %41 = arith.mulf %35, %40 : vector<16x64x128xf32>
    %c0_18 = arith.constant 0 : index
    %c0_19 = arith.constant 0 : index
    %42 = vector.load %arg6[%c0_18, %c0_19] : memref<16x64xbf16, #tpu.memory_space<vmem>>, vector<16x64xbf16>
    %43 = vector.shape_cast %42 : vector<16x64xbf16> to vector<1x16x64xbf16>
    %44 = vector.broadcast %43 : vector<1x16x64xbf16> to vector<16x16x64xbf16>
    %45 = arith.truncf %41 : vector<16x64x128xf32> to vector<16x64x128xbf16>
    "tpu.trace_start"() <{level = 10 : i32, message = "tpk,tkd->tpd"}> : () -> ()
    %cst_20 = arith.constant dense<0.000000e+00> : vector<16x16x128xf32>
    %46 = tpu.matmul %44, %45, %cst_20 {dimension_numbers = #tpu.dot_dimension_numbers<[2], [1], [1], [2], [0, 0, 0, 1, 1, 2], [0], [0]>} : vector<16x16x64xbf16>, vector<16x64x128xbf16>, vector<16x16x128xf32> -> vector<16x16x128xf32>
    "tpu.trace_stop"() : () -> ()
    %47 = arith.addf %0, %46 : vector<16x16x128xf32>
    %c0_21 = arith.constant 0 : index
    %c0_22 = arith.constant 0 : index
    %48 = vector.load %arg7[%c0_21, %c0_22] : memref<16x1xf32, #tpu.memory_space<vmem>>, vector<16x1xf32>
    %49 = vector.shape_cast %48 : vector<16x1xf32> to vector<1x16x1xf32>
    %50 = vector.broadcast %49 : vector<1x16x1xf32> to vector<16x16x128xf32>
    %51 = arith.addf %47, %50 : vector<16x16x128xf32>
    %52 = vector.shape_cast %51 : vector<16x16x128xf32> to vector<256x128xf32>
    %c0_23 = arith.constant 0 : index
    %c0_24 = arith.constant 0 : index
    %53 = vector.load %arg8[%c0_23, %c0_24] : memref<1x128xf32, #tpu.memory_space<vmem>>, vector<1x128xf32>
    %c0_25 = arith.constant 0 : index
    %c0_26 = arith.constant 0 : index
    %54 = vector.load %arg9[%c0_25, %c0_26] : memref<1x128xf32, #tpu.memory_space<vmem>>, vector<1x128xf32>
    %cst_27 = arith.constant dense<0.000000e+00> : vector<256xf32>
    %55 = vector.multi_reduction <add>, %52, %cst_27 [1] : vector<256x128xf32> to vector<256xf32>
    %56 = vector.shape_cast %55 : vector<256xf32> to vector<256x1xf32>
    %cst_28 = arith.constant 1.280000e+02 : f32
    %57 = vector.broadcast %cst_28 : f32 to vector<256x1xf32>
    %58 = arith.divf %56, %57 : vector<256x1xf32>
    %59 = vector.broadcast %58 : vector<256x1xf32> to vector<256x128xf32>
    %60 = arith.subf %52, %59 : vector<256x128xf32>
    %61 = arith.mulf %60, %60 : vector<256x128xf32>
    %cst_29 = arith.constant dense<0.000000e+00> : vector<256xf32>
    %62 = vector.multi_reduction <add>, %61, %cst_29 [1] : vector<256x128xf32> to vector<256xf32>
    %63 = vector.shape_cast %62 : vector<256xf32> to vector<256x1xf32>
    %cst_30 = arith.constant 1.280000e+02 : f32
    %64 = vector.broadcast %cst_30 : f32 to vector<256x1xf32>
    %65 = arith.divf %63, %64 : vector<256x1xf32>
    %cst_31 = arith.constant 9.99999974E-6 : f32
    %66 = vector.broadcast %cst_31 : f32 to vector<256x1xf32>
    %67 = arith.addf %65, %66 : vector<256x1xf32>
    %68 = math.rsqrt %67 : vector<256x1xf32>
    %69 = vector.broadcast %68 : vector<256x1xf32> to vector<256x128xf32>
    %70 = arith.mulf %60, %69 : vector<256x128xf32>
    %71 = vector.broadcast %53 : vector<1x128xf32> to vector<256x128xf32>
    %72 = arith.mulf %70, %71 : vector<256x128xf32>
    %73 = vector.broadcast %54 : vector<1x128xf32> to vector<256x128xf32>
    %74 = arith.addf %72, %73 : vector<256x128xf32>
    %75 = arith.truncf %74 : vector<256x128xf32> to vector<256x128xbf16>
    %c0_32 = arith.constant 0 : index
    %c0_33 = arith.constant 0 : index
    %76 = vector.load %arg10[%c0_32, %c0_33] : memref<128x256xbf16, #tpu.memory_space<vmem>>, vector<128x256xbf16>
    %cst_34 = arith.constant dense<0.000000e+00> : vector<256x256xf32>
    %77 = tpu.matmul %75, %76, %cst_34 {dimension_numbers = #tpu.dot_dimension_numbers<[1], [0], [0], [1], [0, 0, 1, 1], [], []>} : vector<256x128xbf16>, vector<128x256xbf16>, vector<256x256xf32> -> vector<256x256xf32>
    %c0_35 = arith.constant 0 : index
    %c0_36 = arith.constant 0 : index
    %78 = vector.load %arg11[%c0_35, %c0_36] : memref<1x256xf32, #tpu.memory_space<vmem>>, vector<1x256xf32>
    %79 = vector.broadcast %78 : vector<1x256xf32> to vector<256x256xf32>
    %80 = arith.addf %77, %79 : vector<256x256xf32>
    %cst_37 = arith.constant 5.000000e-01 : f32
    %81 = vector.broadcast %cst_37 : f32 to vector<256x256xf32>
    %82 = arith.mulf %81, %80 : vector<256x256xf32>
    %cst_38 = arith.constant 0.707106769 : f32
    %83 = vector.broadcast %cst_38 : f32 to vector<256x256xf32>
    %84 = arith.mulf %80, %83 : vector<256x256xf32>
    %85 = math.erf %84 : vector<256x256xf32>
    %cst_39 = arith.constant 1.000000e+00 : f32
    %86 = vector.broadcast %cst_39 : f32 to vector<256x256xf32>
    %87 = arith.addf %86, %85 : vector<256x256xf32>
    %88 = arith.mulf %82, %87 : vector<256x256xf32>
    %89 = arith.truncf %88 : vector<256x256xf32> to vector<256x256xbf16>
    %c0_40 = arith.constant 0 : index
    %c0_41 = arith.constant 0 : index
    %90 = vector.load %arg12[%c0_40, %c0_41] : memref<256x128xbf16, #tpu.memory_space<vmem>>, vector<256x128xbf16>
    %cst_42 = arith.constant dense<0.000000e+00> : vector<256x128xf32>
    %91 = tpu.matmul %89, %90, %cst_42 {dimension_numbers = #tpu.dot_dimension_numbers<[1], [0], [0], [1], [0, 0, 1, 1], [], []>} : vector<256x256xbf16>, vector<256x128xbf16>, vector<256x128xf32> -> vector<256x128xf32>
    %c0_43 = arith.constant 0 : index
    %c0_44 = arith.constant 0 : index
    %92 = vector.load %arg13[%c0_43, %c0_44] : memref<1x128xf32, #tpu.memory_space<vmem>>, vector<1x128xf32>
    %93 = vector.broadcast %92 : vector<1x128xf32> to vector<256x128xf32>
    %94 = arith.addf %91, %93 : vector<256x128xf32>
    %95 = arith.addf %52, %94 : vector<256x128xf32>
    %96 = vector.shape_cast %95 : vector<256x128xf32> to vector<16x16x128xf32>
    %c0_45 = arith.constant 0 : index
    %c0_46 = arith.constant 0 : index
    %c0_47 = arith.constant 0 : index
    %97 = vector.load %arg14[%c0_45, %c0_46, %c0_47] : memref<16x16x128xf32, #tpu.memory_space<vmem>>, vector<16x16x128xf32>
    tpu.vector_store %arg14[%c0_45, %c0_46, %c0_47], %96 {strides = array<i32>} : memref<16x16x128xf32, #tpu.memory_space<vmem>>, vector<16x16x128xf32>,
    return
  }
  func.func @transform_0(%arg0: i32) -> (i32, i32, i32) {
    %c0_i32 = arith.constant 0 : i32
    %c0_i32_0 = arith.constant 0 : i32
    %c0_i32_1 = arith.constant 0 : i32
    return %arg0, %c0_i32, %c0_i32_0 : i32, i32, i32
  }
  func.func @transform_1(%arg0: i32) -> (i32, i32) {
    %c0_i32 = arith.constant 0 : i32
    %c0_i32_0 = arith.constant 0 : i32
    %c0_i32_1 = arith.constant 0 : i32
    return %c0_i32, %c0_i32_0 : i32, i32
  }
  func.func @transform_2(%arg0: i32) -> (i32, i32) {
    %c0_i32 = arith.constant 0 : i32
    %c0_i32_0 = arith.constant 0 : i32
    %c0_i32_1 = arith.constant 0 : i32
    return %c0_i32, %c0_i32_0 : i32, i32
  }
  func.func @transform_3(%arg0: i32) -> (i32, i32) {
    %c0_i32 = arith.constant 0 : i32
    %c0_i32_0 = arith.constant 0 : i32
    %c0_i32_1 = arith.constant 0 : i32
    return %c0_i32, %c0_i32_0 : i32, i32
  }
  func.func @transform_4(%arg0: i32) -> (i32, i32) {
    %c0_i32 = arith.constant 0 : i32
    %c0_i32_0 = arith.constant 0 : i32
    %c0_i32_1 = arith.constant 0 : i32
    return %c0_i32, %c0_i32_0 : i32, i32
  }
  func.func @transform_5(%arg0: i32) -> (i32, i32) {
    %c0_i32 = arith.constant 0 : i32
    %c0_i32_0 = arith.constant 0 : i32
    %c0_i32_1 = arith.constant 0 : i32
    return %c0_i32, %c0_i32_0 : i32, i32
  }
  func.func @transform_6(%arg0: i32) -> (i32, i32) {
    %c0_i32 = arith.constant 0 : i32
    %c0_i32_0 = arith.constant 0 : i32
    %c0_i32_1 = arith.constant 0 : i32
    return %c0_i32, %c0_i32_0 : i32, i32
  }
  func.func @transform_7(%arg0: i32) -> (i32, i32) {
    %c0_i32 = arith.constant 0 : i32
    %c0_i32_0 = arith.constant 0 : i32
    %c0_i32_1 = arith.constant 0 : i32
    return %c0_i32, %c0_i32_0 : i32, i32
  }
  func.func @transform_8(%arg0: i32) -> (i32, i32) {
    %c0_i32 = arith.constant 0 : i32
    %c0_i32_0 = arith.constant 0 : i32
    %c0_i32_1 = arith.constant 0 : i32
    return %c0_i32, %c0_i32_0 : i32, i32
  }
  func.func @transform_9(%arg0: i32) -> (i32, i32) {
    %c0_i32 = arith.constant 0 : i32
    %c0_i32_0 = arith.constant 0 : i32
    %c0_i32_1 = arith.constant 0 : i32
    return %c0_i32, %c0_i32_0 : i32, i32
  }
  func.func @transform_10(%arg0: i32) -> (i32, i32) {
    %c0_i32 = arith.constant 0 : i32
    %c0_i32_0 = arith.constant 0 : i32
    %c0_i32_1 = arith.constant 0 : i32
    return %c0_i32, %c0_i32_0 : i32, i32
  }
  func.func @transform_11(%arg0: i32) -> (i32, i32) {
    %c0_i32 = arith.constant 0 : i32
    %c0_i32_0 = arith.constant 0 : i32
    %c0_i32_1 = arith.constant 0 : i32
    return %c0_i32, %c0_i32_0 : i32, i32
  }
  func.func @transform_12(%arg0: i32) -> (i32, i32) {
    %c0_i32 = arith.constant 0 : i32
    %c0_i32_0 = arith.constant 0 : i32
    %c0_i32_1 = arith.constant 0 : i32
    return %c0_i32, %c0_i32_0 : i32, i32
  }
  func.func @transform_13(%arg0: i32) -> (i32, i32, i32) {
    %c0_i32 = arith.constant 0 : i32
    %c0_i32_0 = arith.constant 0 : i32
    %c0_i32_1 = arith.constant 0 : i32
    return %arg0, %c0_i32, %c0_i32_0 : i32, i32, i32
  }
}

</mosaic_0001>

<bundles_post_ra>
// kernel: tpu_custom_call.1
= control target key start
LH: loop header
LB: loop body
LE: loop exit
PB: predicated region body
PF: predicated region fallthrough
CT: control target
= control target key end

     0   :  { %s9758_s0 = inlined_call_operand.hbm [shape: f32[32,16,128], index: 0, kind: input, shape index: {}]   ;;  %s9759_s1 = inlined_call_operand.hbm [shape: f32[1,128], index: 1, kind: input, shape index: {}]   ;;  %s9760_s2 = inlined_call_operand.hbm [shape: f32[1,128], index: 2, kind: input, shape index: {}]   ;;  %s9761_s3 = inlined_call_operand.vmem [shape: bf16[64,16], index: 3, kind: input, shape index: {}]   ;;  %s9762_s4 = inlined_call_operand.vmem [shape: f32[64,1], index: 4, kind: input, shape index: {}]   ;;  %s9763_s5 = inlined_call_operand.vmem [shape: bf16[16,64], index: 5, kind: input, shape index: {}]   ;;  %s9764_s6 = inlined_call_operand.vmem [shape: f32[16,1], index: 6, kind: input, shape index: {}]   ;;  %s9765_s7 = inlined_call_operand.hbm [shape: f32[1,128], index: 7, kind: input, shape index: {}]   ;;  %s9766_s8 = inlined_call_operand.hbm [shape: f32[1,128], index: 8, kind: input, shape index: {}]   ;;  %s9767_s9 = inlined_call_operand.vmem [shape: bf16[128,256], index: 9, kind: input, shape index: {}]   ;;  %s9768_s10 = inlined_call_operand.vmem [shape: f32[1,256], index: 10, kind: input, shape index: {}]   ;;  %s9769_s11 = inlined_call_operand.hbm [shape: bf16[256,128], index: 11, kind: input, shape index: {}]   ;;  %s9770_s12 = inlined_call_operand.vmem [shape: f32[1,128], index: 12, kind: input, shape index: {}]   ;;  %s9771_s13 = inlined_call_operand.hbm [shape: f32[32,16,128], index: 13, kind: output, shape index: {}]  }
   0x1   :  { %9800 = sst [smem:[#allocation34_spill]] %s9759_s1 }
   0x2   :  { %9801 = sst [smem:[#allocation35_spill]] %s9760_s2 }
   0x3   :  { %9802 = sst [smem:[#allocation36_spill]] %s9765_s7 }
   0x4   :  { %9803 = sst [smem:[#allocation37_spill]] %s9766_s8 }
   0x5   :  { %9804 = sst [smem:[#allocation38_spill]] %s9769_s11 }
   0x6   :  { %18 = vsyncpa [#allocation3], 0 }
   0x7   :  { %20 = vsyncpa [#allocation3 + $0x1], 0 }
   0x8   :  { %21 = vsyncpa [#allocation6], 0 }
   0x9   :  { %22 = vsyncpa [#allocation9], 0 }
   0xa   :  { %23 = vsyncpa [#allocation12], 0 }
   0xb   :  { %24 = vsyncpa [#allocation4], 0 }
   0xc   :  { %26 = vsyncpa [#allocation4 + $0x1], 0  ;;  %s6974_s25 = smov 0   ;;  %s6976_s26 = smov 0  }
   0xd   :  { %s6978_s27 = smov 0   ;;  %s6980_s28 = smov 0  }
   0xe LB: > { %9805 = sst [smem:[#allocation19_spill]] %s6882_s27  ;;  %s6888_s29 = smov [#allocation5]   ;;  %s6886_s28 = sphi %s6980_s28, %s9919_s28   ;;  %s6882_s27 = sphi %s6978_s27, %s9916_s27   ;;  %s6878_s26 = sphi %s6976_s26, %s9918_s26   ;;  %s6874_s25 = sphi %s6974_s25, %s9917_s25  }
   0xf   : > { %s354_s30 = sshll.u32 %s6888_s29, 4  ;;  %s6995_s14 = sadd.s32 4294967295, %s6886_s28   ;;  %s355_s30 = int_to_ptr.vmem [resolvable:$true] %s354_s30 }
  0x10   : > { %p5179_p0 = scmp.ge.s32.totalorder %s6886_s28, 1  ;;  %p9772_p1 = scmp.eq.s32.totalorder %s6995_s14, 0 }
  0x11   : > { %p341_p2 = scmp.lt.s32.totalorder %s6886_s28, 3  ;;  %s6889_s16 = smov [#allocation8]  }
  0x12   : > { %s388_s17 = sshll.u32 %s6889_s16, 4  ;;  %s6890_s18 = smov [#allocation7]   ;;  %s7007_s17 = int_to_ptr.vmem [resolvable:$true] %s388_s17 }
  0x13   : > { %p7000_p3 = pnand %p5179_p0, %p341_p2  ;;  %s365_s19 = sshll.u32 %s6890_s18, 4  ;;  %s7015_s19 = int_to_ptr.vmem [resolvable:$true] %s365_s19 }
  0x14   : > { %s6891_s21 = smov [#allocation10]   ;;  %s6663_s24 = scalar_lea.vmem %s355_s30, 16 }
  0x15   : > { %s9806_s15 = scalar_select %p7000_p3, 1, 0 }
  0x16   : > { %p5978_p5 = pneg %p7000_p3  ;;  %s7017_s22 = sshll.u32 %s6891_s21, 4  ;;  %s400_s22 = int_to_ptr.vmem [resolvable:$true] %s7017_s22 }
  0x17   : > { %p6664_p8 = scmp.ne.s32.totalorder %s355_s30, %s6663_s24  ;;  %s6670_s29 = scalar_lea.vmem %s355_s30, 32 }
  0x18   : > { %p7011_p6 = pnand %p5978_p5, %p9772_p1  ;;  %p6671_p11 = scmp.lt.s32.totalorder %s355_s30, %s355_s30 }
  0x19   : > { %p6672_p12 = scmp.lt.s32.totalorder %s6670_s29, %s6663_s24 }
  0x1a   : > { %p7021_p7 = pneg %p7011_p6 }
  0x1b   : > { %p6673_p13 = por %p6672_p12, %p6671_p11 }
  0x1c   : > { %p6666_p9 = pnand %p6664_p8, %p7021_p7 }
  0x1e   : > { %p6667_p10 = pneg %p6666_p9 }
  0x20   : > { %p6674_p0 = pnand %p6673_p13, %p6667_p10 }
  0x22   : > { %6677 = shalt.err (!%p6674_p0)
}
  0x23   : > { %s9809_s1 = sld [smem:[#allocation34_spill]]  ;;  %s6689_s21 = scalar_lea.vmem %s7007_s17, 16 }
  0x24   : > { %p6690_p2 = scmp.ne.s32.totalorder %s7007_s17, %s6689_s21  ;;  %s6696_s24 = scalar_lea.vmem %s7007_s17, 32 }
  0x25   : > { %p6697_p9 = scmp.lt.s32.totalorder %s7007_s17, %s7007_s17  ;;  %p6698_p10 = scmp.lt.s32.totalorder %s6696_s24, %s6689_s21 }
  0x26   : > { %p6692_p5 = pnand %p6690_p2, %p7021_p7 }
  0x27   : > { %p6699_p11 = por %p6698_p10, %p6697_p9 }
  0x28   : > { %p6693_p8 = pneg %p6692_p5 }
  0x29   : > { %5981 = dma.hbm_to_vmem [thread:$0]  (!%p7011_p6), %s9809_s1, 16, %s355_s30, [#allocation6]  }
  0x2a   : > { %p6700_p12 = pnand %p6699_p11, %p6693_p8 }
  0x2c   : > { %6703 = shalt.err (!%p6700_p12)
}
  0x2d   : > { %s9810_s7 = sld [smem:[#allocation36_spill]]  ;;  %s6715_s30 = scalar_lea.vmem %s7015_s19, 16 }
  0x2e   : > { %p6716_p13 = scmp.ne.s32.totalorder %s7015_s19, %s6715_s30  ;;  %s6722_s18 = scalar_lea.vmem %s7015_s19, 32 }
  0x2f   : > { %p6723_p5 = scmp.lt.s32.totalorder %s7015_s19, %s7015_s19  ;;  %p6724_p8 = scmp.lt.s32.totalorder %s6722_s18, %s6715_s30 }
  0x30   : > { %p6718_p0 = pnand %p6716_p13, %p7021_p7 }
  0x31   : > { %p6725_p9 = por %p6724_p8, %p6723_p5 }
  0x32   : > { %p6719_p2 = pneg %p6718_p0 }
  0x33   : > { %5987 = dma.hbm_to_vmem [thread:$0]  (!%p7011_p6), %s9810_s7, 16, %s7007_s17, [#allocation9]  }
  0x34   : > { %p6726_p10 = pnand %p6725_p9, %p6719_p2 }
  0x36   : > { %6729 = shalt.err (!%p6726_p10)
}
  0x37   : > { %s9811_s2 = sld [smem:[#allocation35_spill]]  ;;  %s6892_s17 = smov [#allocation11]  }
  0x38   : > { %s415_s29 = sshll.u32 %s6892_s17, 4  ;;  %s6741_s16 = scalar_lea.vmem %s400_s22, 16  ;;  %s416_s29 = int_to_ptr.vmem [resolvable:$true] %s415_s29 }
  0x39   : > { %p6742_p11 = scmp.ne.s32.totalorder %s400_s22, %s6741_s16  ;;  %s6748_s30 = scalar_lea.vmem %s400_s22, 32 }
  0x3a   : > { %p6749_p0 = scmp.lt.s32.totalorder %s400_s22, %s400_s22  ;;  %p6750_p2 = scmp.lt.s32.totalorder %s6748_s30, %s6741_s16 }
  0x3b   : > { %p6744_p12 = pnand %p6742_p11, %p7021_p7 }
  0x3c   : > { %p6751_p5 = por %p6750_p2, %p6749_p0 }
  0x3d   : > { %5984 = dma.hbm_to_vmem [thread:$0]  (!%p7011_p6), %s9811_s2, 16, %s7015_s19, [#allocation6]  }
  0x3e   : > { %p6745_p13 = pneg %p6744_p12 }
  0x40   : > { %p6752_p8 = pnand %p6751_p5, %p6745_p13 }
  0x42   : > { %6755 = shalt.err (!%p6752_p8)
}
  0x43   : > { %s9812_s8 = sld [smem:[#allocation37_spill]]  ;;  %s6767_s19 = scalar_lea.vmem %s416_s29, 2048 }
  0x44   : > { %p6768_p9 = scmp.ne.s32.totalorder %s416_s29, %s6767_s19  ;;  %p6775_p12 = scmp.lt.s32.totalorder %s416_s29, %s416_s29 }
  0x45   : > { %p6776_p4 = scmp.lt.s32.totalorder %s6767_s19, %s6767_s19 }
  0x46   : > { %p6770_p10 = pnand %p6768_p9, %p7021_p7 }
  0x47   : > { %p6777_p1 = por %p6776_p4, %p6775_p12 }
  0x48   : > { %p6771_p11 = pneg %p6770_p10 }
  0x49   : > { %5990 = dma.hbm_to_vmem [thread:$0]  (!%p7011_p6), %s9812_s8, 16, %s400_s22, [#allocation9]  }
  0x4a   : > { %p6778_p3 = pnand %p6777_p1, %p6771_p11 }
  0x4c   : > { %6781 = shalt.err (!%p6778_p3)
}
  0x4d   : > { %s6893_s24 = smov 64   ;;  %s6894_s22 = smov 4  }
  0x4e   : > { %s9813_s11 = sld [smem:[#allocation38_spill]]  ;;  %s5178_s16 = sadd.s32 4294967294, %s6886_s28  }
  0x4f   : > { %s7075_s30 = sadd.s32 1, %s6886_s28   ;;  %s39_s18 = sadd.s32 1, %s6882_s27 }
  0x50   : > { %s36_s21 = ssub.s32 %s6886_s28, %s7075_s30  ;;  %p46_p1 = scmp.ne.s32.totalorder %s6882_s27, %s6878_s26 }
  0x51   : > { %p37_p3 = scmp.eq.s32.totalorder %s36_s21, 0  ;;  %p47_p4 = scmp.eq.s32.totalorder %s6886_s28, 0 }
  0x52   : > { %p52_p7 = scmp.ne.s32.totalorder %s6878_s26, %s6874_s25  ;;  %p328_p13 = scmp.eq.s32.totalorder %s6995_s14, 1 }
  0x53   : > { %s7087_s19 = scalar_select %p37_p3, %s6882_s27, %s39_s18  }
  0x54   : > { %5993 = dma.hbm_to_vmem [thread:$0]  (!%p7011_p6), %s9813_s11, 2048, %s416_s29, [#allocation12], %s6893_s24, %s6893_s24, %s6894_s22  }
  0x55   : > { %9814 = sst [smem:[#allocation20_spill]] %s7087_s19  ;;  %p48_p0 = por %p47_p4, %p46_p1 }
  0x56   : > { %p9815_p2 = scmp.eq.s32.totalorder %s6995_s14, 0  ;;  %p7095_p6 = por %p328_p13, %p46_p1 }
  0x57   : > { %p334_p8 = scmp.eq.s32.totalorder %s5178_s16, 1  ;;  %p6007_p9 = scmp.lt.s32.totalorder %s6886_s28, 2 }
  0x58   : > { %p7091_p5 = por %p9815_p2, %p52_p7  ;;  %s432_s24 = sand.u32 1, %s6882_s27  }
  0x59   : > { %s9817_s29 = scalar_select %p7095_p6, 1, 0 }
  0x5a   : > { %s9816_s20 = scalar_select %p7091_p5, 1, 0 }
  0x5b   : > { %p7101_p10 = por %p334_p8, %p52_p7  ;;  %s5186_s23 = sshll.u32 %s432_s24, 8 }
  0x5c   : > { %s5327_s17 = sshll.u32 %s6886_s28, 12  ;;  %s436_s2 = scalar_lea.vmem [#allocation2], %s5186_s23 }
  0x5d   : > { %s9818_s22 = scalar_select %p7101_p10, 1, 0 }
  0x5e   : > { %s7109_s1 = scalar_lea.hbm %s9758_s0, %s5327_s17  ;;  %s444_s7 = sshll.u32 %s436_s2, 4  ;;  %s7115_s7 = int_to_ptr.vmem [resolvable:$true] %s444_s7 }
  0x5f   : > { %p7111_p11 = pnand %p6007_p9, %p48_p0  ;;  %s7117_s8 = scalar_lea.sflag [#allocation3], %s432_s24 }
  0x60   : > { %s6782_s11 = scalar_lea.hbm %s7109_s1, 4096  ;;  %s6787_s23 = scalar_lea.hbm %s9758_s0, 8192 }
  0x61   : > { %p6783_p12 = scmp.ne.s32.totalorder %s7109_s1, %s6782_s11  ;;  %p6784_p1 = pneg %p7111_p11 }
  0x62   : > { %p6788_p7 = scmp.lt.s32.totalorder %s7109_s1, %s9758_s0  ;;  %p6789_p13 = scmp.lt.s32.totalorder %s6787_s23, %s6782_s11 }
  0x63   : > { %p6785_p3 = pnand %p6784_p1, %p6783_p12 }
  0x64   : > { %p6790_p0 = por %p6789_p13, %p6788_p7 }
  0x65   : > { %p6786_p4 = pneg %p6785_p3 }
  0x67   : > { %p6791_p2 = pnand %p6790_p0, %p6786_p4 }
  0x69   : > { %6794 = shalt.err (!%p6791_p2)
}
  0x6a   : > { %s6795_s24 = scalar_lea.vmem %s7115_s7, 4096  ;;  %s6895_s19 = smov [#allocation2]  }
  0x6b   : > { %p6796_p8 = scmp.ne.s32.totalorder %s7115_s7, %s6795_s24  ;;  %s6800_s27 = sshll.u32 %s6895_s19, 4  ;;  %s6801_s27 = int_to_ptr.vmem [resolvable:$false] %s6800_s27 }
  0x6c   : > { %s6802_s17 = scalar_lea.vmem %s6801_s27, 8192  ;;  %p6803_p3 = scmp.lt.s32.totalorder %s7115_s7, %s6801_s27 }
  0x6d   : > { %p6798_p9 = pnand %p6796_p8, %p6784_p1  ;;  %p6804_p10 = scmp.lt.s32.totalorder %s6802_s17, %s6795_s24 }
  0x6f   : > { %p6799_p12 = pneg %p6798_p9  ;;  %p6805_p6 = por %p6804_p10, %p6803_p3 }
  0x71   : > { %p6806_p5 = pnand %p6805_p6, %p6799_p12 }
  0x73   : > { %6809 = shalt.err (!%p6806_p5)
}
  0x74   : > { %s6896_s11 = smov 128   ;;  %s6897_s18 = smov 8  }
  0x75   : > { %5997 = dma.hbm_to_vmem [thread:$0]  (!%p7111_p11), %s7109_s1, 4096, %s7115_s7, %s7117_s8, %s6896_s11, %s6896_s11, %s6897_s18  }
  0x76   : > { %p9820_p1 = scmp.ne.s32.totalorder %s9806_s15, 0 }
  0x78   : > { %456 = sbr.rel (%p9820_p1) target bundleno = 1878 (0x756), region = 72 }
  0x7d   : > { %s7141_s19 = sand.u32 1, %s6878_s26   ;;  %p9821_p5 = scmp.ne.s32.totalorder %s9816_s20, 0 }
  0x7e   : > { %s5191_s27 = sshll.u32 %s7141_s19, 8  ;;  %s459_s23 = scalar_lea.sflag [#allocation3], %s7141_s19 }
  0x7f   : > { %s7147_s2 = scalar_lea.vmem [#allocation2], %s5191_s27 }
  0x80   : > { %6853 = dma.done.wait (%p9821_p5), %s459_s23, 4096  }
  0x81   : > { %6855 = vsyncadd (%p9821_p5), %s459_s23, 4294963200  ;;  %p9822_p6 = scmp.eq.s32.totalorder %s6995_s14, 0 }
  0x83   : > { %6857 = dma.done.wait (%p9822_p6), [#allocation6], 32   ;;  %p9823_p10 = pmov %p9822_p6 }
  0x84   : > { %p9824_p11 = pmov %p9822_p6 }
  0x85   : > { %6859 = vsyncadd (%p9823_p10), [#allocation6], 4294967264 }
  0x86   : > { %6861 = dma.done.wait (%p9824_p11), [#allocation9], 32   ;;  %p9825_p4 = pmov %p9822_p6 }
  0x88   : > { %6863 = vsyncadd (%p9825_p4), [#allocation9], 4294967264  ;;  %p9826_p7 = pmov %p9825_p4 }
  0x89   : > { %p9827_p13 = pmov %p9825_p4 }
  0x8a   : > { %6865 = dma.done.wait (%p9826_p7), [#allocation12], 2048  }
  0x8b   : > { %6867 = vsyncadd (%p9827_p13), [#allocation12], 4294965248  ;;  %v528_v0 = vld [vmem:[%s7147_s2] sm:$0xff]  ;;  %v530_v1 = vld [vmem:[%s7147_s2 + $0x10] sm:$0xff]  ;;  %vm1083_vm0 = vcmask 130048   ;;  %vm6900_vm1 = vmmov 0  }
  0x8c   : > { %562 = vadd.xlane.f32.xlu0 %v528_v0  ;;  %566 = vadd.xlane.f32.xlu1 %v530_v1  ;;  %v529_v2 = vld [vmem:[%s7147_s2 + $0x8] sm:$0xff]  ;;  %v531_v3 = vld [vmem:[%s7147_s2 + $0x18] sm:$0xff]  ;;  %v532_v4 = vld [vmem:[%s7147_s2 + $0x20] sm:$0xff]  ;;  %vm2847_vm2 = vcmask 523264   ;;  %s9612_s24 = scalar_lea.vmem [#allocation13], %s5191_s27  ;;  %s5329_s27 = sshll.u32 %s6995_s14, 12 }
  0x8d   : > { %v7171_v5 = vld [vmem:[%s7147_s2 + $0x28] sm:$0xff]  ;;  %v7174_v6 = vld [vmem:[%s7147_s2 + $0x30] sm:$0xff]  ;;  %v7177_v7 = vld [vmem:[%s7147_s2 + $0x38] sm:$0xff]  ;;  %s5057_s17 = sshll.u32 %s9612_s24, 4  ;;  %s9711_s23 = scalar_lea.hbm %s9771_s13, %s5329_s27  ;;  %s9713_s17 = int_to_ptr.vmem [resolvable:$true] %s5057_s17 }
  0x8e   : > { %v7181_v8 = vld [vmem:[%s7147_s2 + $0x40] sm:$0xff]  ;;  %v7184_v9 = vld [vmem:[%s7147_s2 + $0x48] sm:$0xff]  ;;  %v7189_v10 = vld [vmem:[%s7147_s2 + $0x50] sm:$0xff]  ;;  %s5043_s1 = scalar_lea.sflag [#allocation4], %s7141_s19  ;;  %s6810_s7 = scalar_lea.vmem %s9713_s17, 4096 }
  0x8f   : > { %v7194_v11 = vld [vmem:[%s7147_s2 + $0x58] sm:$0xff]  ;;  %v7197_v12 = vld [vmem:[%s7147_s2 + $0x60] sm:$0xff]  ;;  %v7200_v13 = vld [vmem:[%s7147_s2 + $0x68] sm:$0xff]  ;;  %p6811_p0 = scmp.ne.s32.totalorder %s9713_s17, %s6810_s7  ;;  %p9912_p2 = scmp.ne.s32.totalorder %s9817_s29, 0 }
  0x90   : > { %564 = vadd.xlane.f32.xlu0 %v529_v2  ;;  %568 = vadd.xlane.f32.xlu1 %v531_v3  ;;  %v7205_v14 = vld [vmem:[%s7147_s2 + $0x70] sm:$0xff]  ;;  %v7210_v15 = vld [vmem:[%s7147_s2 + $0x78] sm:$0xff]  ;;  %v7215_v16 = vld [vmem:[%s7147_s2 + $0x80] sm:$0xff]  ;;  %s6901_s14 = smov [#allocation13]  }
  0x91   : > { %v7218_v17 = vld [vmem:[%s7147_s2 + $0x88] sm:$0xff]  ;;  %v7223_v18 = vld [vmem:[%s7147_s2 + $0x90] sm:$0xff]  ;;  %v7226_v19 = vld [vmem:[%s7147_s2 + $0x98] sm:$0xff]  ;;  %p6812_p8 = pnand %p6811_p0, %p9912_p2  ;;  %s6814_s8 = sshll.u32 %s6901_s14, 4  ;;  %s6815_s8 = int_to_ptr.vmem [resolvable:$false] %s6814_s8 }
  0x92   : > { %v7239_v32 = vld [vmem:[%s7147_s2 + $0xa0] sm:$0xff]  ;;  %v7249_v38 = vld [vmem:[%s7147_s2 + $0xa8] sm:$0xff]  ;;  %v7257_v43 = vld [vmem:[%s7147_s2 + $0xb0] sm:$0xff]  ;;  %s6816_s15 = scalar_lea.vmem %s6815_s8, 8192  ;;  %p6817_p12 = scmp.lt.s32.totalorder %s9713_s17, %s6815_s8 }
  0x93   : > { %v7266_v48 = vld [vmem:[%s7147_s2 + $0xb8] sm:$0xff]  ;;  %v7275_v53 = vld [vmem:[%s7147_s2 + $0xc0] sm:$0xff]  ;;  %v7284_v58 = vld [vmem:[%s7147_s2 + $0xc8] sm:$0xff]  ;;  %p6813_p9 = pneg %p6812_p8  ;;  %p6818_p3 = scmp.lt.s32.totalorder %s6816_s15, %s6810_s7 }
  0x94   : > { %570 = vadd.xlane.f32.xlu0 %v532_v4  ;;  %572 = vadd.xlane.f32.xlu1 %v7171_v5 }
  0x95   : > { %p6819_p1 = por %p6818_p3, %p6817_p12 }
  0x97   : > { %p6820_p5 = pnand %p6819_p1, %p6813_p9 }
  0x98   : > { %574 = vadd.xlane.f32.xlu0 %v7174_v6  ;;  %576 = vadd.xlane.f32.xlu1 %v7177_v7 }
  0x9c   : > { %578 = vadd.xlane.f32.xlu0 %v7181_v8  ;;  %580 = vadd.xlane.f32.xlu1 %v7184_v9 }
  0xa0   : > { %582 = vadd.xlane.f32.xlu0 %v7189_v10  ;;  %584 = vadd.xlane.f32.xlu1 %v7194_v11 }
  0xa4   : > { %586 = vadd.xlane.f32.xlu0 %v7197_v12  ;;  %588 = vadd.xlane.f32.xlu1 %v7200_v13 }
  0xa8   : > { %590 = vadd.xlane.f32.xlu0 %v7205_v14  ;;  %592 = vadd.xlane.f32.xlu1 %v7210_v15 }
  0xac   : > { %594 = vadd.xlane.f32.xlu0 %v7215_v16  ;;  %596 = vadd.xlane.f32.xlu1 %v7218_v17 }
  0xb0   : > { %598 = vadd.xlane.f32.xlu0 %v7223_v18  ;;  %600 = vadd.xlane.f32.xlu1 %v7226_v19 }
 0x115   : > { %v563_v20 = vpop.xlane.xlu0 %562  ;;  %v567_v21 = vpop.xlane.xlu1 %566 }
 0x116   : > { %v627_v22 = vmul.f32 0.0078125, %v563_v20  ;;  %v629_v24 = vmul.f32 0.0078125, %v567_v21 }
 0x118   : > { %v7230_v23 = vsub.f32 %v528_v0, %v627_v22  ;;  %v7236_v31 = vsub.f32 %v530_v1, %v629_v24  ;;  %v7293_v0 = vld [vmem:[%s7147_s2 + $0xd0] sm:$0xff]  ;;  %v7311_v22 = vld [vmem:[%s7147_s2 + $0xe0] sm:$0xff] }
 0x119   : > { %v565_v25 = vpop.xlane.xlu0 %564  ;;  %v569_v26 = vpop.xlane.xlu1 %568 }
 0x11a   : > { %v628_v27 = vmul.f32 0.0078125, %v565_v25  ;;  %v691_v28 = vmul.f32 %v7230_v23, %v7230_v23  ;;  %v630_v30 = vmul.f32 0.0078125, %v569_v26  ;;  %v693_v35 = vmul.f32 %v7236_v31, %v7236_v31 }
 0x11c   : > { %723 = vadd.xlane.f32.xlu0 %v691_v28  ;;  %v7234_v29 = vsub.f32 %v529_v2, %v628_v27  ;;  %v7246_v37 = vsub.f32 %v531_v3, %v630_v30  ;;  %v7320_v27 = vld [vmem:[%s7147_s2 + $0xe8] sm:$0xff] }
 0x11d   : > { %v571_v33 = vpop.xlane.xlu0 %570  ;;  %v573_v39 = vpop.xlane.xlu1 %572 }
 0x11e   : > { %v692_v34 = vmul.f32 %v7234_v29, %v7234_v29  ;;  %v631_v36 = vmul.f32 0.0078125, %v571_v33  ;;  %v694_v40 = vmul.f32 %v7246_v37, %v7246_v37  ;;  %v632_v41 = vmul.f32 0.0078125, %v573_v39 }
 0x120   : > { %602 = vadd.xlane.f32.xlu0 %v7239_v32  ;;  %725 = vadd.xlane.f32.xlu1 %v692_v34  ;;  %v7254_v42 = vsub.f32 %v532_v4, %v631_v36  ;;  %v7263_v47 = vsub.f32 %v7171_v5, %v632_v41  ;;  %v7329_v36 = vld [vmem:[%s7147_s2 + $0xf0] sm:$0xff] }
 0x121   : > { %v575_v44 = vpop.xlane.xlu0 %574  ;;  %v577_v49 = vpop.xlane.xlu1 %576 }
 0x122   : > { %v695_v45 = vmul.f32 %v7254_v42, %v7254_v42  ;;  %v633_v46 = vmul.f32 0.0078125, %v575_v44  ;;  %v696_v50 = vmul.f32 %v7263_v47, %v7263_v47  ;;  %v634_v51 = vmul.f32 0.0078125, %v577_v49 }
 0x124   : > { %727 = vadd.xlane.f32.xlu0 %v693_v35  ;;  %604 = vadd.xlane.f32.xlu1 %v7249_v38  ;;  %v7272_v52 = vsub.f32 %v7174_v6, %v633_v46  ;;  %v7281_v57 = vsub.f32 %v7177_v7, %v634_v51  ;;  %v7302_v6 = vld [vmem:[%s7147_s2 + $0xd8] sm:$0xff] }
 0x125   : > { %v579_v54 = vpop.xlane.xlu0 %578  ;;  %v581_v59 = vpop.xlane.xlu1 %580  ;;  %v7346_v46 = vld [vmem:[%s7147_s2 + $0xf8] sm:$0xff] }
 0x126   : > { %v697_v55 = vmul.f32 %v7272_v52, %v7272_v52  ;;  %v635_v56 = vmul.f32 0.0078125, %v579_v54  ;;  %v698_v61 = vmul.f32 %v7281_v57, %v7281_v57  ;;  %v636_v62 = vmul.f32 0.0078125, %v581_v59 }
 0x128   : > { %606 = vadd.xlane.f32.xlu0 %v7257_v43  ;;  %729 = vadd.xlane.f32.xlu1 %v694_v40  ;;  %v7290_v63 = vsub.f32 %v7181_v8, %v635_v56  ;;  %v7299_v5 = vsub.f32 %v7184_v9, %v636_v62 }
 0x129   : > { %v583_v60 = vpop.xlane.xlu0 %582  ;;  %v585_v1 = vpop.xlane.xlu1 %584 }
 0x12a   : > { %v699_v3 = vmul.f32 %v7290_v63, %v7290_v63  ;;  %v637_v4 = vmul.f32 0.0078125, %v583_v60  ;;  %v700_v8 = vmul.f32 %v7299_v5, %v7299_v5  ;;  %v638_v20 = vmul.f32 0.0078125, %v585_v1 }
 0x12c   : > { %608 = vadd.xlane.f32.xlu1 %v7266_v48  ;;  %731 = vadd.xlane.f32.xlu0 %v695_v45  ;;  %v7308_v21 = vsub.f32 %v7189_v10, %v637_v4  ;;  %v7317_v26 = vsub.f32 %v7194_v11, %v638_v20  ;;  %v7334_v11 = vld [vmem:[%s9761_s3] sm:$0xff]  }
 0x12d   : > { %v587_v2 = vpop.xlane.xlu0 %586  ;;  %v589_v7 = vpop.xlane.xlu1 %588  ;;  %5604 = vmatprep.mubr.msk.bf16.mxu0 %vm1083_vm0, %v7334_v11  ;;  %5614 = vmatprep.mubr.msk.bf16.mxu1 %vm1083_vm0, %v7334_v11 }
 0x12e   : > { %v701_v9 = vmul.f32 %v7308_v21, %v7308_v21  ;;  %v639_v25 = vmul.f32 0.0078125, %v587_v2  ;;  %v640_v30 = vmul.f32 0.0078125, %v589_v7  ;;  %v702_v33 = vmul.f32 %v7317_v26, %v7317_v26 }
 0x130   : > { %733 = vadd.xlane.f32.xlu1 %v696_v50  ;;  %610 = vadd.xlane.f32.xlu0 %v7275_v53  ;;  %v7326_v35 = vsub.f32 %v7197_v12, %v639_v25  ;;  %v7337_v40 = vsub.f32 %v7200_v13, %v640_v30 }
 0x131   : > { %v591_v24 = vpop.xlane.xlu0 %590  ;;  %v593_v28 = vpop.xlane.xlu1 %592 }
 0x132   : > { %v641_v34 = vmul.f32 0.0078125, %v591_v24  ;;  %v642_v39 = vmul.f32 0.0078125, %v593_v28  ;;  %v703_v12 = vmul.f32 %v7326_v35, %v7326_v35  ;;  %v704_v13 = vmul.f32 %v7337_v40, %v7337_v40 }
 0x134   : > { %612 = vadd.xlane.f32.xlu1 %v7284_v58  ;;  %735 = vadd.xlane.f32.xlu0 %v697_v55  ;;  %v7343_v45 = vsub.f32 %v7205_v14, %v641_v34  ;;  %v7355_v50 = vsub.f32 %v7210_v15, %v642_v39 }
 0x135   : > { %v595_v10 = vpop.xlane.xlu0 %594  ;;  %v597_v41 = vpop.xlane.xlu1 %596 }
 0x136   : > { %v643_v44 = vmul.f32 0.0078125, %v595_v10  ;;  %v705_v14 = vmul.f32 %v7343_v45, %v7343_v45  ;;  %v644_v51 = vmul.f32 0.0078125, %v597_v41  ;;  %v706_v59 = vmul.f32 %v7355_v50, %v7355_v50 }
 0x138   : > { %737 = vadd.xlane.f32.xlu1 %v698_v61  ;;  %614 = vadd.xlane.f32.xlu0 %v7293_v0  ;;  %v7361_v55 = vsub.f32 %v7215_v16, %v643_v44  ;;  %v7368_v61 = vsub.f32 %v7218_v17, %v644_v51 }
 0x139   : > { %v599_v49 = vpop.xlane.xlu0 %598  ;;  %v601_v56 = vpop.xlane.xlu1 %600 }
 0x13a   : > { %v645_v54 = vmul.f32 0.0078125, %v599_v49  ;;  %v707_v15 = vmul.f32 %v7361_v55, %v7361_v55  ;;  %v646_v60 = vmul.f32 0.0078125, %v601_v56  ;;  %v708_v16 = vmul.f32 %v7368_v61, %v7368_v61 }
 0x13c   : > { %616 = vadd.xlane.f32.xlu1 %v7302_v6  ;;  %739 = vadd.xlane.f32.xlu0 %v699_v3  ;;  %v7371_v62 = vsub.f32 %v7223_v18, %v645_v54  ;;  %v7378_v2 = vsub.f32 %v7226_v19, %v646_v60  ;;  %v9777_v3 = vmov 0  }
 0x13d   : > { %6061 = vset.pattern.permute.xlu1 %v9777_v3  ;;  %6060 = vset.pattern.permute.xlu0 %v9777_v3 }
 0x13e   : > { %v709_v1 = vmul.f32 %v7371_v62, %v7371_v62  ;;  %v710_v17 = vmul.f32 %v7378_v2, %v7378_v2 }
 0x140   : > { %741 = vadd.xlane.f32.xlu1 %v700_v8  ;;  %618 = vadd.xlane.f32.xlu0 %v7311_v22 }
 0x144   : > { %620 = vadd.xlane.f32.xlu1 %v7320_v27  ;;  %743 = vadd.xlane.f32.xlu0 %v701_v9 }
 0x148   : > { %745 = vadd.xlane.f32.xlu1 %v702_v33  ;;  %622 = vadd.xlane.f32.xlu0 %v7329_v36 }
 0x14c   : > { %624 = vadd.xlane.f32.xlu1 %v7346_v46  ;;  %747 = vadd.xlane.f32.xlu0 %v703_v12 }
 0x150   : > { %749 = vadd.xlane.f32.xlu1 %v704_v13  ;;  %751 = vadd.xlane.f32.xlu0 %v705_v14 }
 0x154   : > { %753 = vadd.xlane.f32.xlu1 %v706_v59  ;;  %755 = vadd.xlane.f32.xlu0 %v707_v15 }
 0x158   : > { %757 = vadd.xlane.f32.xlu1 %v708_v16  ;;  %759 = vadd.xlane.f32.xlu0 %v709_v1 }
 0x15c   : > { %761 = vadd.xlane.f32.xlu1 %v710_v17 }
 0x1a5   : > { %v724_v18 = vpop.xlane.xlu0 %723 }
 0x1a6   : > { %v787_v4 = vmul.f32 0.0078125, %v724_v18 }
 0x1a8   : > { %v819_v7 = vadd.f32 1e-05, %v787_v4 }
 0x1a9   : > { %v726_v8 = vpop.xlane.xlu1 %725  ;;  %v603_v20 = vpop.xlane.xlu0 %602 }
 0x1aa   : > { %6107 = vrsqrt.f32 %v819_v7  ;;  %v788_v24 = vmul.f32 0.0078125, %v726_v8  ;;  %v647_v19 = vmul.f32 0.0078125, %v603_v20  ;;  %v7405_v20 = vld [vmem:[#allocation5] ss:$0 sm:$0xff] }
 0x1ac   : > { %v820_v9 = vadd.f32 1e-05, %v788_v24  ;;  %v7385_v25 = vsub.f32 %v7239_v32, %v647_v19 }
 0x1ad   : > { %v605_v28 = vpop.xlane.xlu1 %604  ;;  %v728_v30 = vpop.xlane.xlu0 %727 }
 0x1ae   : > { %6109 = vrsqrt.f32 %v820_v9  ;;  %v648_v10 = vmul.f32 0.0078125, %v605_v28  ;;  %v789_v33 = vmul.f32 0.0078125, %v728_v30  ;;  %v711_v34 = vmul.f32 %v7385_v25, %v7385_v25 }
 0x1b0   : > { %v821_v39 = vadd.f32 1e-05, %v789_v33  ;;  %763 = vadd.xlane.f32.xlu0 %v711_v34  ;;  %v7390_v41 = vsub.f32 %v7249_v38, %v648_v10 }
 0x1b1   : > { %v730_v12 = vpop.xlane.xlu1 %729  ;;  %v607_v44 = vpop.xlane.xlu0 %606 }
 0x1b2   : > { %6111 = vrsqrt.f32 %v821_v39  ;;  %v790_v49 = vmul.f32 0.0078125, %v730_v12  ;;  %v649_v13 = vmul.f32 0.0078125, %v607_v44  ;;  %v712_v32 = vmul.f32 %v7390_v41, %v7390_v41  ;;  %v7414_v39 = vld [vmem:[#allocation7] ss:$0 sm:$0xff] }
 0x1b4   : > { %v822_v14 = vadd.f32 1e-05, %v790_v49  ;;  %765 = vadd.xlane.f32.xlu1 %v712_v32  ;;  %v7395_v51 = vsub.f32 %v7257_v43, %v649_v13 }
 0x1b5   : > { %v609_v54 = vpop.xlane.xlu1 %608  ;;  %v732_v56 = vpop.xlane.xlu0 %731 }
 0x1b6   : > { %6113 = vrsqrt.f32 %v822_v14  ;;  %v650_v59 = vmul.f32 0.0078125, %v609_v54  ;;  %v791_v15 = vmul.f32 0.0078125, %v732_v56  ;;  %v713_v38 = vmul.f32 %v7395_v51, %v7395_v51 }
 0x1b7   : > { %v6108_v60 = vpop.eup %6107 }
 0x1b8   : > { %v823_v16 = vadd.f32 1e-05, %v791_v15  ;;  %767 = vadd.xlane.f32.xlu0 %v713_v38  ;;  %v7400_v1 = vsub.f32 %v7266_v48, %v650_v59  ;;  %v883_v4 = vmul.f32 %v6108_v60, %v7230_v23 }
 0x1b9   : > { %v734_v17 = vpop.xlane.xlu1 %733  ;;  %v611_v18 = vpop.xlane.xlu0 %610 }
 0x1ba   : > { %6115 = vrsqrt.f32 %v823_v16  ;;  %v792_v43 = vmul.f32 0.0078125, %v734_v17  ;;  %v651_v7 = vmul.f32 0.0078125, %v611_v18  ;;  %v714_v8 = vmul.f32 %v7400_v1, %v7400_v1 }
 0x1bb   : > { %v6110_v24 = vpop.eup %6109  ;;  %v921_v23 = vmul.f32 %v7405_v20, %v883_v4 }
 0x1bc   : > { %v824_v19 = vadd.f32 1e-05, %v792_v43  ;;  %769 = vadd.xlane.f32.xlu1 %v714_v8  ;;  %v7408_v9 = vsub.f32 %v7275_v53, %v651_v7  ;;  %v884_v48 = vmul.f32 %v6110_v24, %v7234_v29 }
 0x1bd   : > { %v613_v28 = vpop.xlane.xlu1 %612  ;;  %v736_v30 = vpop.xlane.xlu0 %735  ;;  %v959_v32 = vadd.f32 %v7414_v39, %v921_v23 }
 0x1be   : > { %6117 = vrsqrt.f32 %v824_v19  ;;  %v652_v10 = vmul.f32 0.0078125, %v613_v28  ;;  %v793_v33 = vmul.f32 0.0078125, %v736_v30  ;;  %v715_v34 = vmul.f32 %v7408_v9, %v7408_v9 }
 0x1bf   : > { %v6112_v12 = vpop.eup %6111  ;;  %v922_v44 = vmul.f32 %v7405_v20, %v884_v48 }
 0x1c0   : > { %v825_v49 = vadd.f32 1e-05, %v793_v33  ;;  %771 = vadd.xlane.f32.xlu0 %v715_v34  ;;  %v7418_v53 = vsub.f32 %v7284_v58, %v652_v10  ;;  %v885_v54 = vmul.f32 %v6112_v12, %v7236_v31  ;;  %v7432_v31 = vld [vmem:[%s9761_s3 + $0x8] sm:$0xff]  }
 0x1c1   : > { %v738_v29 = vpop.xlane.xlu1 %737  ;;  %v615_v13 = vpop.xlane.xlu0 %614  ;;  %v960_v14 = vadd.f32 %v7414_v39, %v922_v44 }
 0x1c2   : > { %6119 = vrsqrt.f32 %v825_v49  ;;  %v794_v56 = vmul.f32 0.0078125, %v738_v29  ;;  %v653_v59 = vmul.f32 0.0078125, %v615_v13  ;;  %v716_v15 = vmul.f32 %v7418_v53, %v7418_v53 }
 0x1c3   : > { %v6114_v38 = vpop.eup %6113  ;;  %v991_v60 = vpack.c.bf16 %v960_v14, %v959_v32  ;;  %v923_v43 = vmul.f32 %v7405_v20, %v885_v54 }
 0x1c4   : > { %v826_v16 = vadd.f32 1e-05, %v794_v56  ;;  %v7426_v58 = vsub.f32 %v7293_v0, %v653_v59  ;;  %773 = vadd.xlane.f32.xlu1 %v716_v15  ;;  %v886_v17 = vmul.f32 %v6114_v38, %v7246_v37  ;;  %v7440_v37 = vld [vmem:[%s9761_s3 + $0x10] sm:$0xff]   ;;  %v7462_v56 = vld [vmem:[%s9761_s3 + $0x18] sm:$0xff]  }
 0x1c5   : > { %5602 = vmatprep.subr.bf16.mxu0 %v991_v60  ;;  %v617_v18 = vpop.xlane.xlu1 %616  ;;  %v740_v4 = vpop.xlane.xlu0 %739  ;;  %v961_v10 = vadd.f32 %v7414_v39, %v923_v43 }
 0x1c6   : > { %6121 = vrsqrt.f32 %v826_v16  ;;  %v654_v7 = vmul.f32 0.0078125, %v617_v18  ;;  %5603 = vmatpush3.bf16.msra.mxu0 %v991_v60  ;;  %v795_v8 = vmul.f32 0.0078125, %v740_v4  ;;  %v717_v0 = vmul.f32 %v7426_v58, %v7426_v58 }
 0x1c7   : > { %v6116_v24 = vpop.eup %6115  ;;  %v924_v19 = vmul.f32 %v7405_v20, %v886_v17 }
 0x1c8   : > { %v827_v48 = vadd.f32 1e-05, %v795_v8  ;;  %775 = vadd.xlane.f32.xlu0 %v717_v0  ;;  %v7444_v28 = vsub.f32 %v7302_v6, %v654_v7  ;;  %v887_v34 = vmul.f32 %v6116_v24, %v7254_v42 }
 0x1c9   : > { %5605 = vmatmul.mubr.msk.bf16.vlgmr.msra.gmra.mxu0 %vm1083_vm0, %v7432_v31  ;;  %v742_v30 = vpop.xlane.xlu1 %741  ;;  %v619_v23 = vpop.xlane.xlu0 %618  ;;  %v962_v33 = vadd.f32 %v7414_v39, %v924_v19 }
 0x1ca   : > { %6123 = vrsqrt.f32 %v827_v48  ;;  %v796_v12 = vmul.f32 0.0078125, %v742_v30  ;;  %v655_v44 = vmul.f32 0.0078125, %v619_v23  ;;  %v718_v49 = vmul.f32 %v7444_v28, %v7444_v28  ;;  %5608 = vmatprep.mubr.msk.bf16.mxu0 %vm1083_vm0, %v7440_v37 }
 0x1cb   : > { %v6118_v6 = vpop.eup %6117  ;;  %v992_v29 = vpack.c.bf16 %v962_v33, %v961_v10  ;;  %v925_v59 = vmul.f32 %v7405_v20, %v887_v34 }
 0x1cc   : > { %v828_v13 = vadd.f32 1e-05, %v796_v12  ;;  %v7456_v32 = vsub.f32 %v7311_v22, %v655_v44  ;;  %777 = vadd.xlane.f32.xlu1 %v718_v49  ;;  %v888_v14 = vmul.f32 %v6118_v6, %v7263_v47 }
 0x1cd   : > { %5612 = vmatprep.subr.bf16.mxu1 %v992_v29  ;;  %v621_v42 = vpop.xlane.xlu1 %620  ;;  %v744_v54 = vpop.xlane.xlu0 %743  ;;  %v963_v43 = vadd.f32 %v7414_v39, %v925_v59 }
 0x1ce   : > { %6125 = vrsqrt.f32 %v828_v13  ;;  %v656_v15 = vmul.f32 0.0078125, %v621_v42  ;;  %5613 = vmatpush3.bf16.msra.mxu1 %v992_v29  ;;  %v797_v38 = vmul.f32 0.0078125, %v744_v54  ;;  %v719_v22 = vmul.f32 %v7456_v32, %v7456_v32 }
 0x1cf   : > { %v6120_v60 = vpop.eup %6119  ;;  %v926_v47 = vmul.f32 %v7405_v20, %v888_v14 }
 0x1d0   : > { %v829_v16 = vadd.f32 1e-05, %v797_v38  ;;  %779 = vadd.xlane.f32.xlu0 %v719_v22  ;;  %v7469_v17 = vsub.f32 %v7320_v27, %v656_v15  ;;  %v889_v8 = vmul.f32 %v6120_v60, %v7272_v52 }
 0x1d1   : > { %5609 = vmatmul.mubr.msk.bf16.gmra.mxu0 %vm1083_vm0, %v7462_v56  ;;  %5615 = vmatmul.mubr.msk.bf16.vlgmr.msra.gmra.mxu1 %vm1083_vm0, %v7432_v31  ;;  %v746_v18 = vpop.xlane.xlu1 %745  ;;  %v623_v4 = vpop.xlane.xlu0 %622  ;;  %v964_v7 = vadd.f32 %v7414_v39, %v926_v47 }
 0x1d2   : > { %6127 = vrsqrt.f32 %v829_v16  ;;  %v798_v0 = vmul.f32 0.0078125, %v746_v18  ;;  %v657_v24 = vmul.f32 0.0078125, %v623_v4  ;;  %v720_v27 = vmul.f32 %v7469_v17, %v7469_v17  ;;  %5618 = vmatprep.mubr.msk.bf16.mxu1 %vm1083_vm0, %v7440_v37  ;;  %5624 = vmatprep.mubr.msk.bf16.mxu0 %vm1083_vm0, %v7334_v11 }
 0x1d3   : > { %v6122_v19 = vpop.eup %6121  ;;  %v993_v48 = vpack.c.bf16 %v964_v7, %v963_v43  ;;  %v927_v34 = vmul.f32 %v7405_v20, %v889_v8 }
 0x1d4   : > { %v830_v30 = vadd.f32 1e-05, %v798_v0  ;;  %v7485_v23 = vsub.f32 %v7329_v36, %v657_v24  ;;  %781 = vadd.xlane.f32.xlu1 %v720_v27  ;;  %v890_v52 = vmul.f32 %v6122_v19, %v7281_v57 }
 0x1d5   : > { %5622 = vmatprep.subr.bf16.mxu0 %v993_v48  ;;  %v625_v10 = vpop.xlane.xlu1 %624  ;;  %v748_v33 = vpop.xlane.xlu0 %747  ;;  %v965_v54 = vadd.f32 %v7414_v39, %v927_v34 }
 0x1d6   : > { %6129 = vrsqrt.f32 %v830_v30  ;;  %v658_v12 = vmul.f32 0.0078125, %v625_v10  ;;  %5623 = vmatpush3.bf16.msra.mxu0 %v993_v48  ;;  %v799_v44 = vmul.f32 0.0078125, %v748_v33  ;;  %v721_v49 = vmul.f32 %v7485_v23, %v7485_v23 }
 0x1d7   : > { %v6124_v6 = vpop.eup %6123  ;;  %v928_v29 = vmul.f32 %v7405_v20, %v890_v52 }
 0x1d8   : > { %v831_v36 = vadd.f32 1e-05, %v799_v44  ;;  %783 = vadd.xlane.f32.xlu0 %v721_v49  ;;  %v7493_v13 = vsub.f32 %v7346_v46, %v658_v12  ;;  %v891_v57 = vmul.f32 %v6124_v6, %v7290_v63 }
 0x1d9   : > { %5619 = vmatmul.mubr.msk.bf16.gmra.mxu1 %vm1083_vm0, %v7462_v56  ;;  %5625 = vmatmul.mubr.msk.bf16.vlgmr.msra.gmra.mxu0 %vm1083_vm0, %v7432_v31  ;;  %v750_v14 = vpop.xlane.xlu1 %749  ;;  %v752_v42 = vpop.xlane.xlu0 %751  ;;  %v966_v59 = vadd.f32 %v7414_v39, %v928_v29 }
 0x1da   : > { %6131 = vrsqrt.f32 %v831_v36  ;;  %v800_v15 = vmul.f32 0.0078125, %v750_v14  ;;  %v801_v38 = vmul.f32 0.0078125, %v752_v42  ;;  %v722_v46 = vmul.f32 %v7493_v13, %v7493_v13  ;;  %5628 = vmatprep.mubr.msk.bf16.mxu0 %vm1083_vm0, %v7440_v37  ;;  %5634 = vmatprep.mubr.msk.bf16.mxu1 %vm1083_vm0, %v7334_v11 }
 0x1db   : > { %v6126_v63 = vpop.eup %6125  ;;  %v994_v22 = vpack.c.bf16 %v966_v59, %v965_v54  ;;  %v929_v60 = vmul.f32 %v7405_v20, %v891_v57 }
 0x1dc   : > { %v832_v47 = vadd.f32 1e-05, %v800_v15  ;;  %v833_v16 = vadd.f32 1e-05, %v801_v38  ;;  %785 = vadd.xlane.f32.xlu1 %v722_v46  ;;  %v892_v18 = vmul.f32 %v6126_v63, %v7299_v5  ;;  %v1022_v46 = vld [vmem:[%s9762_s4 + $0x38] sm:$0xff] }
 0x1dd   : > { %5632 = vmatprep.subr.bf16.mxu1 %v994_v22  ;;  %v754_v4 = vpop.xlane.xlu1 %753  ;;  %v756_v43 = vpop.xlane.xlu0 %755  ;;  %v967_v27 = vadd.f32 %v7414_v39, %v929_v60 }
 0x1de   : > { %6133 = vrsqrt.f32 %v832_v47  ;;  %v802_v7 = vmul.f32 0.0078125, %v754_v4  ;;  %5633 = vmatpush3.bf16.msra.mxu1 %v994_v22  ;;  %v803_v8 = vmul.f32 0.0078125, %v756_v43  ;;  %v930_v0 = vmul.f32 %v7405_v20, %v892_v18 }
 0x1df   : > { %v6128_v24 = vpop.eup %6127  ;;  %6135 = vrsqrt.f32 %v833_v16 }
 0x1e0   : > { %v834_v19 = vadd.f32 1e-05, %v802_v7  ;;  %v835_v48 = vadd.f32 1e-05, %v803_v8  ;;  %v968_v30 = vadd.f32 %v7414_v39, %v930_v0  ;;  %v893_v52 = vmul.f32 %v6128_v24, %v7308_v21 }
 0x1e1   : > { %5629 = vmatmul.mubr.msk.bf16.gmra.mxu0 %vm1083_vm0, %v7462_v56  ;;  %5635 = vmatmul.mubr.msk.bf16.vlgmr.msra.gmra.mxu1 %vm1083_vm0, %v7432_v31  ;;  %v758_v5 = vpop.xlane.xlu1 %757  ;;  %v760_v10 = vpop.xlane.xlu0 %759 }
 0x1e2   : > { %6137 = vrsqrt.f32 %v834_v19  ;;  %v804_v33 = vmul.f32 0.0078125, %v758_v5  ;;  %v805_v34 = vmul.f32 0.0078125, %v760_v10  ;;  %v995_v12 = vpack.c.bf16 %v968_v30, %v967_v27  ;;  %5638 = vmatprep.mubr.msk.bf16.mxu1 %vm1083_vm0, %v7440_v37  ;;  %5644 = vmatprep.mubr.msk.bf16.mxu0 %vm1083_vm0, %v7334_v11 }
 0x1e3   : > { %v6130_v44 = vpop.eup %6129  ;;  %6139 = vrsqrt.f32 %v835_v48  ;;  %v931_v29 = vmul.f32 %v7405_v20, %v893_v52 }
 0x1e4   : > { %v836_v21 = vadd.f32 1e-05, %v804_v33  ;;  %v837_v49 = vadd.f32 1e-05, %v805_v34  ;;  %5642 = vmatprep.subr.bf16.mxu0 %v995_v12  ;;  %v894_v6 = vmul.f32 %v6130_v44, %v7317_v26  ;;  %v1020_v33 = vld [vmem:[%s9762_s4 + $0x28] sm:$0xff] }
 0x1e5   : > { %v762_v36 = vpop.xlane.xlu1 %761  ;;  %5643 = vmatpush3.bf16.msra.mxu0 %v995_v12  ;;  %v969_v59 = vadd.f32 %v7414_v39, %v931_v29 }
 0x1e6   : > { %6141 = vrsqrt.f32 %v836_v21  ;;  %v806_v57 = vmul.f32 0.0078125, %v762_v36  ;;  %v932_v14 = vmul.f32 %v7405_v20, %v894_v6  ;;  %v1017_v36 = vld [vmem:[%s9762_s4 + $0x10] sm:$0xff] }
 0x1e7   : > { %v6132_v42 = vpop.eup %6131  ;;  %6143 = vrsqrt.f32 %v837_v49 }
 0x1e8   : > { %v838_v54 = vadd.f32 1e-05, %v806_v57  ;;  %v970_v15 = vadd.f32 %v7414_v39, %v932_v14  ;;  %v895_v38 = vmul.f32 %v6132_v42, %v7326_v35  ;;  %v1021_v35 = vld [vmem:[%s9762_s4 + $0x30] sm:$0xff]  ;;  %v1018_v42 = vld [vmem:[%s9762_s4 + $0x18] sm:$0xff] }
 0x1e9   : > { %5639 = vmatmul.mubr.msk.bf16.gmra.mxu1 %vm1083_vm0, %v7462_v56  ;;  %5645 = vmatmul.mubr.msk.bf16.vlgmr.msra.gmra.mxu0 %vm1083_vm0, %v7432_v31 }
 0x1ea   : > { %6145 = vrsqrt.f32 %v838_v54  ;;  %v996_v26 = vpack.c.bf16 %v970_v15, %v969_v59  ;;  %5648 = vmatprep.mubr.msk.bf16.mxu0 %vm1083_vm0, %v7440_v37  ;;  %5654 = vmatprep.mubr.msk.bf16.mxu1 %vm1083_vm0, %v7334_v11  ;;  %v933_v47 = vmul.f32 %v7405_v20, %v895_v38  ;;  %v1015_v59 = vld [vmem:[%s9762_s4] sm:$0xff]  ;;  %v1016_v15 = vld [vmem:[%s9762_s4 + $0x8] sm:$0xff] }
 0x1eb   : > { %v6134_v63 = vpop.eup %6133  ;;  %v3539_v38 = vld [vmem:[%s9764_s6] sm:$0xff] }
 0x1ec   : > { %v6136_v22 = vpop.eup %6135  ;;  %5652 = vmatprep.subr.bf16.mxu1 %v996_v26  ;;  %v896_v60 = vmul.f32 %v6134_v63, %v7337_v40  ;;  %v971_v7 = vadd.f32 %v7414_v39, %v933_v47  ;;  %v1019_v40 = vld [vmem:[%s9762_s4 + $0x20] sm:$0xff] }
 0x1ed   : > { %5653 = vmatpush3.bf16.msra.mxu1 %v996_v26  ;;  %v897_v16 = vmul.f32 %v6136_v22, %v7343_v45  ;;  %1060 = vperm.xlu1 %6061, %v1022_v46   ;;  %v3540_v45 = vld [vmem:[%s9764_s6 + $0x8] sm:$0xff] }
 0x1ee   : > { %v934_v18 = vmul.f32 %v7405_v20, %v896_v60  ;;  %1055 = vperm.xlu0 %6060, %v1021_v35  }
 0x1ef   : > { %v6138_v4 = vpop.eup %6137  ;;  %v935_v24 = vmul.f32 %v7405_v20, %v897_v16 }
 0x1f0   : > { %v6140_v43 = vpop.eup %6139  ;;  %v972_v8 = vadd.f32 %v7414_v39, %v934_v18  ;;  %v898_v0 = vmul.f32 %v6138_v4, %v7355_v50 }
 0x1f1   : > { %5649 = vmatmul.mubr.msk.bf16.gmra.mxu0 %vm1083_vm0, %v7462_v56  ;;  %5655 = vmatmul.mubr.msk.bf16.vlgmr.msra.gmra.mxu1 %vm1083_vm0, %v7432_v31  ;;  %v899_v27 = vmul.f32 %v6140_v43, %v7361_v55  ;;  %v973_v52 = vadd.f32 %v7414_v39, %v935_v24 }
 0x1f2   : > { %v997_v19 = vpack.c.bf16 %v972_v8, %v971_v7  ;;  %5658 = vmatprep.mubr.msk.bf16.mxu1 %vm1083_vm0, %v7440_v37  ;;  %5664 = vmatprep.mubr.msk.bf16.mxu0 %vm1083_vm0, %v7334_v11  ;;  %v936_v50 = vmul.f32 %v7405_v20, %v898_v0 }
 0x1f3   : > { %v6142_v48 = vpop.eup %6141  ;;  %1045 = vperm.xlu1 %6061, %v1019_v40   ;;  %3548 = vperm.xlu0 %6060, %v3540_v45   ;;  %v937_v10 = vmul.f32 %v7405_v20, %v899_v27 }
 0x1f4   : > { %v6144_v30 = vpop.eup %6143  ;;  %5662 = vmatprep.subr.bf16.mxu0 %v997_v19  ;;  %v974_v5 = vadd.f32 %v7414_v39, %v936_v50  ;;  %v900_v55 = vmul.f32 %v6142_v48, %v7368_v61 }
 0x1f5   : > { %5663 = vmatpush3.bf16.msra.mxu0 %v997_v19  ;;  %v901_v34 = vmul.f32 %v6144_v30, %v7371_v62  ;;  %v975_v49 = vadd.f32 %v7414_v39, %v937_v10 }
 0x1f6   : > { %v998_v12 = vpack.c.bf16 %v974_v5, %v973_v52  ;;  %v938_v44 = vmul.f32 %v7405_v20, %v900_v55 }
 0x1f7   : > { %v6146_v21 = vpop.eup %6145  ;;  %1050 = vperm.xlu1 %6061, %v1020_v33   ;;  %v939_v29 = vmul.f32 %v7405_v20, %v901_v34 }
 0x1f8   : > { %5672 = vmatprep.subr.bf16.mxu1 %v998_v12  ;;  %v976_v6 = vadd.f32 %v7414_v39, %v938_v44  ;;  %v902_v61 = vmul.f32 %v6146_v21, %v7378_v2 }
 0x1f9   : > { %5659 = vmatmul.mubr.msk.bf16.gmra.mxu1 %vm1083_vm0, %v7462_v56  ;;  %5665 = vmatmul.mubr.msk.bf16.vlgmr.msra.gmra.mxu0 %vm1083_vm0, %v7432_v31  ;;  %v977_v2 = vadd.f32 %v7414_v39, %v939_v29 }
 0x1fa   : > { %5673 = vmatpush3.bf16.msra.mxu1 %v998_v12  ;;  %v999_v62 = vpack.c.bf16 %v976_v6, %v975_v49  ;;  %5668 = vmatprep.mubr.msk.bf16.mxu0 %vm1083_vm0, %v7440_v37  ;;  %v940_v57 = vmul.f32 %v7405_v20, %v902_v61 }
 0x1fb   : > { %5674 = vmatprep.mubr.msk.bf16.mxu1 %vm1083_vm0, %v7334_v11  ;;  %1035 = vperm.xlu1 %6061, %v1017_v36  }
 0x1fc   : > { %5682 = vmatprep.subr.bf16.mxu0 %v999_v62  ;;  %v978_v14 = vadd.f32 %v7414_v39, %v940_v57 }
 0x1fd   : > { %5683 = vmatpush3.bf16.msra.mxu0 %v999_v62 }
 0x1fe   : > { %v1000_v54 = vpack.c.bf16 %v978_v14, %v977_v2 }
 0x1ff   : > { %1040 = vperm.xlu1 %6061, %v1018_v42  }
 0x200   : > { %5692 = vmatprep.subr.bf16.mxu1 %v1000_v54 }
 0x201   : > { %5669 = vmatmul.mubr.msk.bf16.gmra.mxu0 %vm1083_vm0, %v7462_v56  ;;  %5675 = vmatmul.mubr.msk.bf16.vlgmr.msra.gmra.mxu1 %vm1083_vm0, %v7432_v31 }
 0x202   : > { %5693 = vmatpush3.bf16.msra.mxu1 %v1000_v54  ;;  %5678 = vmatprep.mubr.msk.bf16.mxu1 %vm1083_vm0, %v7440_v37 }
 0x203   : > { %5684 = vmatprep.mubr.msk.bf16.mxu0 %vm1083_vm0, %v7334_v11  ;;  %1025 = vperm.xlu1 %6061, %v1015_v59  }
 0x207   : > { %1030 = vperm.xlu1 %6061, %v1016_v15  }
 0x209   : > { %5679 = vmatmul.mubr.msk.bf16.gmra.mxu1 %vm1083_vm0, %v7462_v56  ;;  %5685 = vmatmul.mubr.msk.bf16.vlgmr.msra.gmra.mxu0 %vm1083_vm0, %v7432_v31 }
 0x20a   : > { %5688 = vmatprep.mubr.msk.bf16.mxu0 %vm1083_vm0, %v7440_v37  ;;  %5694 = vmatprep.mubr.msk.bf16.mxu1 %vm1083_vm0, %v7334_v11 }
 0x20b   : > { %3543 = vperm.xlu1 %6061, %v3539_v38  }
 0x211   : > { %5689 = vmatmul.mubr.msk.bf16.gmra.mxu0 %vm1083_vm0, %v7462_v56  ;;  %5695 = vmatmul.mubr.msk.bf16.vlgmr.msra.gmra.mxu1 %vm1083_vm0, %v7432_v31 }
 0x212   : > { %5698 = vmatprep.mubr.msk.bf16.mxu1 %vm1083_vm0, %v7440_v37  ;;  %5704 = vmatprep.mubr.msk.bf16.mxu0 %vm1083_vm0, %v7334_v11 }
 0x219   : > { %5699 = vmatmul.mubr.msk.bf16.gmra.mxu1 %vm1083_vm0, %v7462_v56 }
 0x21a   : > { %5714 = vmatprep.mubr.msk.bf16.mxu1 %vm1083_vm0, %v7334_v11 }
 0x239   : > { %v764_v26 = vpop.xlane.xlu0 %763 }
 0x23a   : > { %v807_v46 = vmul.f32 0.0078125, %v764_v26 }
 0x23c   : > { %v839_v63 = vadd.f32 1e-05, %v807_v46 }
 0x23d   : > { %v766_v35 = vpop.xlane.xlu1 %765 }
 0x23e   : > { %6147 = vrsqrt.f32 %v839_v63  ;;  %v808_v22 = vmul.f32 0.0078125, %v766_v35 }
 0x240   : > { %v840_v60 = vadd.f32 1e-05, %v808_v22 }
 0x241   : > { %v768_v47 = vpop.xlane.xlu0 %767 }
 0x242   : > { %6149 = vrsqrt.f32 %v840_v60  ;;  %v809_v16 = vmul.f32 0.0078125, %v768_v47 }
 0x244   : > { %v841_v18 = vadd.f32 1e-05, %v809_v16 }
 0x245   : > { %v770_v4 = vpop.xlane.xlu1 %769 }
 0x246   : > { %6151 = vrsqrt.f32 %v841_v18  ;;  %v810_v43 = vmul.f32 0.0078125, %v770_v4 }
 0x248   : > { %v842_v7 = vadd.f32 1e-05, %v810_v43 }
 0x249   : > { %v772_v8 = vpop.xlane.xlu0 %771 }
 0x24a   : > { %6153 = vrsqrt.f32 %v842_v7  ;;  %v811_v0 = vmul.f32 0.0078125, %v772_v8 }
 0x24b   : > { %v6148_v24 = vpop.eup %6147 }
 0x24c   : > { %v843_v40 = vadd.f32 1e-05, %v811_v0  ;;  %v903_v45 = vmul.f32 %v6148_v24, %v7385_v25 }
 0x24d   : > { %v774_v27 = vpop.xlane.xlu1 %773 }
 0x24e   : > { %6155 = vrsqrt.f32 %v843_v40  ;;  %v812_v19 = vmul.f32 0.0078125, %v774_v27  ;;  %v941_v52 = vmul.f32 %v7405_v20, %v903_v45 }
 0x24f   : > { %v6150_v50 = vpop.eup %6149 }
 0x250   : > { %v844_v48 = vadd.f32 1e-05, %v812_v19  ;;  %v904_v30 = vmul.f32 %v6150_v50, %v7390_v41  ;;  %v979_v12 = vadd.f32 %v7414_v39, %v941_v52 }
 0x251   : > { %v776_v5 = vpop.xlane.xlu0 %775 }
 0x252   : > { %6157 = vrsqrt.f32 %v844_v48  ;;  %v813_v55 = vmul.f32 0.0078125, %v776_v5  ;;  %v942_v10 = vmul.f32 %v7405_v20, %v904_v30 }
 0x253   : > { %v6152_v33 = vpop.eup %6151 }
 0x254   : > { %v845_v34 = vadd.f32 1e-05, %v813_v55  ;;  %v980_v25 = vadd.f32 %v7414_v39, %v942_v10  ;;  %v905_v44 = vmul.f32 %v6152_v33, %v7395_v51 }
 0x255   : > { %v778_v21 = vpop.xlane.xlu1 %777 }
 0x256   : > { %6159 = vrsqrt.f32 %v845_v34  ;;  %v814_v49 = vmul.f32 0.0078125, %v778_v21  ;;  %v1001_v6 = vpack.c.bf16 %v980_v25, %v979_v12  ;;  %v943_v36 = vmul.f32 %v7405_v20, %v905_v44 }
 0x257   : > { %v6154_v41 = vpop.eup %6153 }
 0x258   : > { %v846_v61 = vadd.f32 1e-05, %v814_v49  ;;  %5702 = vmatprep.subr.bf16.mxu0 %v1001_v6  ;;  %v906_v29 = vmul.f32 %v6154_v41, %v7400_v1  ;;  %v981_v51 = vadd.f32 %v7414_v39, %v943_v36  ;;  %v9779_v41 = vmov 0.0  }
 0x259   : > { %5703 = vmatpush3.bf16.msra.mxu0 %v1001_v6  ;;  %v780_v62 = vpop.xlane.xlu0 %779 }
 0x25a   : > { %6161 = vrsqrt.f32 %v846_v61  ;;  %v815_v57 = vmul.f32 0.0078125, %v780_v62  ;;  %v944_v2 = vmul.f32 %v7405_v20, %v906_v29 }
 0x25b   : > { %v6156_v14 = vpop.eup %6155 }
 0x25c   : > { %v847_v42 = vadd.f32 1e-05, %v815_v57  ;;  %5705 = vmatmul.mubr.msk.bf16.vlgmr.msra.gmra.mxu0 %vm1083_vm0, %v7432_v31  ;;  %v982_v54 = vadd.f32 %v7414_v39, %v944_v2  ;;  %v907_v59 = vmul.f32 %v6156_v14, %v7408_v9 }
 0x25d   : > { %v782_v1 = vpop.xlane.xlu1 %781  ;;  %5708 = vmatprep.mubr.msk.bf16.mxu0 %vm1083_vm0, %v7440_v37 }
 0x25e   : > { %6163 = vrsqrt.f32 %v847_v42  ;;  %v816_v15 = vmul.f32 0.0078125, %v782_v1  ;;  %v1002_v38 = vpack.c.bf16 %v982_v54, %v981_v51  ;;  %v945_v35 = vmul.f32 %v7405_v20, %v907_v59 }
 0x25f   : > { %v6158_v26 = vpop.eup %6157 }
 0x260   : > { %v848_v46 = vadd.f32 1e-05, %v816_v15  ;;  %5712 = vmatprep.subr.bf16.mxu1 %v1002_v38  ;;  %v908_v63 = vmul.f32 %v6158_v26, %v7418_v53  ;;  %v983_v18 = vadd.f32 %v7414_v39, %v945_v35 }
 0x261   : > { %5713 = vmatpush3.bf16.msra.mxu1 %v1002_v38  ;;  %v784_v22 = vpop.xlane.xlu0 %783 }
 0x262   : > { %6165 = vrsqrt.f32 %v848_v46  ;;  %v817_v60 = vmul.f32 0.0078125, %v784_v22  ;;  %v946_v9 = vmul.f32 %v7405_v20, %v908_v63 }
 0x263   : > { %v6160_v47 = vpop.eup %6159 }
 0x264   : > { %v849_v16 = vadd.f32 1e-05, %v817_v60  ;;  %5709 = vmatmul.mubr.msk.bf16.gmra.mxu0 %vm1083_vm0, %v7462_v56  ;;  %5715 = vmatmul.mubr.msk.bf16.vlgmr.msra.gmra.mxu1 %vm1083_vm0, %v7432_v31  ;;  %v984_v53 = vadd.f32 %v7414_v39, %v946_v9  ;;  %v909_v4 = vmul.f32 %v6160_v47, %v7426_v58 }
 0x265   : > { %v786_v43 = vpop.xlane.xlu1 %785  ;;  %5718 = vmatprep.mubr.msk.bf16.mxu1 %vm1083_vm0, %v7440_v37  ;;  %5724 = vmatprep.mubr.msk.bf16.mxu0 %vm1083_vm0, %v7334_v11 }
 0x266   : > { %6167 = vrsqrt.f32 %v849_v16  ;;  %v818_v7 = vmul.f32 0.0078125, %v786_v43  ;;  %v1003_v8 = vpack.c.bf16 %v984_v53, %v983_v18  ;;  %v947_v45 = vmul.f32 %v7405_v20, %v909_v4 }
 0x267   : > { %v6162_v0 = vpop.eup %6161 }
 0x268   : > { %v850_v24 = vadd.f32 1e-05, %v818_v7  ;;  %5722 = vmatprep.subr.bf16.mxu0 %v1003_v8  ;;  %v910_v40 = vmul.f32 %v6162_v0, %v7444_v28  ;;  %v985_v19 = vadd.f32 %v7414_v39, %v947_v45 }
 0x269   : > { %5723 = vmatpush3.bf16.msra.mxu0 %v1003_v8  ;;  %v7729_v57 = vpop.permute.xlu0 %1055 }
 0x26a   : > { %6169 = vrsqrt.f32 %v850_v24  ;;  %v948_v58 = vmul.f32 %v7405_v20, %v910_v40  ;;  %9828 = vst [vmem:[#allocation21_spill] sm:$0xff] %v7729_v57 }
 0x26b   : > { %v6164_v27 = vpop.eup %6163 }
 0x26c   : > { %5719 = vmatmul.mubr.msk.bf16.gmra.mxu1 %vm1083_vm0, %v7462_v56  ;;  %5725 = vmatmul.mubr.msk.bf16.vlgmr.msra.gmra.mxu0 %vm1083_vm0, %v7432_v31  ;;  %v986_v50 = vadd.f32 %v7414_v39, %v948_v58  ;;  %v911_v48 = vmul.f32 %v6164_v27, %v7456_v32  ;;  %v7685_v32 = vpop.permute.xlu1 %1060 }
 0x26d   : > { %5728 = vmatprep.mubr.msk.bf16.mxu0 %vm1083_vm0, %v7440_v37  ;;  %5734 = vmatprep.mubr.msk.bf16.mxu1 %vm1083_vm0, %v7334_v11 }
 0x26e   : > { %v1004_v28 = vpack.c.bf16 %v986_v50, %v985_v19  ;;  %v949_v5 = vmul.f32 %v7405_v20, %v911_v48 }
 0x26f   : > { %v6166_v30 = vpop.eup %6165 }
 0x270   : > { %5732 = vmatprep.subr.bf16.mxu1 %v1004_v28  ;;  %v912_v52 = vmul.f32 %v6166_v30, %v7469_v17  ;;  %v987_v33 = vadd.f32 %v7414_v39, %v949_v5  ;;  %v7696_v49 = vpop.permute.xlu1 %1045 }
 0x271   : > { %5733 = vmatpush3.bf16.msra.mxu1 %v1004_v28 }
 0x272   : > { %v950_v55 = vmul.f32 %v7405_v20, %v912_v52 }
 0x273   : > { %v6168_v10 = vpop.eup %6167 }
 0x274   : > { %5729 = vmatmul.mubr.msk.bf16.gmra.mxu0 %vm1083_vm0, %v7462_v56  ;;  %5735 = vmatmul.mubr.msk.bf16.vlgmr.msra.gmra.mxu1 %vm1083_vm0, %v7432_v31  ;;  %v988_v34 = vadd.f32 %v7414_v39, %v950_v55  ;;  %v913_v17 = vmul.f32 %v6168_v10, %v7485_v23  ;;  %v7710_v61 = vpop.permute.xlu1 %1050 }
 0x275   : > { %5738 = vmatprep.mubr.msk.bf16.mxu1 %vm1083_vm0, %v7440_v37  ;;  %5744 = vmatprep.mubr.msk.bf16.mxu0 %vm1083_vm0, %v7334_v11 }
 0x276   : > { %v1005_v12 = vpack.c.bf16 %v988_v34, %v987_v33  ;;  %v951_v21 = vmul.f32 %v7405_v20, %v913_v17 }
 0x277   : > { %v6170_v25 = vpop.eup %6169 }
 0x278   : > { %5742 = vmatprep.subr.bf16.mxu0 %v1005_v12  ;;  %v914_v44 = vmul.f32 %v6170_v25, %v7493_v13  ;;  %v989_v23 = vadd.f32 %v7414_v39, %v951_v21 }
 0x279   : > { %5743 = vmatpush3.bf16.msra.mxu0 %v1005_v12 }
 0x27a   : > { %v952_v6 = vmul.f32 %v7405_v20, %v914_v44  ;;  %5762 = vmatprep.subr.bf16.mxu0 %v9779_v41 }
 0x27c   : > { %5739 = vmatmul.mubr.msk.bf16.gmra.mxu1 %vm1083_vm0, %v7462_v56  ;;  %5745 = vmatmul.mubr.msk.bf16.vlgmr.msra.gmra.mxu0 %vm1083_vm0, %v7432_v31  ;;  %v990_v13 = vadd.f32 %v7414_v39, %v952_v6 }
 0x27d   : > { %5748 = vmatprep.mubr.msk.bf16.mxu0 %vm1083_vm0, %v7440_v37  ;;  %5754 = vmatprep.mubr.msk.bf16.mxu1 %vm1083_vm0, %v7334_v11  ;;  %v7721_v11 = vpop.permute.xlu1 %1035 }
 0x27e   : > { %v1006_v20 = vpack.c.bf16 %v990_v13, %v989_v23 }
 0x280   : > { %5752 = vmatprep.subr.bf16.mxu1 %v1006_v20 }
 0x281   : > { %5753 = vmatpush3.bf16.msra.mxu1 %v1006_v20  ;;  %v7723_v36 = vpop.permute.xlu1 %1040 }
 0x282   : > { %5774 = vmatprep.subr.bf16.mxu1 %v9779_v41 }
 0x284   : > { %5749 = vmatmul.mubr.msk.bf16.gmra.mxu0 %vm1083_vm0, %v7462_v56  ;;  %5755 = vmatmul.mubr.msk.bf16.vlgmr.msra.gmra.mxu1 %vm1083_vm0, %v7432_v31 }
 0x285   : > { %5758 = vmatprep.mubr.msk.bf16.mxu1 %vm1083_vm0, %v7440_v37  ;;  %5770 = vmatprep.mubr.msk.bf16.mxu0 %vm6900_vm1, %v9779_v41  ;;  %v7731_v14 = vpop.permute.xlu1 %1025 }
 0x289   : > { %v5606_v39 = vpop.f32.mrf.mxu0  ;;  %v7744_v22 = vpop.permute.xlu1 %1030 }
 0x28a   : > { %v7735_v59 = vadd.f32 %v5606_v39, %v7721_v11 }
 0x28b   : > { %v1130_v29 = vpop.f32.mrf.mxu0 }
 0x28c   : > { %5759 = vmatmul.mubr.msk.bf16.gmra.mxu1 %vm1083_vm0, %v7462_v56  ;;  %v7742_v35 = vadd.f32 %v1130_v29, %v7731_v14  ;;  %v2266_v9 = vmul.f32 0.70710677, %v7735_v59 }
 0x28d   : > { %v5607_v62 = vpop.f32.mrf.mxu0  ;;  %5782 = vmatprep.mubr.msk.bf16.mxu1 %vm6900_vm1, %v9779_v41 }
 0x28e   : > { %v7738_v38 = vadd.f32 %v5607_v62, %v7723_v36  ;;  %v2264_v8 = vmul.f32 0.70710677, %v7742_v35 }
 0x28f   : > { %v1133_v31 = vpop.f32.mrf.mxu0 }
 0x290   : > { %v2267_v18 = vmul.f32 0.70710677, %v7738_v38  ;;  %v7749_v53 = vadd.f32 %v1133_v31, %v7744_v22 }
 0x291   : > { %v5610_v37 = vpop.f32.mrf.mxu0  ;;  %v5616_v2 = vpop.f32.mrf.mxu1 }
 0x292   : > { %v1155_v54 = vadd.f32 %v5610_v37, %v7729_v57  ;;  %v2265_v45 = vmul.f32 0.70710677, %v7749_v53  ;;  %v1204_v58 = vadd.f32 %v5616_v2, %v7721_v11 }
 0x293   : > { %v1146_v42 = vpop.f32.mrf.mxu0  ;;  %v1195_v51 = vpop.f32.mrf.mxu1 }
 0x294   : > { %v2270_v56 = vmul.f32 0.70710677, %v1155_v54  ;;  %v1147_v28 = vadd.f32 %v1146_v42, %v7696_v49  ;;  %v1196_v30 = vadd.f32 %v1195_v51, %v7731_v14  ;;  %v2274_v10 = vmul.f32 0.70710677, %v1204_v58 }
 0x295   : > { %v5611_v1 = vpop.f32.mrf.mxu0  ;;  %v5617_v15 = vpop.f32.mrf.mxu1  ;;  %v2142_v31 = vmul.f32 0.5, %v1155_v54 }
 0x296   : > { %v1158_v26 = vadd.f32 %v5611_v1, %v7685_v32  ;;  %6171 = verf.f32 %v2270_v56  ;;  %v7759_v27 = vadd.f32 %v5617_v15, %v7723_v36  ;;  %v2268_v21 = vmul.f32 0.70710677, %v1147_v28 }
 0x297   : > { %v1149_v46 = vpop.f32.mrf.mxu0  ;;  %v1198_v63 = vpop.f32.mrf.mxu1  ;;  %v2272_v6 = vmul.f32 0.70710677, %v1196_v30 }
 0x298   : > { %v2271_v60 = vmul.f32 0.70710677, %v1158_v26  ;;  %v7776_v33 = vadd.f32 %v1149_v46, %v7710_v61  ;;  %v2275_v34 = vmul.f32 0.70710677, %v7759_v27  ;;  %v7780_v17 = vadd.f32 %v1198_v63, %v7744_v22 }
 0x299   : > { %v5620_v47 = vpop.f32.mrf.mxu1  ;;  %v5626_v16 = vpop.f32.mrf.mxu0  ;;  %v2143_v1 = vmul.f32 0.5, %v1158_v26  ;;  %v2138_v26 = vmul.f32 0.5, %v7735_v59  ;;  %v7825_v59 = vmul.f32 0.5, %v1147_v28 }
 0x29a   : > { %6173 = verf.f32 %v2271_v60  ;;  %v7752_v4 = vadd.f32 %v5620_v47, %v7729_v57  ;;  %v2269_v39 = vmul.f32 0.70710677, %v7776_v33  ;;  %v7792_v29 = vadd.f32 %v5626_v16, %v7721_v11 }
 0x29b   : > { %v1211_v43 = vpop.f32.mrf.mxu1  ;;  %v1260_v7 = vpop.f32.mrf.mxu0  ;;  %6175 = verf.f32 %v2266_v9  ;;  %v2273_v37 = vmul.f32 0.70710677, %v7780_v17 }
 0x29c   : > { %v2278_v0 = vmul.f32 0.70710677, %v7752_v4  ;;  %6177 = verf.f32 %v2267_v18  ;;  %v7796_v2 = vadd.f32 %v1211_v43, %v7696_v49  ;;  %v7803_v15 = vadd.f32 %v1260_v7, %v7731_v14 }
 0x29d   : > { %v5621_v24 = vpop.f32.mrf.mxu1  ;;  %v5627_v40 = vpop.f32.mrf.mxu0  ;;  %v2282_v16 = vmul.f32 0.70710677, %v7792_v29 }
 0x29e   : > { %6179 = verf.f32 %v2278_v0  ;;  %v7762_v19 = vadd.f32 %v5621_v24, %v7685_v32  ;;  %v7806_v46 = vadd.f32 %v5627_v40, %v7723_v36  ;;  %v2276_v43 = vmul.f32 0.70710677, %v7796_v2 }
 0x29f   : > { %v7764_v50 = vpop.f32.mrf.mxu1  ;;  %v7766_v48 = vpop.f32.mrf.mxu0  ;;  %6181 = verf.f32 %v2264_v8  ;;  %v2136_v24 = vmul.f32 0.5, %v7742_v35  ;;  %v2139_v40 = vmul.f32 0.5, %v7738_v38  ;;  %v7832_v35 = vmul.f32 0.5, %v1196_v30 }
 0x2a0   : > { %v2279_v52 = vmul.f32 0.70710677, %v7762_v19  ;;  %6183 = verf.f32 %v2265_v45  ;;  %v7835_v38 = vmul.f32 0.5, %v7759_v27  ;;  %v1215_v28 = vadd.f32 %v7764_v50, %v7710_v61 }
 0x2a1   : > { %v7771_v5 = vpop.f32.mrf.mxu0  ;;  %v7773_v55 = vpop.f32.mrf.mxu1  ;;  %v2150_v27 = vmul.f32 0.5, %v7752_v4  ;;  %v7859_v4 = vmul.f32 0.5, %v7776_v33  ;;  %v2145_v33 = vmul.f32 0.5, %v7780_v17 }
 0x2a2   : > { %6185 = verf.f32 %v2279_v52  ;;  %v2280_v52 = vmul.f32 0.70710677, %v7803_v15  ;;  %v7850_v50 = vadd.f32 %v7771_v5, %v7729_v57  ;;  %v1334_v5 = vadd.f32 %v7773_v55, %v7721_v11 }
 0x2a3   : > { %v7782_v12 = vpop.f32.mrf.mxu0  ;;  %v7784_v25 = vpop.f32.mrf.mxu1  ;;  %6187 = verf.f32 %v2274_v10 }
 0x2a4   : > { %v6172_v44 = vpop.eup %6171  ;;  %6189 = verf.f32 %v2275_v34  ;;  %v2137_v34 = vmul.f32 0.5, %v7749_v53 }
 0x2a5   : > { %v7786_v23 = vpop.f32.mrf.mxu0  ;;  %v7788_v13 = vpop.f32.mrf.mxu1  ;;  %v2526_v20 = vadd.f32 1.0, %v6172_v44  ;;  %6191 = verf.f32 %v2268_v21  ;;  %v7823_v44 = vmul.f32 0.5, %v1204_v58  ;;  %v2283_v21 = vmul.f32 0.70710677, %v7806_v46 }
 0x2a6   : > { %6193 = verf.f32 %v2272_v6 }
 0x2a7   : > { %v6174_v62 = vpop.eup %6173  ;;  %v7798_v42 = vpop.f32.mrf.mxu0  ;;  %v2654_v9 = vmul.f32 %v2526_v20, %v2142_v31  ;;  %6195 = verf.f32 %v2269_v39 }
 0x2a8   : > { %v7800_v51 = vpop.f32.mrf.mxu1  ;;  %v2527_v56 = vadd.f32 1.0, %v6174_v62  ;;  %v6176_v60 = vpop.eup %6175  ;;  %6197 = verf.f32 %v2273_v37 }
 0x2a9   : > { %v7810_v63 = vpop.f32.mrf.mxu0  ;;  %v6178_v18 = vpop.eup %6177  ;;  %6199 = verf.f32 %v2282_v16  ;;  %v2522_v53 = vadd.f32 1.0, %v6176_v60  ;;  %v2151_v60 = vmul.f32 0.5, %v7762_v19 }
 0x2aa   : > { %v7808_v54 = vpop.f32.mrf.mxu1  ;;  %v2655_v47 = vmul.f32 %v2527_v56, %v2143_v1  ;;  %v2523_v39 = vadd.f32 1.0, %v6178_v18  ;;  %6201 = verf.f32 %v2276_v43  ;;  %v1264_v56 = vadd.f32 %v7766_v48, %v7744_v22 }
 0x2ab   : > { %v7817_v8 = vpop.f32.mrf.mxu0  ;;  %v6180_v0 = vpop.eup %6179  ;;  %6203 = verf.f32 %v2280_v52  ;;  %v7863_v48 = vadd.f32 %v7786_v23, %v7685_v32  ;;  %v2277_v52 = vmul.f32 0.70710677, %v1215_v28 }
 0x2ac   : > { %v7815_v7 = vpop.f32.mrf.mxu1  ;;  %v2781_v45 = vpack.c.bf16 %v2655_v47, %v2654_v9  ;;  %v6182_v10 = vpop.eup %6181  ;;  %v2534_v58 = vadd.f32 1.0, %v6180_v0  ;;  %6205 = verf.f32 %v2283_v21  ;;  %v7856_v18 = vmul.f32 %v2523_v39, %v2139_v40 }
 0x2ad   : > { %v7830_v20 = vpop.f32.mrf.mxu0  ;;  %v6184_v62 = vpop.eup %6183  ;;  %v2520_v1 = vadd.f32 1.0, %v6182_v10  ;;  %v7871_v39 = vmul.f32 %v2522_v53, %v2138_v26  ;;  %v2281_v23 = vmul.f32 0.70710677, %v1264_v56  ;;  %6207 = verf.f32 %v2277_v52 }
 0x2ae   : > { %v7828_v6 = vpop.f32.mrf.mxu1  ;;  %5763 = vmatpush3.bf16.msra.mxu0 %v2781_v45  ;;  %v2521_v43 = vadd.f32 1.0, %v6184_v62  ;;  %v2662_v0 = vmul.f32 %v2534_v58, %v2150_v27  ;;  %v7875_v62 = vmul.f32 0.5, %v7792_v29  ;;  %v7880_v27 = vmul.f32 0.5, %v7796_v2 }
 0x2af   : > { %v7841_v37 = vpop.f32.mrf.mxu0  ;;  %5764 = vmatprep.subr.bf16.mxu0 %v9779_v41  ;;  %v6186_v30 = vpop.eup %6185  ;;  %v7877_v58 = vmul.f32 %v2520_v1, %v2136_v24  ;;  %v7890_v29 = vmul.f32 0.5, %v7803_v15  ;;  %v7893_v24 = vmul.f32 0.5, %v7806_v46  ;;  %v2287_v2 = vmul.f32 0.70710677, %v7863_v48 }
 0x2b0   : > { %v7839_v31 = vpop.f32.mrf.mxu1  ;;  %v2535_v9 = vadd.f32 1.0, %v6186_v30  ;;  %v6188_v19 = vpop.eup %6187  ;;  %v7896_v1 = vmul.f32 %v2521_v43, %v2137_v34  ;;  %6209 = verf.f32 %v2281_v23  ;;  %v7902_v15 = vadd.f32 %v7788_v13, %v7723_v36 }
 0x2b1   : > { %v7852_v47 = vpop.f32.mrf.mxu0  ;;  %v6190_v40 = vpop.eup %6189  ;;  %9830 = vst [vmem:[#allocation23_spill] sm:$0xff] %v7877_v58  ;;  %v2530_v58 = vadd.f32 1.0, %v6188_v19  ;;  %v7907_v43 = vmul.f32 0.5, %v1215_v28  ;;  %v1277_v52 = vadd.f32 %v7782_v12, %v7696_v49  ;;  %v1326_v13 = vadd.f32 %v7784_v25, %v7731_v14 }
 0x2b2   : > { %v7854_v16 = vpop.f32.mrf.mxu1  ;;  %v2663_v45 = vmul.f32 %v2535_v9, %v2151_v60  ;;  %v6192_v30 = vpop.eup %6191  ;;  %v2286_v60 = vmul.f32 0.70710677, %v7850_v50  ;;  %v1280_v28 = vadd.f32 %v7798_v42, %v7710_v61  ;;  %v7929_v25 = vadd.f32 %v7828_v6, %v7685_v32 }
 0x2b3   : > { %v7867_v10 = vpop.f32.mrf.mxu0  ;;  %v6194_v26 = vpop.eup %6193  ;;  %v2524_v17 = vadd.f32 1.0, %v6192_v30  ;;  %v7913_v30 = vmul.f32 0.5, %v1264_v56  ;;  %v7923_v12 = vmul.f32 %v2530_v58, %v7823_v44  ;;  %v7939_v42 = vmul.f32 0.5, %v7850_v50 }
 0x2b4   : > { %v7869_v21 = vpop.f32.mrf.mxu1  ;;  %v2785_v55 = vpack.c.bf16 %v2663_v45, %v2662_v0  ;;  %v6196_v53 = vpop.eup %6195  ;;  %v2531_v0 = vadd.f32 1.0, %v6190_v40  ;;  %v2290_v45 = vmul.f32 0.70710677, %v1334_v5  ;;  %v2528_v34 = vadd.f32 1.0, %v6194_v26 }
 0x2b5   : > { %9829 = vst [vmem:[#allocation22_spill] sm:$0xff] %v7869_v21  ;;  %v7883_v9 = vpop.f32.mrf.mxu0  ;;  %v9833_v21 = vmov 0.0   ;;  %6211 = verf.f32 %v2286_v60  ;;  %v2525_v19 = vadd.f32 1.0, %v6196_v53  ;;  %v2652_v56 = vmul.f32 %v2524_v17, %v7825_v59 }
 0x2b6   : > { %v7885_v3 = vpop.f32.mrf.mxu1  ;;  %5775 = vmatpush3.bf16.msra.mxu1 %v2785_v55  ;;  %6213 = verf.f32 %v2287_v2  ;;  %v7918_v55 = vmul.f32 %v2531_v0, %v7835_v38  ;;  %v2291_v53 = vmul.f32 0.70710677, %v7902_v15  ;;  %v7936_v0 = vmul.f32 %v2528_v34, %v7832_v35 }
 0x2b7   : > { %9831 = vst [vmem:[#allocation24_spill] sm:$0xff] %v7885_v3  ;;  %v6198_v3 = vpop.eup %6197  ;;  %v7904_v46 = vpop.f32.mrf.mxu0  ;;  %5776 = vmatprep.subr.bf16.mxu1 %v9833_v21  ;;  %6215 = verf.f32 %v2290_v45  ;;  %v2284_v44 = vmul.f32 0.70710677, %v1277_v52  ;;  %v1329_v59 = vadd.f32 %v7800_v51, %v7744_v22  ;;  %v2653_v17 = vmul.f32 %v2525_v19, %v7859_v4 }
 0x2b8   : > { %v7898_v41 = vpop.f32.mrf.mxu1  ;;  %v6200_v23 = vpop.eup %6199  ;;  %v2529_v26 = vadd.f32 1.0, %v6198_v3  ;;  %9837 = vst [vmem:[#allocation29_spill] sm:$0xff] %v7936_v0  ;;  %v7944_v6 = vmul.f32 0.5, %v1334_v5  ;;  %v2288_v45 = vmul.f32 0.70710677, %v1326_v13  ;;  %6217 = verf.f32 %v2291_v53 }
 0x2b9   : > { %9832 = vst [vmem:[#allocation25_spill] sm:$0xff] %v7898_v41  ;;  %v6202_v60 = vpop.eup %6201  ;;  %v7931_v2 = vpop.f32.mrf.mxu0  ;;  %v2538_v50 = vadd.f32 1.0, %v6200_v23  ;;  %v2295_v51 = vmul.f32 0.70710677, %v7929_v25  ;;  %6219 = verf.f32 %v2284_v44  ;;  %v2289_v19 = vmul.f32 0.70710677, %v1329_v59 }
 0x2ba   : > { %v7911_v40 = vpop.f32.mrf.mxu1  ;;  %9835 = vst [vmem:[#allocation27_spill] sm:$0xff] %v7931_v2  ;;  %v6204_v3 = vpop.eup %6203  ;;  %v7950_v34 = vmul.f32 %v2529_v26, %v2145_v33  ;;  %v2285_v2 = vmul.f32 0.70710677, %v1280_v28  ;;  %v2532_v0 = vadd.f32 1.0, %v6202_v60  ;;  %6221 = verf.f32 %v2288_v45 }
 0x2bb   : > { %9834 = vst [vmem:[#allocation26_spill] sm:$0xff] %v7911_v40  ;;  %v6206_v58 = vpop.eup %6205  ;;  %v2536_v41 = vadd.f32 1.0, %v6204_v3  ;;  %v7953_v40 = vpop.f32.mrf.mxu0  ;;  %v1342_v23 = vadd.f32 %v7815_v7, %v7696_v49  ;;  %v2780_v26 = vpack.c.bf16 %v2653_v17, %v2652_v56  ;;  %v7961_v60 = vmul.f32 0.5, %v1277_v52 }
 0x2bc   : > { %v7933_v38 = vpop.f32.mrf.mxu1  ;;  %v2539_v5 = vadd.f32 1.0, %v6206_v58  ;;  %v7963_v53 = vmul.f32 0.5, %v1326_v13  ;;  %6223 = verf.f32 %v2285_v2  ;;  %v7967_v3 = vadd.f32 %v7830_v20, %v7723_v36  ;;  %v6208_v44 = vpop.eup %6207 }
 0x2bd   : > { %9836 = vst [vmem:[#allocation28_spill] sm:$0xff] %v7933_v38  ;;  %v1350_v38 = vadd.f32 %v7808_v54, %v7729_v57  ;;  %v1399_v54 = vadd.f32 %v7810_v63, %v7721_v11  ;;  %v7970_v58 = vmul.f32 %v2538_v50, %v7875_v62  ;;  %v7973_v63 = vmul.f32 %v2532_v0, %v7880_v27  ;;  %v7977_v52 = vpop.f32.mrf.mxu0  ;;  %v6210_v56 = vpop.eup %6209 }
 0x2be   : > { %v7955_v4 = vpop.f32.mrf.mxu1  ;;  %v1391_v7 = vadd.f32 %v7817_v8, %v7731_v14  ;;  %6225 = verf.f32 %v2295_v51  ;;  %5765 = vmatpush3.bf16.msra.mxu0 %v2780_v26  ;;  %v7982_v20 = vmul.f32 %v2539_v5, %v7893_v24  ;;  %v2159_v2 = vmul.f32 0.5, %v7863_v48 }
 0x2bf   : > { %v2294_v33 = vmul.f32 0.70710677, %v1350_v38  ;;  %6227 = verf.f32 %v2289_v19  ;;  %v2298_v62 = vmul.f32 0.70710677, %v1399_v54  ;;  %5766 = vmatprep.subr.bf16.mxu0 %v9833_v21  ;;  %v7987_v0 = vmul.f32 %v2536_v41, %v7890_v29 }
 0x2c0   : > { %v7979_v13 = vpop.f32.mrf.mxu1  ;;  %v7990_v8 = vmul.f32 0.5, %v7902_v15  ;;  %v2292_v17 = vmul.f32 0.70710677, %v1342_v23  ;;  %v2533_v50 = vadd.f32 1.0, %v6208_v44  ;;  %v7992_v51 = vmul.f32 0.5, %v1280_v28  ;;  %v8006_v28 = vpop.f32.mrf.mxu0 }
 0x2c1   : > { %9838 = vst [vmem:[#allocation30_spill] sm:$0xff] %v7987_v0  ;;  %6229 = verf.f32 %v2294_v33  ;;  %v2299_v24 = vmul.f32 0.70710677, %v7967_v3  ;;  %v7997_v48 = vadd.f32 %v7839_v31, %v7710_v61  ;;  %v2537_v19 = vadd.f32 1.0, %v6210_v56 }
 0x2c2   : > { %v6212_v27 = vpop.eup %6211  ;;  %v7999_v26 = vmul.f32 0.5, %v1329_v59  ;;  %v2296_v41 = vmul.f32 0.70710677, %v1391_v7  ;;  %v1394_v29 = vadd.f32 %v7841_v37, %v7744_v22  ;;  %v9839_v15 = vpack.c.bf16 %v7856_v18, %v7871_v39  ;;  %v8008_v33 = vpop.f32.mrf.mxu1 }
 0x2c3   : > { %v6214_v45 = vpop.eup %6213  ;;  %9840 = vst [vmem:[#allocation31_spill] sm:$0xff] %v8008_v33  ;;  %v8012_v44 = vmul.f32 0.5, %v1350_v38  ;;  %6231 = verf.f32 %v2298_v62  ;;  %v8016_v59 = vadd.f32 %v7852_v47, %v7729_v57  ;;  %v2542_v37 = vadd.f32 1.0, %v6212_v27 }
 0x2c4   : > { %v6216_v5 = vpop.eup %6215  ;;  %5767 = vmatpush3.bf16.msra.mxu0 %v9839_v15  ;;  %v2543_v56 = vadd.f32 1.0, %v6214_v45  ;;  %6233 = verf.f32 %v2292_v17  ;;  %v8021_v18 = vadd.f32 %v7854_v16, %v7721_v11  ;;  %v2661_v39 = vmul.f32 %v2533_v50, %v7907_v43  ;;  %v8032_v17 = vpop.f32.mrf.mxu0 }
 0x2c5   : > { %5768 = vmatprep.subr.bf16.mxu0 %v9833_v21  ;;  %v2546_v15 = vadd.f32 1.0, %v6216_v5  ;;  %6235 = verf.f32 %v2299_v24  ;;  %v2293_v38 = vmul.f32 0.70710677, %v7997_v48  ;;  %v8026_v62 = vmul.f32 %v2537_v19, %v7913_v30  ;;  %v8034_v16 = vpop.f32.mrf.mxu1  ;;  %v6218_v45 = vpop.eup %6217 }
 0x2c6   : > { %6237 = verf.f32 %v2296_v41  ;;  %v2297_v47 = vmul.f32 0.70710677, %v1394_v29  ;;  %v8030_v27 = vadd.f32 %v7883_v9, %v7685_v32  ;;  %9842 = vst [vmem:[#allocation33_spill] sm:$0xff] %v8034_v16  ;;  %v8036_v31 = vmul.f32 0.5, %v1399_v54  ;;  %v6220_v24 = vpop.eup %6219 }
 0x2c7   : > { %9841 = vst [vmem:[#allocation32_spill] sm:$0xff] %v8026_v62  ;;  %v8038_v43 = vmul.f32 0.5, %v1342_v23  ;;  %v2302_v50 = vmul.f32 0.70710677, %v8016_v59  ;;  %v1407_v30 = vadd.f32 %v7867_v10, %v7696_v49  ;;  %v2670_v5 = vmul.f32 %v2542_v37, %v7939_v42  ;;  %v6222_v35 = vpop.eup %6221  ;;  %v9843_v23 = vld [vmem:[#allocation22_spill] sm:$0xff]  ;;  %v8058_v37 = vpop.f32.mrf.mxu0 }
 0x2c8   : > { %v2671_v19 = vmul.f32 %v2543_v56, %v2159_v2  ;;  %v8044_v9 = vmul.f32 0.5, %v1391_v7  ;;  %v2306_v41 = vmul.f32 0.70710677, %v8021_v18  ;;  %v8048_v16 = vmul.f32 %v2546_v15, %v7944_v6  ;;  %v9844_v7 = vld [vmem:[#allocation23_spill] sm:$0xff]  ;;  %9845 = vst [vmem:[#allocation22_spill] sm:$0xff] %v8058_v37  ;;  %v8060_v56 = vpop.f32.mrf.mxu1 }
 0x2c9   : > { %v2167_v54 = vmul.f32 0.5, %v7929_v25  ;;  %6239 = verf.f32 %v2293_v38  ;;  %v8053_v33 = vadd.f32 %v9843_v23, %v7731_v14  ;;  %v6224_v10 = vpop.eup %6223  ;;  %v2547_v62 = vadd.f32 1.0, %v6218_v45  ;;  %9846 = vst [vmem:[#allocation23_spill] sm:$0xff] %v8060_v56 }
 0x2ca   : > { %6241 = verf.f32 %v2297_v47  ;;  %v2303_v42 = vmul.f32 0.70710677, %v8030_v27  ;;  %v2778_v2 = vpack.c.bf16 %v7896_v1, %v9844_v7  ;;  %v2540_v15 = vadd.f32 1.0, %v6220_v24  ;;  %v8068_v47 = vld [vmem:[%s9763_s5] sm:$0xff]  }
 0x2cb   : > { %v6226_v6 = vpop.eup %6225  ;;  %v8063_v25 = vmul.f32 0.5, %v7967_v3  ;;  %6243 = verf.f32 %v2302_v50  ;;  %v2300_v38 = vmul.f32 0.70710677, %v1407_v30  ;;  %v2544_v23 = vadd.f32 1.0, %v6222_v35 }
 0x2cc   : > { %v6228_v45 = vpop.eup %6227  ;;  %v2789_v0 = vpack.c.bf16 %v2671_v19, %v2670_v5  ;;  %6245 = verf.f32 %v2306_v41  ;;  %5769 = vmatpush3.bf16.msra.mxu0 %v2778_v2  ;;  %v2784_v1 = vpack.c.bf16 %v2661_v39, %v7973_v63  ;;  %v2541_v56 = vadd.f32 1.0, %v6224_v10  ;;  %v9847_v5 = vld [vmem:[#allocation24_spill] sm:$0xff]  ;;  %v8083_v63 = vpop.f32.mrf.mxu0 }
 0x2cd   : > { %v8072_v24 = vmul.f32 0.5, %v7997_v48  ;;  %v8074_v3 = vmul.f32 0.5, %v1394_v29  ;;  %v2304_v50 = vmul.f32 0.70710677, %v8053_v33  ;;  %5786 = vmatprep.subr.bf16.mxu0 %v9833_v21  ;;  %v8079_v37 = vmul.f32 %v2547_v62, %v7990_v8  ;;  %v8085_v39 = vpop.f32.mrf.mxu1 }
 0x2ce   : > { %v6230_v7 = vpop.eup %6229  ;;  %v2551_v35 = vadd.f32 1.0, %v6226_v6  ;;  %6247 = verf.f32 %v2303_v42  ;;  %v1467_v19 = vadd.f32 %v9847_v5, %v7723_v36  ;;  %5777 = vmatpush3.bf16.msra.mxu1 %v2784_v1  ;;  %9848 = vst [vmem:[#allocation24_spill] sm:$0xff] %v8085_v39  ;;  %v8088_v48 = vmul.f32 %v2540_v15, %v7961_v60  ;;  %v9851_v5 = vld [vmem:[#allocation25_spill] sm:$0xff] }
 0x2cf   : > { %v2545_v29 = vadd.f32 1.0, %v6228_v45  ;;  %6249 = verf.f32 %v2300_v38  ;;  %v8092_v41 = vadd.f32 %v7955_v4, %v7685_v32  ;;  %5771 = vmatmul.mubr.msk.bf16.vlgmr.msra.gmra.mxu0 %vm2847_vm2, %v8068_v47  ;;  %5778 = vmatprep.subr.bf16.mxu1 %v9833_v21  ;;  %v8098_v62 = vmul.f32 %v2544_v23, %v7963_v53  ;;  %v9849_v53 = vld [vmem:[#allocation26_spill] sm:$0xff]  ;;  %v8125_v23 = vpop.f32.mrf.mxu1 }
 0x2d0   : > { %v6232_v8 = vpop.eup %6231  ;;  %v2550_v10 = vadd.f32 1.0, %v6230_v7  ;;  %v8101_v42 = vmul.f32 0.5, %v8016_v59  ;;  %v1410_v60 = vadd.f32 %v7904_v46, %v7710_v61  ;;  %5787 = vmatpush3.bf16.msra.mxu0 %v2789_v0  ;;  %5794 = vmatprep.mubr.msk.bf16.mxu0 %vm6900_vm1, %v9833_v21  ;;  %v8108_v2 = vmul.f32 0.5, %v8021_v18 }
 0x2d1   : > { %v6234_v4 = vpop.eup %6233  ;;  %v8110_v6 = vmul.f32 0.5, %v1407_v30  ;;  %6251 = verf.f32 %v2304_v50  ;;  %v8114_v15 = vadd.f32 %v9849_v53, %v7729_v57  ;;  %5788 = vmatprep.subr.bf16.mxu0 %v9833_v21  ;;  %v2669_v0 = vmul.f32 %v2541_v56, %v7992_v51  ;;  %v8123_v30 = vpop.f32.mrf.mxu0  ;;  %v9852_v56 = vld [vmem:[#allocation29_spill] sm:$0xff] }
 0x2d2   : > { %v6236_v59 = vpop.eup %6235  ;;  %v2679_v38 = vmul.f32 %v2551_v35, %v2167_v54  ;;  %v2307_v45 = vmul.f32 0.70710677, %v1467_v19  ;;  %v9850_v18 = vpack.c.bf16 %v7918_v55, %v7923_v12  ;;  %v8128_v7 = vmul.f32 %v2545_v29, %v7999_v26 }
 0x2d3   : > { %v6238_v1 = vpop.eup %6237  ;;  %v2554_v50 = vadd.f32 1.0, %v6232_v8  ;;  %v1459_v53 = vadd.f32 %v9851_v5, %v7744_v22  ;;  %v2311_v51 = vmul.f32 0.70710677, %v8092_v41  ;;  %v2678_v54 = vmul.f32 %v2550_v10, %v8012_v44  ;;  %v9853_v44 = vld [vmem:[#allocation27_spill] sm:$0xff] }
 0x2d4   : > { %5779 = vmatpush3.bf16.msra.mxu1 %v9850_v18  ;;  %v2548_v55 = vadd.f32 1.0, %v6234_v4  ;;  %v2301_v12 = vmul.f32 0.70710677, %v1410_v60  ;;  %v2782_v35 = vpack.c.bf16 %v7950_v34, %v9852_v56  ;;  %v2555_v18 = vadd.f32 1.0, %v6236_v59  ;;  %v8146_v4 = vpop.f32.mrf.mxu0  ;;  %v8148_v34 = vpop.f32.mrf.mxu1 }
 0x2d5   : > { %5780 = vmatprep.subr.bf16.mxu1 %v9833_v21  ;;  %v8138_v46 = vmul.f32 0.5, %v8053_v33  ;;  %v8141_v26 = vmul.f32 0.5, %v8030_v27  ;;  %v2310_v29 = vmul.f32 0.70710677, %v8114_v15  ;;  %v2552_v5 = vadd.f32 1.0, %v6238_v1 }
 0x2d6   : > { %v6240_v8 = vpop.eup %6239  ;;  %v2793_v39 = vpack.c.bf16 %v2679_v38, %v2678_v54  ;;  %6253 = verf.f32 %v2307_v45  ;;  %v1529_v10 = vadd.f32 %v9853_v44, %v7721_v11  ;;  %v8151_v33 = vmul.f32 %v2554_v50, %v8036_v31  ;;  %v9854_v54 = vld [vmem:[#allocation28_spill] sm:$0xff] }
 0x2d7   : > { %v6242_v59 = vpop.eup %6241  ;;  %v8153_v27 = vmul.f32 0.5, %v1467_v19  ;;  %v2305_v56 = vmul.f32 0.70710677, %v1459_v53  ;;  %6255 = verf.f32 %v2311_v51  ;;  %v8157_v45 = vmul.f32 %v2548_v55, %v8038_v43 }
 0x2d8   : > { %5781 = vmatpush3.bf16.msra.mxu1 %v2782_v35  ;;  %v6244_v38 = vpop.eup %6243  ;;  %v8159_v1 = vmul.f32 0.5, %v1410_v60  ;;  %6257 = verf.f32 %v2301_v12  ;;  %v1472_v35 = vadd.f32 %v9854_v54, %v7696_v49  ;;  %v8164_v31 = vmul.f32 %v2555_v18, %v8063_v25  ;;  %v8178_v25 = vpop.f32.mrf.mxu0 }
 0x2d9   : > { %5798 = vmatprep.subr.bf16.mxu1 %v9833_v21  ;;  %v6246_v44 = vpop.eup %6245  ;;  %v2549_v19 = vadd.f32 1.0, %v6240_v8  ;;  %6259 = verf.f32 %v2310_v29  ;;  %v2788_v50 = vpack.c.bf16 %v2669_v0, %v8088_v48  ;;  %v8170_v43 = vmul.f32 %v2552_v5, %v8044_v9  ;;  %v8180_v12 = vpop.f32.mrf.mxu1 }
 0x2da   : > { %v8172_v60 = vmul.f32 0.5, %v1459_v53  ;;  %v2314_v51 = vmul.f32 0.70710677, %v1529_v10  ;;  %v8176_v55 = vadd.f32 %v7979_v13, %v7710_v61  ;;  %v2553_v0 = vadd.f32 1.0, %v6242_v59 }
 0x2db   : > { %5783 = vmatmul.mubr.msk.bf16.vlgmr.msra.gmra.mxu1 %vm2847_vm2, %v8068_v47  ;;  %9855 = vst [vmem:[#allocation26_spill] sm:$0xff] %v8170_v43  ;;  %v6248_v48 = vpop.eup %6247  ;;  %v2558_v18 = vadd.f32 1.0, %v6244_v38  ;;  %6261 = verf.f32 %v2305_v56  ;;  %v1521_v9 = vadd.f32 %v7953_v40, %v7731_v14  ;;  %5789 = vmatpush3.bf16.msra.mxu0 %v2788_v50  ;;  %v2562_v29 = vadd.f32 1.0, %v6246_v44  ;;  %v8205_v44 = vpop.f32.mrf.mxu0 }
 0x2dc   : > { %5799 = vmatpush3.bf16.msra.mxu1 %v2793_v39  ;;  %5806 = vmatprep.mubr.msk.bf16.mxu1 %vm6900_vm1, %v9833_v21  ;;  %v6250_v53 = vpop.eup %6249  ;;  %v8187_v13 = vmul.f32 0.5, %v8114_v15  ;;  %v2308_v39 = vmul.f32 0.70710677, %v1472_v35  ;;  %v1532_v8 = vadd.f32 %v7977_v52, %v7723_v36  ;;  %v2677_v59 = vmul.f32 %v2549_v19, %v8072_v24  ;;  %v8207_v50 = vpop.f32.mrf.mxu1 }
 0x2dd   : > { %5790 = vmatprep.subr.bf16.mxu0 %v9833_v21  ;;  %5800 = vmatprep.subr.bf16.mxu1 %v9833_v21  ;;  %v8196_v40 = vmul.f32 0.5, %v1529_v10  ;;  %v8200_v56 = vadd.f32 %v8083_v63, %v7685_v32  ;;  %v2559_v38 = vadd.f32 1.0, %v6248_v48  ;;  %6263 = verf.f32 %v2314_v51 }
 0x2de   : > { %v6252_v15 = vpop.eup %6251  ;;  %v2309_v52 = vmul.f32 0.70710677, %v8176_v55  ;;  %v1545_v54 = vadd.f32 %v8032_v17, %v7729_v57  ;;  %v8210_v24 = vmul.f32 %v2553_v0, %v8074_v3  ;;  %v2686_v10 = vmul.f32 %v2558_v18, %v8101_v42 }
 0x2df   : > { %v2556_v19 = vadd.f32 1.0, %v6250_v53  ;;  %v2312_v63 = vmul.f32 0.70710677, %v1521_v9  ;;  %v9857_v48 = vpack.c.bf16 %v7982_v20, %v7970_v58  ;;  %v8217_v51 = vmul.f32 %v2562_v29, %v8108_v2  ;;  %v9859_v2 = vld [vmem:[#allocation22_spill] sm:$0xff]  ;;  %v8232_v29 = vpop.f32.mrf.mxu0 }
 0x2e0   : > { %9856 = vst [vmem:[#allocation25_spill] sm:$0xff] %v8210_v24  ;;  %6265 = verf.f32 %v2308_v39  ;;  %v2315_v17 = vmul.f32 0.70710677, %v1532_v8  ;;  %v1524_v5 = vadd.f32 %v8006_v28, %v7744_v22  ;;  %v2560_v3 = vadd.f32 1.0, %v6252_v15  ;;  %v8234_v28 = vpop.f32.mrf.mxu1 }
 0x2e1   : > { %5791 = vmatpush3.bf16.msra.mxu0 %v9857_v48  ;;  %v8222_v0 = vmul.f32 0.5, %v1472_v35  ;;  %v8224_v42 = vmul.f32 0.5, %v1521_v9  ;;  %v2319_v18 = vmul.f32 0.70710677, %v8200_v56  ;;  %v2687_v58 = vmul.f32 %v2559_v38, %v8141_v26  ;;  %9860 = vst [vmem:[#allocation27_spill] sm:$0xff] %v8234_v28  ;;  %v9861_v48 = vld [vmem:[#allocation30_spill] sm:$0xff] }
 0x2e2   : > { %5792 = vmatprep.subr.bf16.mxu0 %v9833_v21  ;;  %6267 = verf.f32 %v2309_v52  ;;  %v2318_v20 = vmul.f32 0.70710677, %v1545_v54  ;;  %v8230_v53 = vadd.f32 %v9859_v2, %v7696_v49  ;;  %v8237_v35 = vmul.f32 %v2556_v19, %v8110_v6  ;;  %v9862_v2 = vld [vmem:[#allocation32_spill] sm:$0xff]  ;;  %v8257_v43 = vpop.f32.mrf.mxu1 }
 0x2e3   : > { %9858 = vst [vmem:[#allocation29_spill] sm:$0xff] %v8224_v42  ;;  %v6254_v39 = vpop.eup %6253  ;;  %6269 = verf.f32 %v2312_v63  ;;  %v2183_v9 = vmul.f32 0.5, %v8092_v41  ;;  %v8242_v26 = vadd.f32 %v8123_v30, %v7710_v61  ;;  %v2313_v38 = vmul.f32 0.70710677, %v1524_v5 }
 0x2e4   : > { %v6256_v15 = vpop.eup %6255  ;;  %6271 = verf.f32 %v2315_v17  ;;  %v8246_v52 = vadd.f32 %v8125_v23, %v7729_v57  ;;  %v2786_v42 = vpack.c.bf16 %v9862_v2, %v9861_v48  ;;  %v8251_v6 = vmul.f32 %v2560_v3, %v8138_v46  ;;  %v5690_v23 = vpop.f32.mrf.mxu0  ;;  %v9863_v2 = vld [vmem:[#allocation31_spill] sm:$0xff] }
 0x2e5   : > { %v6258_v28 = vpop.eup %6257  ;;  %v8253_v19 = vmul.f32 0.5, %v1532_v8  ;;  %6273 = verf.f32 %v2319_v18  ;;  %v2792_v41 = vpack.c.bf16 %v2677_v59, %v8157_v45  ;;  %v2797_v63 = vpack.c.bf16 %v2687_v58, %v2686_v10 }
 0x2e6   : > { %v6260_v30 = vpop.eup %6259  ;;  %v2563_v17 = vadd.f32 1.0, %v6254_v39  ;;  %6275 = verf.f32 %v2318_v20  ;;  %v2316_v24 = vmul.f32 0.70710677, %v8230_v53  ;;  %5793 = vmatpush3.bf16.msra.mxu0 %v2786_v42  ;;  %v2567_v48 = vadd.f32 1.0, %v6256_v15  ;;  %v8294_v15 = vpop.f32.mrf.mxu1 }
 0x2e7   : > { %v8261_v46 = vadd.f32 %v9863_v2, %v7721_v11  ;;  %v2317_v8 = vmul.f32 0.70710677, %v8242_v26  ;;  %5801 = vmatpush3.bf16.msra.mxu1 %v2792_v41  ;;  %v8266_v45 = vadd.f32 %v8180_v12, %v7685_v32  ;;  %v2557_v10 = vadd.f32 1.0, %v6258_v28  ;;  %5810 = vmatprep.subr.bf16.mxu0 %v9833_v21  ;;  %v9864_v12 = vld [vmem:[#allocation33_spill] sm:$0xff] }
 0x2e8   : > { %v6262_v59 = vpop.eup %6261  ;;  %v8269_v3 = vmul.f32 0.5, %v8176_v55  ;;  %6277 = verf.f32 %v2313_v38  ;;  %v2326_v42 = vmul.f32 0.70710677, %v8246_v52  ;;  %5802 = vmatprep.subr.bf16.mxu1 %v9833_v21  ;;  %v2566_v18 = vadd.f32 1.0, %v6260_v30 }
 0x2e9   : > { %v8274_v58 = vmul.f32 0.5, %v1524_v5  ;;  %v8276_v20 = vmul.f32 0.5, %v1545_v54  ;;  %v8280_v39 = vadd.f32 %v9864_v12, %v7731_v14  ;;  %5795 = vmatmul.mubr.msk.bf16.vlgmr.msra.gmra.mxu0 %vm2847_vm2, %v8068_v47  ;;  %v8285_v55 = vmul.f32 %v2563_v17, %v8153_v27  ;;  %v8292_v54 = vpop.f32.mrf.mxu0  ;;  %v9865_v27 = vld [vmem:[#allocation23_spill] sm:$0xff]  ;;  %v8322_v12 = vpop.f32.mrf.mxu1 }
 0x2ea   : > { %6279 = verf.f32 %v2316_v24  ;;  %v2327_v28 = vmul.f32 0.70710677, %v8266_v45  ;;  %5811 = vmatpush3.bf16.msra.mxu0 %v2797_v63  ;;  %v8290_v5 = vadd.f32 %v8207_v50, %v7710_v61  ;;  %5818 = vmatprep.mubr.msk.bf16.mxu0 %vm6900_vm1, %v9833_v21  ;;  %v6264_v38 = vpop.eup %6263  ;;  %v2561_v41 = vadd.f32 1.0, %v6262_v59  ;;  %v9867_v59 = vld [vmem:[#allocation24_spill] sm:$0xff] }
 0x2eb   : > { %v2695_v30 = vmul.f32 %v2567_v48, %v2183_v9  ;;  %v1597_v24 = vadd.f32 %v9865_v27, %v7723_v36  ;;  %6281 = verf.f32 %v2317_v8  ;;  %v9866_v63 = vpack.c.bf16 %v8079_v37, %v8048_v16  ;;  %5812 = vmatprep.subr.bf16.mxu0 %v9833_v21  ;;  %v5700_v37 = vpop.f32.mrf.mxu1 }
 0x2ec   : > { %v2685_v50 = vmul.f32 %v2557_v10, %v8159_v1  ;;  %v2322_v17 = vmul.f32 0.70710677, %v8261_v46  ;;  %6283 = verf.f32 %v2326_v42  ;;  %v8308_v2 = vadd.f32 %v8148_v34, %v7696_v49  ;;  %v5691_v42 = vpop.f32.mrf.mxu0 }
 0x2ed   : > { %5803 = vmatpush3.bf16.msra.mxu1 %v9866_v63  ;;  %v6266_v9 = vpop.eup %6265  ;;  %v2694_v48 = vmul.f32 %v2566_v18, %v8187_v13  ;;  %v2320_v8 = vmul.f32 0.70710677, %v8280_v39  ;;  %6285 = verf.f32 %v2327_v28  ;;  %v2790_v16 = vpack.c.bf16 %v8128_v7, %v8098_v62 }
 0x2ee   : > { %5804 = vmatprep.subr.bf16.mxu1 %v9833_v21  ;;  %v2570_v1 = vadd.f32 1.0, %v6264_v38  ;;  %v8319_v10 = vadd.f32 %v9867_v59, %v7744_v22  ;;  %v2325_v34 = vmul.f32 0.70710677, %v8290_v5  ;;  %v8325_v18 = vmul.f32 %v2561_v41, %v8172_v60 }
 0x2ef   : > { %v6268_v13 = vpop.eup %6267  ;;  %v2801_v28 = vpack.c.bf16 %v2695_v30, %v2694_v48  ;;  %v2323_v27 = vmul.f32 0.70710677, %v1597_v24  ;;  %v8328_v62 = vadd.f32 %v5690_v23, %v7729_v57  ;;  %v2564_v38 = vadd.f32 1.0, %v6266_v9 }
 0x2f0   : > { %v8330_v7 = vpop.eup %6269  ;;  %6287 = verf.f32 %v2322_v17  ;;  %v8334_v63 = vadd.f32 %v8146_v4, %v7721_v11  ;;  %v2324_v59 = vmul.f32 0.70710677, %v8308_v2  ;;  %v8339_v41 = vmul.f32 0.5, %v8230_v53 }
 0x2f1   : > { %5805 = vmatpush3.bf16.msra.mxu1 %v2790_v16  ;;  %v6272_v60 = vpop.eup %6271  ;;  %6289 = verf.f32 %v2320_v8  ;;  %v2191_v23 = vmul.f32 0.5, %v8200_v56  ;;  %v8342_v30 = vmul.f32 0.5, %v1597_v24  ;;  %v8345_v17 = vmul.f32 %v2570_v1, %v8196_v40  ;;  %v1669_v16 = vpop.f32.mrf.mxu0 }
 0x2f2   : > { %9868 = vst [vmem:[#allocation28_spill] sm:$0xff] %v8334_v63  ;;  %5822 = vmatprep.subr.bf16.mxu1 %v9833_v21  ;;  %v6274_v48 = vpop.eup %6273  ;;  %v2565_v9 = vadd.f32 1.0, %v6268_v13  ;;  %v2321_v4 = vmul.f32 0.70710677, %v8319_v10  ;;  %6291 = verf.f32 %v2325_v34  ;;  %v8351_v8 = vmul.f32 0.5, %v8242_v26 }
 0x2f3   : > { %v6276_v53 = vpop.eup %6275  ;;  %6293 = verf.f32 %v2323_v27  ;;  %v2334_v56 = vmul.f32 0.70710677, %v8328_v62  ;;  %v2796_v24 = vpack.c.bf16 %v2685_v50, %v8237_v35  ;;  %v2692_v40 = vmul.f32 %v2564_v38, %v8222_v0 }
 0x2f4   : > { %5807 = vmatmul.mubr.msk.bf16.vlgmr.msra.gmra.mxu1 %vm2847_vm2, %v8068_v47  ;;  %v2571_v1 = vadd.f32 1.0, %v6272_v60  ;;  %v2330_v34 = vmul.f32 0.70710677, %v8334_v63  ;;  %6295 = verf.f32 %v2324_v59  ;;  %v2575_v27 = vadd.f32 1.0, %v6274_v48  ;;  %v1731_v59 = vpop.f32.mrf.mxu1 }
 0x2f5   : > { %5823 = vmatpush3.bf16.msra.mxu1 %v2801_v28  ;;  %5830 = vmatprep.mubr.msk.bf16.mxu1 %vm6900_vm1, %v9833_v21  ;;  %v6278_v13 = vpop.eup %6277  ;;  %v8362_v26 = vadd.f32 %v8292_v54, %v7696_v49  ;;  %v8365_v35 = vadd.f32 %v5691_v42, %v7685_v32  ;;  %v8368_v50 = vadd.f32 %v1669_v16, %v7710_v61  ;;  %v2574_v28 = vadd.f32 1.0, %v6276_v53 }
 0x2f6   : > { %5824 = vmatprep.subr.bf16.mxu1 %v9833_v21  ;;  %5813 = vmatpush3.bf16.msra.mxu0 %v2796_v24  ;;  %v2693_v0 = vmul.f32 %v2565_v9, %v8269_v3  ;;  %6297 = verf.f32 %v2321_v4  ;;  %v8373_v38 = vadd.f32 %v8205_v44, %v7723_v36  ;;  %v2198_v54 = vmul.f32 0.5, %v8246_v52 }
 0x2f7   : > { %9869 = vst [vmem:[#allocation22_spill] sm:$0xff] %v8362_v26  ;;  %5814 = vmatprep.subr.bf16.mxu0 %v9833_v21  ;;  %v6280_v60 = vpop.eup %6279  ;;  %v8379_v42 = vadd.f32 %v8178_v25, %v7731_v14  ;;  %6299 = verf.f32 %v2334_v56  ;;  %v2335_v48 = vmul.f32 0.70710677, %v8365_v35  ;;  %v8383_v9 = vmul.f32 %v2571_v1, %v8253_v19 }
 0x2f8   : > { %v6282_v3 = vpop.eup %6281  ;;  %v8385_v4 = vadd.f32 1.0, %v6278_v13  ;;  %v8389_v44 = vadd.f32 %v8232_v29, %v7744_v22  ;;  %v2333_v16 = vmul.f32 0.70710677, %v8368_v50  ;;  %v2703_v53 = vmul.f32 %v2575_v27, %v2191_v23  ;;  %v5701_v23 = vpop.f32.mrf.mxu1 }
 0x2f9   : > { %v6284_v52 = vpop.eup %6283  ;;  %6301 = verf.f32 %v2330_v34  ;;  %v2332_v25 = vmul.f32 0.70710677, %v8362_v26  ;;  %v9870_v56 = vpack.c.bf16 %v8164_v31, %v8151_v33  ;;  %v8397_v19 = vadd.f32 %v5700_v37, %v7729_v57  ;;  %v9871_v33 = vld [vmem:[#allocation26_spill] sm:$0xff]  ;;  %v9872_v31 = vld [vmem:[#allocation25_spill] sm:$0xff] }
 0x2fa   : > { %v6286_v24 = vpop.eup %6285  ;;  %v2702_v1 = vmul.f32 %v2574_v28, %v8276_v20  ;;  %v2331_v29 = vmul.f32 0.70710677, %v8373_v38  ;;  %6303 = verf.f32 %v2335_v48  ;;  %v2800_v13 = vpack.c.bf16 %v2693_v0, %v2692_v40 }
 0x2fb   : > { %5815 = vmatpush3.bf16.msra.mxu0 %v9870_v56  ;;  %v2573_v34 = vadd.f32 1.0, %v6282_v3  ;;  %v2328_v27 = vmul.f32 0.70710677, %v8379_v42  ;;  %v2199_v63 = vmul.f32 0.5, %v8266_v45  ;;  %v2794_v56 = vpack.c.bf16 %v9872_v31, %v9871_v33 }
 0x2fc   : > { %5816 = vmatprep.subr.bf16.mxu0 %v9833_v21  ;;  %v2572_v37 = vadd.f32 1.0, %v6280_v60  ;;  %v2583_v57 = vadd.f32 1.0, %v6286_v24  ;;  %v2329_v26 = vmul.f32 0.70710677, %v8389_v44  ;;  %6305 = verf.f32 %v2333_v16  ;;  %5825 = vmatpush3.bf16.msra.mxu1 %v2800_v13  ;;  %v1734_v16 = vpop.f32.mrf.mxu1  ;;  %v9873_v24 = vld [vmem:[#allocation27_spill] sm:$0xff] }
 0x2fd   : > { %v8407_v20 = vpop.eup %6287  ;;  %v2805_v28 = vpack.c.bf16 %v2703_v53, %v2702_v1  ;;  %v2582_v48 = vadd.f32 1.0, %v6284_v52  ;;  %6307 = verf.f32 %v2332_v25  ;;  %v2342_v40 = vmul.f32 0.70710677, %v8397_v19  ;;  %5826 = vmatprep.subr.bf16.mxu1 %v9833_v21 }
 0x2fe   : > { %v8411_v45 = vpop.eup %6289  ;;  %6309 = verf.f32 %v2331_v29  ;;  %v8415_v0 = vadd.f32 %v8294_v15, %v7723_v36  ;;  %v8418_v60 = vadd.f32 %v1731_v59, %v7696_v49  ;;  %v8421_v3 = vadd.f32 %v5701_v23, %v7685_v32 }
 0x2ff   : > { %5817 = vmatpush3.bf16.msra.mxu0 %v2794_v56  ;;  %v6292_v52 = vpop.eup %6291  ;;  %v2701_v53 = vmul.f32 %v2573_v34, %v8351_v8  ;;  %v2197_v25 = vmul.f32 0.5, %v8290_v5  ;;  %v8428_v1 = vadd.f32 %v9873_v24, %v7721_v11  ;;  %6311 = verf.f32 %v2342_v40 }
 0x300   : > { %5834 = vmatprep.subr.bf16.mxu0 %v9833_v21  ;;  %v6294_v15 = vpop.eup %6293  ;;  %v2700_v59 = vmul.f32 %v2572_v37, %v8339_v41  ;;  %6313 = verf.f32 %v2328_v27  ;;  %v2711_v29 = vmul.f32 %v2583_v57, %v2199_v63  ;;  %v2340_v13 = vmul.f32 0.70710677, %v8418_v60 }
 0x301   : > { %v9874_v8 = vpack.c.bf16 %v8285_v55, %v8217_v51  ;;  %v6296_v5 = vpop.eup %6295  ;;  %v2710_v23 = vmul.f32 %v2582_v48, %v2198_v54  ;;  %6315 = verf.f32 %v2329_v26  ;;  %v2343_v34 = vmul.f32 0.70710677, %v8421_v3 }
 0x302   : > { %5819 = vmatmul.mubr.msk.bf16.vlgmr.msra.gmra.mxu0 %vm2847_vm2, %v8068_v47  ;;  %v8439_v33 = vadd.f32 %v1734_v16, %v7710_v61  ;;  %v2581_v57 = vadd.f32 1.0, %v6292_v52  ;;  %v2339_v63 = vmul.f32 0.70710677, %v8415_v0  ;;  %v8445_v41 = vadd.f32 %v8322_v12, %v7744_v22 }
 0x303   : > { %5827 = vmatpush3.bf16.msra.mxu1 %v9874_v8  ;;  %5835 = vmatpush3.bf16.msra.mxu0 %v2805_v28  ;;  %v2798_v51 = vpack.c.bf16 %v8325_v18, %v8251_v6  ;;  %v6298_v55 = vpop.eup %6297  ;;  %v2338_v26 = vmul.f32 0.70710677, %v8428_v1  ;;  %6317 = verf.f32 %v2343_v34  ;;  %v2804_v27 = vpack.c.bf16 %v2701_v53, %v2700_v59  ;;  %v9875_v59 = vld [vmem:[#allocation29_spill] sm:$0xff] }
 0x304   : > { %5828 = vmatprep.subr.bf16.mxu1 %v9833_v21  ;;  %5836 = vmatprep.subr.bf16.mxu0 %v9833_v21  ;;  %v2341_v54 = vmul.f32 0.70710677, %v8439_v33  ;;  %v6300_v31 = vpop.eup %6299  ;;  %v2580_v56 = vadd.f32 1.0, %v6296_v5  ;;  %v2809_v37 = vpack.c.bf16 %v2711_v29, %v2710_v23  ;;  %v8456_v12 = vadd.f32 %v8257_v43, %v7731_v14 }
 0x305   : > { %5842 = vmatprep.mubr.msk.bf16.mxu0 %vm6900_vm1, %v9833_v21  ;;  %6319 = verf.f32 %v2340_v13  ;;  %v2568_v6 = vadd.f32 1.0, %v8330_v7  ;;  %v2803_v18 = vpack.c.bf16 %v8383_v9, %v8345_v17  ;;  %v2579_v28 = vadd.f32 1.0, %v6294_v15 }
 0x306   : > { %6321 = verf.f32 %v2341_v54  ;;  %v6302_v48 = vpop.eup %6301  ;;  %v2196_v40 = vmul.f32 0.5, %v8308_v2  ;;  %v2709_v16 = vmul.f32 %v2581_v57, %v2197_v25  ;;  %v2337_v43 = vmul.f32 0.70710677, %v8445_v41 }
 0x307   : > { %5829 = vmatpush3.bf16.msra.mxu1 %v2798_v51  ;;  %5837 = vmatpush3.bf16.msra.mxu0 %v2804_v27  ;;  %6323 = verf.f32 %v2339_v63  ;;  %v6304_v52 = vpop.eup %6303  ;;  %v2697_v7 = vmul.f32 %v8385_v4, %v8274_v58  ;;  %v2578_v17 = vadd.f32 1.0, %v8407_v20  ;;  %v2590_v9 = vadd.f32 1.0, %v6300_v31 }
 0x308   : > { %5846 = vmatprep.subr.bf16.mxu1 %v9833_v21  ;;  %5838 = vmatprep.subr.bf16.mxu0 %v9833_v21  ;;  %6325 = verf.f32 %v2338_v26  ;;  %v2708_v53 = vmul.f32 %v2580_v56, %v2196_v40  ;;  %v2336_v2 = vmul.f32 0.70710677, %v8456_v12  ;;  %v2207_v25 = vmul.f32 0.5, %v8365_v35 }
 0x309   : > { %v2591_v24 = vadd.f32 1.0, %v6304_v52  ;;  %v6306_v15 = vpop.eup %6305  ;;  %v2696_v58 = vmul.f32 %v2568_v6, %v9875_v59  ;;  %v2194_v4 = vmul.f32 0.5, %v8261_v46  ;;  %v2707_v20 = vmul.f32 %v2579_v28, %v8342_v30 }
 0x30a   : > { %5831 = vmatmul.mubr.msk.bf16.vlgmr.msra.gmra.mxu1 %vm2847_vm2, %v8068_v47  ;;  %v2206_v29 = vmul.f32 0.5, %v8328_v62  ;;  %v6308_v13 = vpop.eup %6307  ;;  %v2577_v8 = vadd.f32 1.0, %v6298_v55  ;;  %6327 = verf.f32 %v2337_v43  ;;  %v2808_v5 = vpack.c.bf16 %v2709_v16, %v2708_v53 }
 0x30b   : > { %5847 = vmatpush3.bf16.msra.mxu1 %v2809_v37  ;;  %5854 = vmatprep.mubr.msk.bf16.mxu1 %vm6900_vm1, %v9833_v21  ;;  %v2719_v35 = vmul.f32 %v2591_v24, %v2207_v25  ;;  %v6310_v23 = vpop.eup %6309  ;;  %v2589_v57 = vadd.f32 1.0, %v6306_v15  ;;  %v2802_v63 = vpack.c.bf16 %v2697_v7, %v2696_v58  ;;  %v2706_v46 = vmul.f32 %v2578_v17, %v2194_v4  ;;  %v9877_v25 = vld [vmem:[#allocation28_spill] sm:$0xff] }
 0x30c   : > { %5839 = vmatpush3.bf16.msra.mxu0 %v2803_v18  ;;  %5848 = vmatprep.subr.bf16.mxu1 %v9833_v21  ;;  %v2718_v34 = vmul.f32 %v2590_v9, %v2206_v29  ;;  %v6312_v51 = vpop.eup %6311  ;;  %v2576_v30 = vadd.f32 1.0, %v8411_v45  ;;  %v2193_v62 = vmul.f32 0.5, %v8319_v10  ;;  %6329 = verf.f32 %v2336_v2  ;;  %v9876_v45 = vld [vmem:[#allocation22_spill] sm:$0xff] }
 0x30d   : > { %5840 = vmatprep.subr.bf16.mxu0 %v9833_v21  ;;  %v6314_v26 = vpop.eup %6313  ;;  %v2588_v54 = vadd.f32 1.0, %v6308_v13  ;;  %v2205_v27 = vmul.f32 0.5, %v8368_v50  ;;  %v2192_v56 = vmul.f32 0.5, %v8280_v39  ;;  %v2807_v37 = vpack.c.bf16 %v2707_v20, %v2706_v46 }
 0x30e   : > { %v2813_v55 = vpack.c.bf16 %v2719_v35, %v2718_v34  ;;  %v6316_v31 = vpop.eup %6315  ;;  %v2705_v6 = vmul.f32 %v2577_v8, %v2193_v62  ;;  %v2587_v18 = vadd.f32 1.0, %v6310_v23  ;;  %v2204_v10 = vmul.f32 0.5, %v9876_v45 }
 0x30f   : > { %5849 = vmatpush3.bf16.msra.mxu1 %v2808_v5  ;;  %v2717_v28 = vmul.f32 %v2589_v57, %v2205_v27  ;;  %v2598_v40 = vadd.f32 1.0, %v6312_v51  ;;  %v2704_v43 = vmul.f32 %v2576_v30, %v2192_v56  ;;  %v2586_v52 = vadd.f32 1.0, %v6302_v48 }
 0x310   : > { %5841 = vmatpush3.bf16.msra.mxu0 %v2802_v63  ;;  %5850 = vmatprep.subr.bf16.mxu1 %v9833_v21  ;;  %v6318_v16 = vpop.eup %6317  ;;  %v2203_v50 = vmul.f32 0.5, %v8373_v38  ;;  %v2716_v39 = vmul.f32 %v2588_v54, %v2204_v10  ;;  %v2214_v17 = vmul.f32 0.5, %v8397_v19  ;;  %v2215_v9 = vmul.f32 0.5, %v8421_v3 }
 0x311   : > { %5858 = vmatprep.subr.bf16.mxu0 %v9833_v21  ;;  %v2599_v53 = vadd.f32 1.0, %v6318_v16  ;;  %v2202_v24 = vmul.f32 0.5, %v9877_v25  ;;  %v2585_v15 = vadd.f32 1.0, %v6316_v31  ;;  %v2806_v38 = vpack.c.bf16 %v2705_v6, %v2704_v43 }
 0x312   : > { %v6320_v7 = vpop.eup %6319  ;;  %v2715_v48 = vmul.f32 %v2587_v18, %v2203_v50  ;;  %v2726_v58 = vmul.f32 %v2598_v40, %v2214_v17  ;;  %v2812_v3 = vpack.c.bf16 %v2717_v28, %v2716_v39  ;;  %v2213_v13 = vmul.f32 0.5, %v8439_v33  ;;  %v9878_v50 = vld [vmem:[#allocation21_spill] sm:$0xff] }
 0x313   : > { %5843 = vmatmul.mubr.msk.bf16.vlgmr.msra.gmra.mxu0 %vm2847_vm2, %v8068_v47  ;;  %5851 = vmatpush3.bf16.msra.mxu1 %v2807_v37  ;;  %v6322_v2 = vpop.eup %6321  ;;  %v2727_v19 = vmul.f32 %v2599_v53, %v2215_v9  ;;  %v2596_v29 = vadd.f32 1.0, %v6320_v7  ;;  %v2714_v8 = vmul.f32 %v2586_v52, %v2202_v24  ;;  %v2584_v35 = vadd.f32 1.0, %v6314_v26 }
 0x314   : > { %5859 = vmatpush3.bf16.msra.mxu0 %v2813_v55  ;;  %5852 = vmatprep.subr.bf16.mxu1 %v9833_v21  ;;  %v6324_v59 = vpop.eup %6323  ;;  %v2597_v4 = vadd.f32 1.0, %v6322_v2  ;;  %v2201_v5 = vmul.f32 0.5, %v8389_v44  ;;  %v2212_v57 = vmul.f32 0.5, %v8418_v60  ;;  %v2200_v30 = vmul.f32 0.5, %v8379_v42 }
 0x315   : > { %5860 = vmatprep.subr.bf16.mxu0 %v9833_v21  ;;  %5866 = vmatprep.mubr.msk.bf16.mxu0 %vm6900_vm1, %v9833_v21  ;;  %v6326_v20 = vpop.eup %6325  ;;  %v2817_v23 = vpack.c.bf16 %v2727_v19, %v2726_v58  ;;  %v2595_v34 = vadd.f32 1.0, %v6324_v59  ;;  %v2811_v33 = vpack.c.bf16 %v2715_v48, %v2714_v8  ;;  %v2211_v26 = vmul.f32 0.5, %v8415_v0 }
 0x316   : > { %v2725_v63 = vmul.f32 %v2597_v4, %v2213_v13  ;;  %v2713_v62 = vmul.f32 %v2585_v15, %v2201_v5  ;;  %v2594_v44 = vadd.f32 1.0, %v6326_v20  ;;  %v2724_v54 = vmul.f32 %v2596_v29, %v2212_v57 }
 0x317   : > { %5853 = vmatpush3.bf16.msra.mxu1 %v2806_v38  ;;  %v6328_v46 = vpop.eup %6327  ;;  %v2712_v27 = vmul.f32 %v2584_v35, %v2200_v30  ;;  %v2210_v42 = vmul.f32 0.5, %v8428_v1  ;;  %v2723_v31 = vmul.f32 %v2595_v34, %v2211_v26  ;;  %v2209_v10 = vmul.f32 0.5, %v8445_v41 }
 0x318   : > { %5861 = vmatpush3.bf16.msra.mxu0 %v2812_v3  ;;  %5870 = vmatprep.subr.bf16.mxu1 %v9833_v21  ;;  %v2593_v56 = vadd.f32 1.0, %v6328_v46  ;;  %v2816_v37 = vpack.c.bf16 %v2725_v63, %v2724_v54  ;;  %v2208_v40 = vmul.f32 0.5, %v8456_v12 }
 0x319   : > { %5862 = vmatprep.subr.bf16.mxu0 %v9833_v21  ;;  %v6330_v55 = vpop.eup %6329  ;;  %v2810_v0 = vpack.c.bf16 %v2713_v62, %v2712_v27  ;;  %v2722_v18 = vmul.f32 %v2594_v44, %v2210_v42 }
 0x31a   : > { %5855 = vmatmul.mubr.msk.bf16.vlgmr.msra.gmra.mxu1 %vm2847_vm2, %v8068_v47  ;;  %v2592_v45 = vadd.f32 1.0, %v6330_v55  ;;  %v2721_v1 = vmul.f32 %v2593_v56, %v2209_v10 }
 0x31b   : > { %5871 = vmatpush3.bf16.msra.mxu1 %v2817_v23  ;;  %5878 = vmatprep.mubr.msk.bf16.mxu1 %vm6900_vm1, %v9833_v21  ;;  %v2815_v16 = vpack.c.bf16 %v2723_v31, %v2722_v18 }
 0x31c   : > { %v5706_v51 = vpop.f32.mrf.mxu0  ;;  %5863 = vmatpush3.bf16.msra.mxu0 %v2811_v33  ;;  %5872 = vmatprep.subr.bf16.mxu1 %v9833_v21  ;;  %v2720_v39 = vmul.f32 %v2592_v45, %v2208_v40 }
 0x31d   : > { %5864 = vmatprep.subr.bf16.mxu0 %v9833_v21  ;;  %v1789_v38 = vadd.f32 %v5706_v51, %v7721_v11 }
 0x31e   : > { %v1780_v60 = vpop.f32.mrf.mxu0  ;;  %v2814_v9 = vpack.c.bf16 %v2721_v1, %v2720_v39 }
 0x31f   : > { %5873 = vmatpush3.bf16.msra.mxu1 %v2816_v37  ;;  %v1781_v29 = vadd.f32 %v1780_v60, %v7731_v14  ;;  %v2346_v8 = vmul.f32 0.70710677, %v1789_v38 }
 0x320   : > { %v5707_v6 = vpop.f32.mrf.mxu0  ;;  %5865 = vmatpush3.bf16.msra.mxu0 %v2810_v0  ;;  %5874 = vmatprep.subr.bf16.mxu1 %v9833_v21 }
 0x321   : > { %5882 = vmatprep.subr.bf16.mxu0 %v9833_v21  ;;  %v8530_v19 = vadd.f32 %v5707_v6, %v7723_v36  ;;  %v2344_v51 = vmul.f32 0.70710677, %v1781_v29 }
 0x322   : > { %v1783_v28 = vpop.f32.mrf.mxu0 }
 0x323   : > { %5867 = vmatmul.mubr.msk.bf16.vlgmr.msra.gmra.mxu0 %vm2847_vm2, %v8068_v47  ;;  %5875 = vmatpush3.bf16.msra.mxu1 %v2815_v16  ;;  %v2347_v5 = vmul.f32 0.70710677, %v8530_v19  ;;  %v1784_v23 = vadd.f32 %v1783_v28, %v7744_v22 }
 0x324   : > { %v5710_v43 = vpop.f32.mrf.mxu0  ;;  %v5716_v52 = vpop.f32.mrf.mxu1  ;;  %5876 = vmatprep.subr.bf16.mxu1 %v9833_v21  ;;  %5890 = vmatprep.mubr.msk.bf16.mxu0 %vm6900_vm1, %v9833_v21 }
 0x325   : > { %v8516_v7 = vadd.f32 %v5710_v43, %v9878_v50  ;;  %v1854_v46 = vadd.f32 %v5716_v52, %v7721_v11  ;;  %v2345_v60 = vmul.f32 0.70710677, %v1784_v23 }
 0x326   : > { %v1796_v41 = vpop.f32.mrf.mxu0  ;;  %v1845_v17 = vpop.f32.mrf.mxu1 }
 0x327   : > { %v2350_v12 = vmul.f32 0.70710677, %v8516_v7  ;;  %5877 = vmatpush3.bf16.msra.mxu1 %v2814_v9  ;;  %v1797_v30 = vadd.f32 %v1796_v41, %v7696_v49  ;;  %v2354_v31 = vmul.f32 0.70710677, %v1854_v46  ;;  %v1846_v37 = vadd.f32 %v1845_v17, %v7731_v14 }
 0x328   : > { %v5711_v53 = vpop.f32.mrf.mxu0  ;;  %v5717_v2 = vpop.f32.mrf.mxu1  ;;  %5894 = vmatprep.subr.bf16.mxu1 %v9833_v21  ;;  %v2222_v40 = vmul.f32 0.5, %v8516_v7 }
 0x329   : > { %6331 = verf.f32 %v2350_v12  ;;  %v1808_v25 = vadd.f32 %v5711_v53, %v7685_v32  ;;  %v1857_v26 = vadd.f32 %v5717_v2, %v7723_v36  ;;  %v2348_v56 = vmul.f32 0.70710677, %v1797_v30 }
 0x32a   : > { %v1799_v24 = vpop.f32.mrf.mxu0  ;;  %v1848_v48 = vpop.f32.mrf.mxu1  ;;  %5879 = vmatmul.mubr.msk.bf16.vlgmr.msra.gmra.mxu1 %vm2847_vm2, %v8068_v47  ;;  %v2352_v12 = vmul.f32 0.70710677, %v1846_v37 }
 0x32b   : > { %v2351_v15 = vmul.f32 0.70710677, %v1808_v25  ;;  %5902 = vmatprep.mubr.msk.bf16.mxu1 %vm6900_vm1, %v9833_v21  ;;  %v8555_v55 = vadd.f32 %v1799_v24, %v7710_v61  ;;  %v2355_v45 = vmul.f32 0.70710677, %v1857_v26  ;;  %v8565_v10 = vadd.f32 %v1848_v48, %v7744_v22 }
 0x32c   : > { %v5720_v59 = vpop.f32.mrf.mxu1  ;;  %v5726_v58 = vpop.f32.mrf.mxu0  ;;  %v2223_v39 = vmul.f32 0.5, %v1808_v25  ;;  %v2218_v24 = vmul.f32 0.5, %v1789_v38  ;;  %v8595_v38 = vmul.f32 0.5, %v1784_v23 }
 0x32d   : > { %6333 = verf.f32 %v2351_v15  ;;  %v8533_v4 = vadd.f32 %v5720_v59, %v9878_v50  ;;  %v2349_v16 = vmul.f32 0.70710677, %v8555_v55  ;;  %v8570_v1 = vadd.f32 %v5726_v58, %v7721_v11 }
 0x32e   : > { %v1861_v3 = vpop.f32.mrf.mxu1  ;;  %v8535_v20 = vpop.f32.mrf.mxu0  ;;  %v2353_v2 = vmul.f32 0.70710677, %v8565_v10  ;;  %v8587_v58 = vmul.f32 0.5, %v1781_v29  ;;  %v8602_v29 = vmul.f32 0.5, %v1797_v30  ;;  %v8615_v30 = vmul.f32 0.5, %v1857_v26 }
 0x32f   : > { %v2358_v13 = vmul.f32 0.70710677, %v8533_v4  ;;  %v8577_v17 = vadd.f32 %v1861_v3, %v7696_v49  ;;  %v2362_v48 = vmul.f32 0.70710677, %v8570_v1 }
 0x330   : > { %v5721_v35 = vpop.f32.mrf.mxu1  ;;  %v5727_v47 = vpop.f32.mrf.mxu0 }
 0x331   : > { %6335 = verf.f32 %v2358_v13  ;;  %v8544_v34 = vadd.f32 %v5721_v35, %v7685_v32  ;;  %v2356_v13 = vmul.f32 0.70710677, %v8577_v17  ;;  %v2219_v35 = vmul.f32 0.5, %v8530_v19 }
 0x332   : > { %v1864_v57 = vpop.f32.mrf.mxu1  ;;  %v8546_v63 = vpop.f32.mrf.mxu0  ;;  %6337 = verf.f32 %v2346_v8  ;;  %v8592_v8 = vadd.f32 %v8535_v20, %v7731_v14 }
 0x333   : > { %v2359_v33 = vmul.f32 0.70710677, %v8544_v34  ;;  %6339 = verf.f32 %v2347_v5  ;;  %v8598_v5 = vadd.f32 %v5727_v47, %v7723_v36 }
 0x334   : > { %v5730_v62 = vpop.f32.mrf.mxu0  ;;  %v8551_v44 = vpop.f32.mrf.mxu1 }
 0x335   : > { %6341 = verf.f32 %v2359_v33  ;;  %v8600_v33 = vmul.f32 0.5, %v1854_v46  ;;  %v8610_v23 = vadd.f32 %v5730_v62, %v9878_v50 }
 0x336   : > { %v6332_v54 = vpop.eup %6331  ;;  %v8557_v27 = vpop.f32.mrf.mxu0  ;;  %6343 = verf.f32 %v2344_v51 }
 0x337   : > { %v8559_v42 = vpop.f32.mrf.mxu1  ;;  %v2606_v18 = vadd.f32 1.0, %v6332_v54  ;;  %6345 = verf.f32 %v2345_v60  ;;  %v8605_v54 = vadd.f32 %v1864_v57, %v7710_v61  ;;  %v2360_v57 = vmul.f32 0.70710677, %v8592_v8 }
 0x338   : > { %v5731_v6 = vpop.f32.mrf.mxu0  ;;  %6347 = verf.f32 %v2354_v31  ;;  %v8607_v31 = vmul.f32 0.5, %v1846_v37 }
 0x339   : > { %v8562_v0 = vpop.f32.mrf.mxu1  ;;  %6349 = verf.f32 %v2348_v56  ;;  %v2734_v7 = vmul.f32 %v2606_v18, %v2222_v40  ;;  %v8619_v56 = vadd.f32 %v5731_v6, %v7685_v32  ;;  %v2230_v18 = vmul.f32 0.5, %v8533_v4 }
 0x33a   : > { %v6334_v28 = vpop.eup %6333  ;;  %v8572_v43 = vpop.f32.mrf.mxu0  ;;  %6351 = verf.f32 %v2355_v45  ;;  %v2231_v45 = vmul.f32 0.5, %v8544_v34  ;;  %v2357_v26 = vmul.f32 0.70710677, %v8605_v54  ;;  %v2366_v4 = vmul.f32 0.70710677, %v8610_v23 }
 0x33b   : > { %v8574_v52 = vpop.f32.mrf.mxu1  ;;  %v2607_v41 = vadd.f32 1.0, %v6334_v28  ;;  %6353 = verf.f32 %v2349_v16  ;;  %v2363_v28 = vmul.f32 0.70710677, %v8598_v5 }
 0x33c   : > { %v8583_v15 = vpop.f32.mrf.mxu0  ;;  %6355 = verf.f32 %v2352_v12 }
 0x33d   : > { %v8579_v9 = vpop.f32.mrf.mxu1  ;;  %v2735_v53 = vmul.f32 %v2607_v41, %v2223_v39  ;;  %6357 = verf.f32 %v2353_v2  ;;  %v8625_v39 = vmul.f32 0.5, %v8555_v55  ;;  %v2367_v55 = vmul.f32 0.70710677, %v8619_v56 }
 0x33e   : > { %v6336_v59 = vpop.eup %6335  ;;  %6359 = verf.f32 %v2362_v48  ;;  %v8612_v47 = vpop.f32.mrf.mxu0  ;;  %v8636_v48 = vmul.f32 0.5, %v8565_v10  ;;  %v8651_v10 = vmul.f32 0.5, %v8577_v17  ;;  %v8663_v17 = vmul.f32 0.5, %v8592_v8 }
 0x33f   : > { %v8585_v25 = vpop.f32.mrf.mxu1  ;;  %v2821_v3 = vpack.c.bf16 %v2735_v53, %v2734_v7  ;;  %v6338_v51 = vpop.eup %6337  ;;  %v2614_v19 = vadd.f32 1.0, %v6336_v59  ;;  %6361 = verf.f32 %v2356_v13  ;;  %v1914_v7 = vadd.f32 %v8546_v63, %v7744_v22 }
 0x340   : > { %v6340_v20 = vpop.eup %6339  ;;  %v2602_v40 = vadd.f32 1.0, %v6338_v51  ;;  %v8633_v34 = vpop.f32.mrf.mxu0  ;;  %6363 = verf.f32 %v2360_v57  ;;  %v8644_v63 = vadd.f32 %v8572_v43, %v7710_v61 }
 0x341   : > { %v5741_v60 = vpop.f32.mrf.mxu1  ;;  %5883 = vmatpush3.bf16.msra.mxu0 %v2821_v3  ;;  %v2603_v16 = vadd.f32 1.0, %v6340_v20  ;;  %v2742_v12 = vmul.f32 %v2614_v19, %v2230_v18  ;;  %v8640_v3 = vmul.f32 0.5, %v8570_v1  ;;  %6365 = verf.f32 %v2363_v28 }
 0x342   : > { %5884 = vmatprep.subr.bf16.mxu0 %v9833_v21  ;;  %v6342_v46 = vpop.eup %6341  ;;  %v8646_v20 = vmul.f32 %v2602_v40, %v2218_v24  ;;  %6367 = verf.f32 %v2357_v26  ;;  %v1927_v18 = vadd.f32 %v8557_v27, %v7696_v49  ;;  %v8657_v43 = vpop.f32.mrf.mxu0  ;;  %v2365_v28 = vmul.f32 0.70710677, %v8644_v63 }
 0x343   : > { %v6344_v37 = vpop.eup %6343  ;;  %v2615_v62 = vadd.f32 1.0, %v6342_v46  ;;  %v8628_v41 = vpop.f32.mrf.mxu1  ;;  %v8648_v19 = vmul.f32 %v2603_v16, %v2219_v35  ;;  %6369 = verf.f32 %v2366_v4  ;;  %v8672_v27 = vadd.f32 %v8579_v9, %v9878_v50 }
 0x344   : > { %v6346_v53 = vpop.eup %6345  ;;  %v2600_v2 = vadd.f32 1.0, %v6344_v37  ;;  %v2361_v37 = vmul.f32 0.70710677, %v1914_v7  ;;  %6371 = verf.f32 %v2367_v55  ;;  %v8675_v40 = vadd.f32 %v5741_v60, %v7685_v32 }
 0x345   : > { %v2743_v6 = vmul.f32 %v2615_v62, %v2231_v45  ;;  %v6348_v59 = vpop.eup %6347  ;;  %v8653_v46 = vpop.f32.mrf.mxu1  ;;  %v2601_v1 = vadd.f32 1.0, %v6346_v53  ;;  %v8667_v62 = vmul.f32 0.5, %v8598_v5  ;;  %v2364_v60 = vmul.f32 0.70710677, %v1927_v18 }
 0x346   : > { %v6350_v51 = vpop.eup %6349  ;;  %v8660_v35 = vmul.f32 %v2600_v2, %v8587_v58  ;;  %v2610_v45 = vadd.f32 1.0, %v6348_v59  ;;  %6373 = verf.f32 %v2361_v37  ;;  %v5750_v53 = vpop.f32.mrf.mxu0  ;;  %v8692_v59 = vmul.f32 0.5, %v8605_v54 }
 0x347   : > { %v2825_v13 = vpack.c.bf16 %v2743_v6, %v2742_v12  ;;  %v6352_v57 = vpop.eup %6351  ;;  %v2604_v16 = vadd.f32 1.0, %v6350_v51  ;;  %v8681_v12 = vadd.f32 %v8551_v44, %v7721_v11  ;;  %v8683_v5 = vpop.f32.mrf.mxu1  ;;  %v8686_v4 = vmul.f32 %v2601_v1, %v8595_v38 }
 0x348   : > { %v6354_v24 = vpop.eup %6353  ;;  %v2611_v26 = vadd.f32 1.0, %v6352_v57  ;;  %v8689_v55 = vmul.f32 %v2610_v45, %v8600_v33  ;;  %v2375_v44 = vmul.f32 0.70710677, %v8675_v40  ;;  %v8699_v38 = vadd.f32 %v8559_v42, %v7731_v14 }
 0x349   : > { %5895 = vmatpush3.bf16.msra.mxu1 %v2825_v13  ;;  %v6356_v58 = vpop.eup %6355  ;;  %v2605_v9 = vadd.f32 1.0, %v6354_v24  ;;  %v8694_v13 = vmul.f32 0.5, %v1914_v7  ;;  %6375 = verf.f32 %v2365_v28  ;;  %v2374_v1 = vmul.f32 0.70710677, %v8672_v27  ;;  %v8711_v24 = vpop.f32.mrf.mxu1 }
 0x34a   : > { %5896 = vmatprep.subr.bf16.mxu1 %v9833_v21  ;;  %v6358_v6 = vpop.eup %6357  ;;  %v2608_v57 = vadd.f32 1.0, %v6356_v58  ;;  %9879 = vst [vmem:[#allocation30_spill] sm:$0xff] %v8699_v38  ;;  %v2732_v37 = vmul.f32 %v2604_v16, %v8602_v29  ;;  %v8704_v33 = vmul.f32 %v2611_v26, %v8615_v30  ;;  %v2370_v54 = vmul.f32 0.70710677, %v8681_v12  ;;  %v2056_v58 = vpop.f32.mrf.mxu0 }
 0x34b   : > { %v6360_v2 = vpop.eup %6359  ;;  %v8709_v7 = vadd.f32 %v8628_v41, %v7710_v61  ;;  %v2733_v45 = vmul.f32 %v2605_v9, %v8625_v39  ;;  %v2609_v42 = vadd.f32 1.0, %v6358_v6  ;;  %v8715_v28 = vmul.f32 0.5, %v8610_v23 }
 0x34c   : > { %v6362_v51 = vpop.eup %6361  ;;  %6377 = verf.f32 %v2364_v60  ;;  %v2618_v29 = vadd.f32 1.0, %v6360_v2  ;;  %v8719_v30 = vadd.f32 %v8585_v25, %v7696_v49  ;;  %v8722_v41 = vmul.f32 %v2608_v57, %v8607_v31  ;;  %v8735_v60 = vpop.f32.mrf.mxu1 }
 0x34d   : > { %v2612_v16 = vadd.f32 1.0, %v6362_v51  ;;  %6379 = verf.f32 %v2375_v44  ;;  %v6364_v26 = vpop.eup %6363  ;;  %v2368_v8 = vmul.f32 0.70710677, %v8699_v38  ;;  %v8727_v39 = vadd.f32 %v8562_v0, %v7723_v36  ;;  %v5751_v57 = vpop.f32.mrf.mxu0 }
 0x34e   : > { %6381 = verf.f32 %v2374_v1  ;;  %v6366_v23 = vpop.eup %6365  ;;  %v2373_v25 = vmul.f32 0.70710677, %v8709_v7  ;;  %v8733_v9 = vadd.f32 %v5750_v53, %v9878_v50  ;;  %v8738_v2 = vmul.f32 %v2609_v42, %v8636_v48 }
 0x34f   : > { %6383 = verf.f32 %v2370_v54  ;;  %v6368_v31 = vpop.eup %6367  ;;  %v8740_v44 = vmul.f32 0.5, %v1927_v18  ;;  %v8744_v0 = vadd.f32 %v8574_v52, %v7744_v22  ;;  %v2820_v51 = vpack.c.bf16 %v2733_v45, %v2732_v37  ;;  %v5760_v45 = vpop.f32.mrf.mxu1 }
 0x350   : > { %v6370_v1 = vpop.eup %6369  ;;  %v8747_v54 = vmul.f32 %v2618_v29, %v8640_v3  ;;  %v8750_v53 = vmul.f32 %v2612_v16, %v8651_v10  ;;  %v8752_v6 = vadd.f32 1.0, %v6364_v26  ;;  %v2372_v48 = vmul.f32 0.70710677, %v8719_v30 }
 0x351   : > { %v6372_v42 = vpop.eup %6371  ;;  %v2619_v18 = vadd.f32 1.0, %v6366_v23  ;;  %6385 = verf.f32 %v2368_v8  ;;  %v2371_v38 = vmul.f32 0.70710677, %v8727_v39  ;;  %v8758_v52 = vadd.f32 %v8583_v15, %v7721_v11  ;;  %5885 = vmatpush3.bf16.msra.mxu0 %v2820_v51  ;;  %v2059_v15 = vpop.f32.mrf.mxu0 }
 0x352   : > { %v2613_v37 = vadd.f32 1.0, %v6368_v31  ;;  %v2239_v3 = vmul.f32 0.5, %v8619_v56  ;;  %6387 = verf.f32 %v2373_v25  ;;  %v2382_v10 = vmul.f32 0.70710677, %v8733_v9  ;;  %5886 = vmatprep.subr.bf16.mxu0 %v9833_v21 }
 0x353   : > { %9880 = vst [vmem:[#allocation32_spill] sm:$0xff] %v8758_v52  ;;  %v2622_v29 = vadd.f32 1.0, %v6370_v1  ;;  %v2237_v16 = vmul.f32 0.5, %v8644_v63  ;;  %v2369_v8 = vmul.f32 0.70710677, %v8744_v0  ;;  %v8767_v26 = vadd.f32 %v8612_v47, %v7731_v14  ;;  %v6374_v23 = vpop.eup %6373 }
 0x354   : > { %v2623_v31 = vadd.f32 1.0, %v6372_v42  ;;  %6389 = verf.f32 %v2372_v48  ;;  %v8770_v56 = vadd.f32 %v2056_v58, %v7696_v49  ;;  %v8773_v25 = vadd.f32 %v5751_v57, %v7685_v32 }
 0x355   : > { %9881 = vst [vmem:[#allocation31_spill] sm:$0xff] %v8767_v26  ;;  %v8776_v51 = vmul.f32 %v2619_v18, %v8667_v62  ;;  %6391 = verf.f32 %v2371_v38  ;;  %v2378_v63 = vmul.f32 0.70710677, %v8758_v52  ;;  %v8781_v47 = vadd.f32 %v8633_v34, %v7723_v36  ;;  %v2121_v38 = vpop.f32.mrf.mxu1 }
 0x356   : > { %v9882_v1 = vpack.c.bf16 %v8648_v19, %v8646_v20  ;;  %v6376_v48 = vpop.eup %6375  ;;  %v2741_v58 = vmul.f32 %v2613_v37, %v8692_v59  ;;  %6393 = verf.f32 %v2382_v10  ;;  %v2383_v57 = vmul.f32 0.70710677, %v8773_v25 }
 0x357   : > { %v8789_v62 = vadd.f32 %v2059_v15, %v7710_v61  ;;  %v2617_v42 = vadd.f32 1.0, %v6374_v23  ;;  %v2750_v34 = vmul.f32 %v2622_v29, %v8715_v28  ;;  %6395 = verf.f32 %v2369_v8 }
 0x358   : > { %5887 = vmatpush3.bf16.msra.mxu0 %v9882_v1  ;;  %v8795_v20 = vadd.f32 %v8657_v43, %v7744_v22  ;;  %v2751_v18 = vmul.f32 %v2623_v31, %v2239_v3  ;;  %v2376_v59 = vmul.f32 0.70710677, %v8767_v26  ;;  %v2380_v37 = vmul.f32 0.70710677, %v8770_v56  ;;  %v5761_v31 = vpop.f32.mrf.mxu1 }
 0x359   : > { %5888 = vmatprep.subr.bf16.mxu0 %v9833_v21  ;;  %v6378_v19 = vpop.eup %6377  ;;  %6397 = verf.f32 %v2383_v57  ;;  %v2621_v15 = vadd.f32 1.0, %v6376_v48  ;;  %v2379_v1 = vmul.f32 0.70710677, %v8781_v47  ;;  %v2381_v23 = vmul.f32 0.70710677, %v8789_v62 }
 0x35a   : > { %v6380_v10 = vpop.eup %6379  ;;  %6399 = verf.f32 %v2378_v63  ;;  %v8803_v29 = vadd.f32 %v8711_v24, %v7723_v36  ;;  %v8806_v43 = vadd.f32 %v5760_v45, %v9878_v50  ;;  %v2818_v3 = vpack.c.bf16 %v8686_v4, %v8660_v35 }
 0x35b   : > { %v6382_v28 = vpop.eup %6381  ;;  %v2824_v8 = vpack.c.bf16 %v2741_v58, %v8750_v53  ;;  %v2620_v63 = vadd.f32 1.0, %v6378_v19  ;;  %v2246_v57 = vmul.f32 0.5, %v8672_v27  ;;  %v2377_v26 = vmul.f32 0.70710677, %v8795_v20 }
 0x35c   : > { %v8811_v48 = vpop.eup %6383  ;;  %6401 = verf.f32 %v2381_v23  ;;  %v2829_v52 = vpack.c.bf16 %v2751_v18, %v2750_v34  ;;  %v2631_v36 = vadd.f32 1.0, %v6380_v10  ;;  %v2390_v50 = vmul.f32 0.70710677, %v8806_v43  ;;  %5889 = vmatpush3.bf16.msra.mxu0 %v2818_v3 }
 0x35d   : > { %6403 = verf.f32 %v2380_v37  ;;  %5897 = vmatpush3.bf16.msra.mxu1 %v2824_v8  ;;  %v2749_v24 = vmul.f32 %v2621_v15, %v2237_v16  ;;  %v2630_v35 = vadd.f32 1.0, %v6382_v28  ;;  %v8817_v4 = vadd.f32 %v2121_v38, %v7696_v49  ;;  %5906 = vmatprep.subr.bf16.mxu0 %v9833_v21  ;;  %v2124_v16 = vpop.f32.mrf.mxu1 }
 0x35e   : > { %6405 = verf.f32 %v2379_v1  ;;  %5898 = vmatprep.subr.bf16.mxu1 %v9833_v21  ;;  %v8821_v27 = vpop.eup %6385  ;;  %v2247_v53 = vmul.f32 0.5, %v8675_v40  ;;  %v2387_v45 = vmul.f32 0.70710677, %v8803_v29  ;;  %v8826_v58 = vadd.f32 %v5761_v31, %v7685_v32  ;;  %v8838_v40 = vld [vmem:[%s9763_s5] sm:$0xff]  }
 0x35f   : > { %6407 = verf.f32 %v2376_v59  ;;  %v6388_v34 = vpop.eup %6387  ;;  %v2827_v49 = vpack.c.bf16 %v8776_v51, %v8747_v54  ;;  %v2748_v38 = vmul.f32 %v2620_v63, %v8740_v44  ;;  %v8833_v19 = vadd.f32 %v8653_v46, %v7721_v11  ;;  %5891 = vmatmul.mubr.msk.bf16.vlgmr.msra.gmra.mxu0 %vm2847_vm2, %v8838_v40 }
 0x360   : > { %6409 = verf.f32 %v2390_v50  ;;  %v8843_v32 = vmul.f32 %v2617_v42, %v8694_v13  ;;  %v2759_v18 = vmul.f32 %v2631_v36, %v2247_v53  ;;  %v2388_v44 = vmul.f32 0.70710677, %v8817_v4  ;;  %5907 = vmatpush3.bf16.msra.mxu0 %v2829_v52  ;;  %5914 = vmatprep.mubr.msk.bf16.mxu0 %vm6900_vm1, %v9833_v21 }
 0x361   : > { %6411 = verf.f32 %v2377_v26  ;;  %v9883_v11 = vpack.c.bf16 %v8704_v33, %v8689_v55  ;;  %v6390_v46 = vpop.eup %6389  ;;  %v2828_v54 = vpack.c.bf16 %v2749_v24, %v2748_v38  ;;  %v2758_v51 = vmul.f32 %v2630_v35, %v2246_v57  ;;  %5908 = vmatprep.subr.bf16.mxu0 %v9833_v21 }
 0x362   : > { %v2391_v59 = vmul.f32 0.70710677, %v8826_v58  ;;  %v8851_v37 = vadd.f32 %v2124_v16, %v7710_v61  ;;  %v6392_v13 = vpop.eup %6391  ;;  %v2629_v26 = vadd.f32 1.0, %v6388_v34  ;;  %6413 = verf.f32 %v2387_v45 }
 0x363   : > { %5899 = vmatpush3.bf16.msra.mxu1 %v9883_v11  ;;  %v8857_v55 = vadd.f32 %v8735_v60, %v7744_v22  ;;  %v2822_v33 = vpack.c.bf16 %v8738_v2, %v8722_v41  ;;  %v6394_v52 = vpop.eup %6393  ;;  %v2245_v61 = vmul.f32 0.5, %v8709_v7  ;;  %v2386_v42 = vmul.f32 0.70710677, %v8833_v19 }
 0x364   : > { %5900 = vmatprep.subr.bf16.mxu1 %v9833_v21  ;;  %6415 = verf.f32 %v2391_v59  ;;  %v2389_v10 = vmul.f32 0.70710677, %v8851_v37  ;;  %v6396_v15 = vpop.eup %6395  ;;  %v2628_v1 = vadd.f32 1.0, %v6390_v46  ;;  %v2833_v23 = vpack.c.bf16 %v2759_v18, %v2758_v51  ;;  %5909 = vmatpush3.bf16.msra.mxu0 %v2828_v54  ;;  %v9884_v54 = vld [vmem:[#allocation30_spill] sm:$0xff] }
 0x365   : > { %v8868_v22 = vadd.f32 %v8683_v5, %v7731_v14  ;;  %6417 = verf.f32 %v2388_v44  ;;  %v2627_v60 = vadd.f32 1.0, %v6392_v13  ;;  %v2244_v2 = vmul.f32 0.5, %v8719_v30  ;;  %5910 = vmatprep.subr.bf16.mxu0 %v9833_v21 }
 0x366   : > { %v6398_v41 = vpop.eup %6397  ;;  %v2255_v7 = vmul.f32 0.5, %v8773_v25  ;;  %6419 = verf.f32 %v2389_v10  ;;  %v2757_v3 = vmul.f32 %v2629_v26, %v2245_v61  ;;  %v2638_v8 = vadd.f32 1.0, %v6394_v52 }
 0x367   : > { %5901 = vmatpush3.bf16.msra.mxu1 %v2822_v33  ;;  %v6400_v28 = vpop.eup %6399  ;;  %v2639_v31 = vadd.f32 1.0, %v6398_v41  ;;  %v2385_v14 = vmul.f32 0.70710677, %v8857_v55  ;;  %v2744_v5 = vmul.f32 %v8752_v6, %v8663_v17  ;;  %v2626_v63 = vadd.f32 1.0, %v8811_v48 }
 0x368   : > { %5918 = vmatprep.subr.bf16.mxu1 %v9833_v21  ;;  %v2243_v30 = vmul.f32 0.5, %v8727_v39  ;;  %v2254_v25 = vmul.f32 0.5, %v8733_v9  ;;  %v2756_v36 = vmul.f32 %v2628_v1, %v2244_v2  ;;  %6421 = verf.f32 %v2386_v42  ;;  %5911 = vmatpush3.bf16.msra.mxu0 %v2827_v49 }
 0x369   : > { %v6402_v57 = vpop.eup %6401  ;;  %v2384_v50 = vmul.f32 0.70710677, %v8868_v22  ;;  %v2767_v24 = vmul.f32 %v2639_v31, %v2255_v7  ;;  %v2826_v17 = vpack.c.bf16 %v8843_v32, %v2744_v5  ;;  %v2242_v6 = vmul.f32 0.5, %v8681_v12  ;;  %5912 = vmatprep.subr.bf16.mxu0 %v9833_v21 }
 0x36a   : > { %5903 = vmatmul.mubr.msk.bf16.vlgmr.msra.gmra.mxu1 %vm2847_vm2, %v8838_v40  ;;  %v6404_v35 = vpop.eup %6403  ;;  %v2755_v48 = vmul.f32 %v2627_v60, %v2243_v30  ;;  %v2625_v39 = vadd.f32 1.0, %v6396_v15  ;;  %v2832_v53 = vpack.c.bf16 %v2757_v3, %v2756_v36  ;;  %v2766_v45 = vmul.f32 %v2638_v8, %v2254_v25  ;;  %v9885_v15 = vld [vmem:[#allocation32_spill] sm:$0xff]  ;;  %v9886_v36 = vld [vmem:[#allocation31_spill] sm:$0xff] }
 0x36b   : > { %5919 = vmatpush3.bf16.msra.mxu1 %v2833_v23  ;;  %v6406_v9 = vpop.eup %6405  ;;  %v2637_v16 = vadd.f32 1.0, %v6402_v57  ;;  %6423 = verf.f32 %v2385_v14  ;;  %5926 = vmatprep.mubr.msk.bf16.mxu1 %vm6900_vm1, %v9833_v21  ;;  %v2754_v49 = vmul.f32 %v2626_v63, %v2242_v6  ;;  %v2624_v38 = vadd.f32 1.0, %v8821_v27 }
 0x36c   : > { %5920 = vmatprep.subr.bf16.mxu1 %v9833_v21  ;;  %v6408_v34 = vpop.eup %6407  ;;  %v2241_v12 = vmul.f32 0.5, %v8744_v0  ;;  %v2636_v18 = vadd.f32 1.0, %v6404_v35  ;;  %6425 = verf.f32 %v2384_v50  ;;  %v2837_v44 = vpack.c.bf16 %v2767_v24, %v2766_v45  ;;  %5913 = vmatpush3.bf16.msra.mxu0 %v2826_v17 }
 0x36d   : > { %v6410_v32 = vpop.eup %6409  ;;  %v2253_v11 = vmul.f32 0.5, %v8789_v62  ;;  %v2240_v51 = vmul.f32 0.5, %v9884_v54  ;;  %v2635_v59 = vadd.f32 1.0, %v6406_v9  ;;  %5930 = vmatprep.subr.bf16.mxu0 %v9833_v21  ;;  %v2831_v13 = vpack.c.bf16 %v2755_v48, %v2754_v49 }
 0x36e   : > { %v6412_v46 = vpop.eup %6411  ;;  %v2753_v27 = vmul.f32 %v2625_v39, %v2241_v12  ;;  %v2252_v0 = vmul.f32 0.5, %v8770_v56  ;;  %v2634_v52 = vadd.f32 1.0, %v6400_v28  ;;  %v2251_v61 = vmul.f32 0.5, %v8781_v47 }
 0x36f   : > { %5921 = vmatpush3.bf16.msra.mxu1 %v2832_v53  ;;  %v2765_v26 = vmul.f32 %v2637_v16, %v2253_v11  ;;  %v6414_v33 = vpop.eup %6413  ;;  %v2646_v62 = vadd.f32 1.0, %v6410_v32  ;;  %5915 = vmatmul.mubr.msk.bf16.vlgmr.msra.gmra.mxu0 %vm2847_vm2, %v8838_v40  ;;  %v2752_v10 = vmul.f32 %v2624_v38, %v2240_v51  ;;  %v2250_v1 = vmul.f32 0.5, %v9885_v15 }
 0x370   : > { %5922 = vmatprep.subr.bf16.mxu1 %v9833_v21  ;;  %v2764_v23 = vmul.f32 %v2636_v18, %v2252_v0  ;;  %5931 = vmatpush3.bf16.msra.mxu0 %v2837_v44  ;;  %v2763_v60 = vmul.f32 %v2635_v59, %v2251_v61  ;;  %v2262_v56 = vmul.f32 0.5, %v8806_v43  ;;  %v2263_v2 = vmul.f32 0.5, %v8826_v58 }
 0x371   : > { %v6416_v42 = vpop.eup %6415  ;;  %5932 = vmatprep.subr.bf16.mxu0 %v9833_v21  ;;  %v2830_v28 = vpack.c.bf16 %v2753_v27, %v2752_v10  ;;  %v2633_v3 = vadd.f32 1.0, %v6412_v46  ;;  %5938 = vmatprep.mubr.msk.bf16.mxu0 %vm6900_vm1, %v9833_v21  ;;  %v2762_v31 = vmul.f32 %v2634_v52, %v2250_v1  ;;  %v2632_v30 = vadd.f32 1.0, %v6408_v34 }
 0x372   : > { %v6418_v41 = vpop.eup %6417  ;;  %v2647_v7 = vadd.f32 1.0, %v6416_v42  ;;  %v2836_v8 = vpack.c.bf16 %v2765_v26, %v2764_v23  ;;  %v2774_v14 = vmul.f32 %v2646_v62, %v2262_v56  ;;  %v2249_v43 = vmul.f32 0.5, %v8795_v20  ;;  %v6622_v42 = vld [vmem:[%s7147_s2 + $0x10] sm:$0xff] }
 0x373   : > { %5923 = vmatpush3.bf16.msra.mxu1 %v2831_v13  ;;  %v6420_v47 = vpop.eup %6419  ;;  %v2644_v58 = vadd.f32 1.0, %v6418_v41  ;;  %v2261_v25 = vmul.f32 0.5, %v8851_v37  ;;  %v2248_v50 = vmul.f32 0.5, %v9886_v36  ;;  %v2835_v24 = vpack.c.bf16 %v2763_v60, %v2762_v31  ;;  %v8930_v13 = vpop.permute.xlu1 %3543  ;;  %v6623_v41 = vld [vmem:[%s7147_s2 + $0x18] sm:$0xff] }
 0x374   : > { %5924 = vmatprep.subr.bf16.mxu1 %v9833_v21  ;;  %v2775_v5 = vmul.f32 %v2647_v7, %v2263_v2  ;;  %v2645_v63 = vadd.f32 1.0, %v6420_v47  ;;  %5933 = vmatpush3.bf16.msra.mxu0 %v2836_v8  ;;  %v2761_v17 = vmul.f32 %v2633_v3, %v2249_v43  ;;  %v2643_v6 = vadd.f32 1.0, %v6414_v33  ;;  %v6621_v33 = vld [vmem:[%s7147_s2 + $0x8] sm:$0xff]  ;;  %v6624_v47 = vld [vmem:[%s7147_s2 + $0x20] sm:$0xff] }
 0x375   : > { %v6422_v57 = vpop.eup %6421  ;;  %5934 = vmatprep.subr.bf16.mxu0 %v9833_v21  ;;  %v2260_v48 = vmul.f32 0.5, %v8817_v4  ;;  %v2760_v37 = vmul.f32 %v2632_v30, %v2248_v50  ;;  %v2259_v53 = vmul.f32 0.5, %v8803_v29  ;;  %v2258_v34 = vmul.f32 0.5, %v8833_v19 }
 0x376   : > { %v2841_v35 = vpack.c.bf16 %v2775_v5, %v2774_v14  ;;  %v2773_v39 = vmul.f32 %v2645_v63, %v2261_v25  ;;  %v2642_v9 = vadd.f32 1.0, %v6422_v57  ;;  %v2257_v29 = vmul.f32 0.5, %v8857_v55  ;;  %v6625_v14 = vld [vmem:[%s7147_s2 + $0x28] sm:$0xff] }
 0x377   : > { %5925 = vmatpush3.bf16.msra.mxu1 %v2830_v28  ;;  %v2772_v45 = vmul.f32 %v2644_v58, %v2260_v48  ;;  %v2834_v4 = vpack.c.bf16 %v2761_v17, %v2760_v37  ;;  %v2771_v49 = vmul.f32 %v2643_v6, %v2259_v53  ;;  %v2256_v19 = vmul.f32 0.5, %v8868_v22  ;;  %v6620_v22 = vld [vmem:[%s7147_s2] sm:$0xff]  ;;  %v6626_v58 = vld [vmem:[%s7147_s2 + $0x30] sm:$0xff] }
 0x378   : > { %5942 = vmatprep.subr.bf16.mxu1 %v9833_v21  ;;  %v6424_v20 = vpop.eup %6423  ;;  %5935 = vmatpush3.bf16.msra.mxu0 %v2835_v24  ;;  %v2770_v32 = vmul.f32 %v2642_v9, %v2258_v34  ;;  %v9887_v54 = vmov 0   ;;  %v6627_v24 = vld [vmem:[%s7147_s2 + $0x38] sm:$0xff] }
 0x379   : > { %v6426_v16 = vpop.eup %6425  ;;  %5936 = vmatprep.subr.bf16.mxu0 %v9833_v21  ;;  %v2641_v38 = vadd.f32 1.0, %v6424_v20  ;;  %v2840_v12 = vpack.c.bf16 %v2773_v39, %v2772_v45  ;;  %v6628_v39 = vld [vmem:[%s7147_s2 + $0x40] sm:$0xff]  ;;  %v6629_v45 = vld [vmem:[%s7147_s2 + $0x48] sm:$0xff] }
 0x37a   : > { %5927 = vmatmul.mubr.msk.bf16.vlgmr.msra.gmra.mxu1 %vm2847_vm2, %v8838_v40  ;;  %v2640_v18 = vadd.f32 1.0, %v6426_v16  ;;  %v2839_v44 = vpack.c.bf16 %v2771_v49, %v2770_v32 }
 0x37b   : > { %5943 = vmatpush3.bf16.msra.mxu1 %v2841_v35  ;;  %5950 = vmatprep.mubr.msk.bf16.mxu1 %vm6900_vm1, %v9833_v21  ;;  %v2769_v11 = vmul.f32 %v2641_v38, %v2257_v29  ;;  %v6630_v38 = vld [vmem:[%s7147_s2 + $0x50] sm:$0xff] }
 0x37c   : > { %5944 = vmatprep.subr.bf16.mxu1 %v9833_v21  ;;  %5937 = vmatpush3.bf16.msra.mxu0 %v2834_v4  ;;  %v2768_v46 = vmul.f32 %v2640_v18, %v2256_v19  ;;  %v6631_v19 = vld [vmem:[%s7147_s2 + $0x58] sm:$0xff] }
 0x37e   : > { %v2838_v55 = vpack.c.bf16 %v2769_v11, %v2768_v46 }
 0x37f   : > { %5945 = vmatpush3.bf16.msra.mxu1 %v2840_v12  ;;  %5939 = vmatmul.mubr.msk.bf16.vlgmr.msra.gmra.mxu0 %vm2847_vm2, %v8838_v40 }
 0x380   : > { %5946 = vmatprep.subr.bf16.mxu1 %v9833_v21  ;;  %4169 = vmatprep.mubr.bf16.mxu0 %v9887_v54 }
 0x383   : > { %5947 = vmatpush3.bf16.msra.mxu1 %v2839_v44 }
 0x384   : > { %5948 = vmatprep.subr.bf16.mxu1 %v9833_v21  ;;  %v8937_v21 = vpop.permute.xlu0 %3548 }
 0x387   : > { %5949 = vmatpush3.bf16.msra.mxu1 %v2838_v55 }
 0x38a   : > { %5951 = vmatmul.mubr.msk.bf16.vlgmr.msra.gmra.mxu1 %vm2847_vm2, %v8838_v40 }
 0x38f   : > { %v2885_v51 = vpop.f32.mrf.mxu0 }
 0x390   : > { %v3507_v59 = vadd.f32 %v6620_v22, %v2885_v51  ;;  %v6632_v51 = vld [vmem:[%s7147_s2 + $0x60] sm:$0xff] }
 0x391   : > { %v5772_v27 = vpop.f32.mrf.mxu0 }
 0x392   : > { %v8933_v0 = vadd.f32 %v8930_v13, %v3507_v59 }
 0x393   : > { %v2888_v26 = vpop.f32.mrf.mxu0 }
 0x394   : > { %v3508_v52 = vadd.f32 %v6621_v33, %v2888_v26  ;;  %3585 = vadd.xlane.f32.xlu1 %v8933_v0  ;;  %v6633_v33 = vld [vmem:[%s7147_s2 + $0x68] sm:$0xff] }
 0x395   : > { %v5773_v61 = vpop.f32.mrf.mxu0 }
 0x396   : > { %v8940_v40 = vadd.f32 %v8937_v21, %v3508_v52 }
 0x398   : > { %3587 = vadd.xlane.f32.xlu0 %v8940_v40 }
 0x39b   : > { %v2926_v62 = vpop.f32.mrf.mxu1 }
 0x39c   : > { %v3509_v10 = vadd.f32 %v6622_v42, %v2926_v62 }
 0x39d   : > { %v5784_v15 = vpop.f32.mrf.mxu1 }
 0x39e   : > { %v8945_v1 = vadd.f32 %v8930_v13, %v3509_v10  ;;  %v6634_v10 = vld [vmem:[%s7147_s2 + $0x70] sm:$0xff] }
 0x39f   : > { %v2929_v23 = vpop.f32.mrf.mxu1 }
 0x3a0   : > { %v3510_v60 = vadd.f32 %v6623_v41, %v2929_v23  ;;  %3589 = vadd.xlane.f32.xlu0 %v8945_v1 }
 0x3a1   : > { %v5785_v56 = vpop.f32.mrf.mxu1 }
 0x3a2   : > { %v8950_v2 = vadd.f32 %v8937_v21, %v3510_v60  ;;  %v6635_v56 = vld [vmem:[%s7147_s2 + $0x78] sm:$0xff] }
 0x3a4   : > { %3591 = vadd.xlane.f32.xlu1 %v8950_v2 }
 0x3a9   : > { %v2967_v7 = vpop.f32.mrf.mxu0 }
 0x3aa   : > { %v3511_v28 = vadd.f32 %v6624_v47, %v2967_v7 }
 0x3ab   : > { %v5796_v3 = vpop.f32.mrf.mxu0 }
 0x3ac   : > { %v8955_v8 = vadd.f32 %v8930_v13, %v3511_v28 }
 0x3ad   : > { %v2970_v31 = vpop.f32.mrf.mxu0 }
 0x3ae   : > { %v3512_v5 = vadd.f32 %v6625_v14, %v2970_v31  ;;  %3593 = vadd.xlane.f32.xlu0 %v8955_v8  ;;  %v6636_v31 = vld [vmem:[%s7147_s2 + $0x80] sm:$0xff] }
 0x3af   : > { %v5797_v63 = vpop.f32.mrf.mxu0 }
 0x3b0   : > { %v8960_v30 = vadd.f32 %v8937_v21, %v3512_v5 }
 0x3b2   : > { %3595 = vadd.xlane.f32.xlu1 %v8960_v30 }
 0x3b4   : > { %v3008_v43 = vpop.f32.mrf.mxu1 }
 0x3b5   : > { %v3513_v25 = vadd.f32 %v6626_v58, %v3008_v43  ;;  %v6637_v58 = vld [vmem:[%s7147_s2 + $0x88] sm:$0xff] }
 0x3b6   : > { %v5808_v57 = vpop.f32.mrf.mxu1 }
 0x3b7   : > { %v8965_v36 = vadd.f32 %v8930_v13, %v3513_v25 }
 0x3b8   : > { %v3011_v50 = vpop.f32.mrf.mxu1 }
 0x3b9   : > { %v3514_v35 = vadd.f32 %v6627_v24, %v3011_v50  ;;  %3597 = vadd.xlane.f32.xlu0 %v8965_v36 }
 0x3ba   : > { %v5809_v17 = vpop.f32.mrf.mxu1 }
 0x3bb   : > { %v8970_v6 = vadd.f32 %v8937_v21, %v3514_v35  ;;  %v6638_v35 = vld [vmem:[%s7147_s2 + $0x90] sm:$0xff] }
 0x3bd   : > { %3599 = vadd.xlane.f32.xlu1 %v8970_v6 }
 0x3c2   : > { %v3049_v48 = vpop.f32.mrf.mxu0 }
 0x3c3   : > { %v3515_v20 = vadd.f32 %v6628_v39, %v3049_v48 }
 0x3c4   : > { %v5820_v37 = vpop.f32.mrf.mxu0 }
 0x3c5   : > { %v8975_v9 = vadd.f32 %v8930_v13, %v3515_v20  ;;  %v6639_v37 = vld [vmem:[%s7147_s2 + $0x98] sm:$0xff] }
 0x3c6   : > { %v3052_v53 = vpop.f32.mrf.mxu0 }
 0x3c7   : > { %v3516_v16 = vadd.f32 %v6629_v45, %v3052_v53  ;;  %3601 = vadd.xlane.f32.xlu0 %v8975_v9 }
 0x3c8   : > { %v5821_v34 = vpop.f32.mrf.mxu0 }
 0x3c9   : > { %v8980_v4 = vadd.f32 %v8937_v21, %v3516_v16  ;;  %v6067_v34 = vld [vmem:[%s9767_s9 + $0x70] ss:$8 sps:$4 sm:$0xff]  }
 0x3ca   : > { %v3090_v49 = vpop.f32.mrf.mxu1 }
 0x3cb   : > { %v3517_v12 = vadd.f32 %v6630_v38, %v3090_v49  ;;  %3603 = vadd.xlane.f32.xlu1 %v8980_v4  ;;  %v6069_v49 = vld [vmem:[%s9767_s9 + $0x74] ss:$8 sps:$4 sm:$0xff]  }
 0x3cc   : > { %v5832_v32 = vpop.f32.mrf.mxu1  ;;  %4137 = vmatprep.subr.bf16.mxu0 %v6069_v49 }
 0x3cd   : > { %v8985_v18 = vadd.f32 %v8930_v13, %v3517_v12  ;;  %4138 = vmatpush1.bf16.msra.mxu0 %v6067_v34  ;;  %v6072_v34 = vld [vmem:[%s9767_s9 + $0x64] ss:$8 sps:$4 sm:$0xff]  }
 0x3ce   : > { %v3093_v29 = vpop.f32.mrf.mxu1  ;;  %4139 = vmatprep.subr.bf16.mxu0 %v6072_v34 }
 0x3cf   : > { %v3518_v44 = vadd.f32 %v6631_v19, %v3093_v29  ;;  %3605 = vadd.xlane.f32.xlu0 %v8985_v18 }
 0x3d0   : > { %v5833_v11 = vpop.f32.mrf.mxu1 }
 0x3d1   : > { %v8990_v46 = vadd.f32 %v8937_v21, %v3518_v44  ;;  %v6640_v44 = vld [vmem:[%s7147_s2 + $0xa0] sm:$0xff] }
 0x3d3   : > { %v3131_v55 = vpop.f32.mrf.mxu0  ;;  %3607 = vadd.xlane.f32.xlu1 %v8990_v46 }
 0x3d4   : > { %v3519_v22 = vadd.f32 %v6632_v51, %v3131_v55 }
 0x3d5   : > { %v5844_v59 = vpop.f32.mrf.mxu0 }
 0x3d6   : > { %v8995_v27 = vadd.f32 %v8930_v13, %v3519_v22 }
 0x3d7   : > { %v3134_v26 = vpop.f32.mrf.mxu0 }
 0x3d8   : > { %v3520_v52 = vadd.f32 %v6633_v33, %v3134_v26  ;;  %3609 = vadd.xlane.f32.xlu0 %v8995_v27 }
 0x3d9   : > { %v5845_v61 = vpop.f32.mrf.mxu0 }
 0x3da   : > { %v9000_v62 = vadd.f32 %v8937_v21, %v3520_v52  ;;  %v3172_v42 = vpop.f32.mrf.mxu1  ;;  %v6641_v52 = vld [vmem:[%s7147_s2 + $0xa8] sm:$0xff] }
 0x3db   : > { %v3521_v15 = vadd.f32 %v6634_v10, %v3172_v42 }
 0x3dc   : > { %3611 = vadd.xlane.f32.xlu1 %v9000_v62  ;;  %v5856_v23 = vpop.f32.mrf.mxu1 }
 0x3dd   : > { %v9005_v41 = vadd.f32 %v8930_v13, %v3521_v15 }
 0x3de   : > { %v3175_v60 = vpop.f32.mrf.mxu1 }
 0x3df   : > { %v3522_v7 = vadd.f32 %v6635_v56, %v3175_v60  ;;  %3613 = vadd.xlane.f32.xlu0 %v9005_v41 }
 0x3e0   : > { %v5857_v47 = vpop.f32.mrf.mxu1 }
 0x3e1   : > { %v9010_v28 = vadd.f32 %v8937_v21, %v3522_v7  ;;  %v6642_v47 = vld [vmem:[%s7147_s2 + $0xb0] sm:$0xff] }
 0x3e3   : > { %9888 = vst [vmem:[#allocation33_spill] sm:$0xff] %v9010_v28  ;;  %v3213_v3 = vpop.f32.mrf.mxu0  ;;  %3615 = vadd.xlane.f32.xlu1 %v9010_v28 }
 0x3e4   : > { %v3523_v14 = vadd.f32 %v6636_v31, %v3213_v3 }
 0x3e5   : > { %v5868_v5 = vpop.f32.mrf.mxu0 }
 0x3e6   : > { %v9015_v63 = vadd.f32 %v8930_v13, %v3523_v14 }
 0x3e7   : > { %v3216_v43 = vpop.f32.mrf.mxu0 }
 0x3e8   : > { %9889 = vst [vmem:[#allocation23_spill] sm:$0xff] %v9015_v63  ;;  %v3524_v25 = vadd.f32 %v6637_v58, %v3216_v43  ;;  %3617 = vadd.xlane.f32.xlu0 %v9015_v63 }
 0x3e9   : > { %v5869_v57 = vpop.f32.mrf.mxu0 }
 0x3ea   : > { %v9020_v50 = vadd.f32 %v8937_v21, %v3524_v25  ;;  %v3254_v24 = vpop.f32.mrf.mxu1 }
 0x3eb   : > { %v3525_v17 = vadd.f32 %v6638_v35, %v3254_v24  ;;  %v6643_v24 = vld [vmem:[%s7147_s2 + $0xb8] sm:$0xff] }
 0x3ec   : > { %9890 = vst [vmem:[#allocation24_spill] sm:$0xff] %v9020_v50  ;;  %3619 = vadd.xlane.f32.xlu1 %v9020_v50  ;;  %v5880_v48 = vpop.f32.mrf.mxu1 }
 0x3ed   : > { %v9025_v39 = vadd.f32 %v8930_v13, %v3525_v17 }
 0x3ee   : > { %v3257_v20 = vpop.f32.mrf.mxu1 }
 0x3ef   : > { %9891 = vst [vmem:[#allocation26_spill] sm:$0xff] %v9025_v39  ;;  %v3526_v53 = vadd.f32 %v6639_v37, %v3257_v20  ;;  %3621 = vadd.xlane.f32.xlu0 %v9025_v39 }
 0x3f0   : > { %v5881_v45 = vpop.f32.mrf.mxu1 }
 0x3f1   : > { %v9030_v16 = vadd.f32 %v8937_v21, %v3526_v53  ;;  %v6070_v45 = vld [vmem:[%s9767_s9 + $0x60] ss:$8 sps:$4 sm:$0xff]  }
 0x3f2   : > { %4140 = vmatpush1.bf16.msra.mxu0 %v6070_v45  ;;  %v6646_v45 = vld [vmem:[%s7147_s2 + $0xd0] sm:$0xff] }
 0x3f3   : > { %9892 = vst [vmem:[#allocation25_spill] sm:$0xff] %v9030_v16  ;;  %3623 = vadd.xlane.f32.xlu1 %v9030_v16 }
 0x41d   : > { %v3586_v38 = vpop.xlane.xlu1 %3585 }
 0x41e   : > { %v3649_v12 = vmul.f32 0.0078125, %v3586_v38 }
 0x41f   : > { %v3295_v29 = vpop.f32.mrf.mxu0 }
 0x420   : > { %v9040_v32 = vsub.f32 %v8933_v0, %v3649_v12  ;;  %v3527_v11 = vadd.f32 %v6640_v44, %v3295_v29  ;;  %v6073_v12 = vld [vmem:[%s9767_s9 + $0x50] ss:$8 sps:$4 sm:$0xff]   ;;  %v6075_v29 = vld [vmem:[%s9767_s9 + $0x54] ss:$8 sps:$4 sm:$0xff]  }
 0x421   : > { %v3588_v19 = vpop.xlane.xlu0 %3587  ;;  %v5892_v22 = vpop.f32.mrf.mxu0  ;;  %4141 = vmatprep.subr.bf16.mxu0 %v6075_v29 }
 0x422   : > { %v3650_v55 = vmul.f32 0.0078125, %v3588_v19  ;;  %v3713_v51 = vmul.f32 %v9040_v32, %v9040_v32  ;;  %v9049_v26 = vadd.f32 %v8930_v13, %v3527_v11  ;;  %4142 = vmatpush1.bf16.msra.mxu0 %v6073_v12 }
 0x423   : > { %v3298_v33 = vpop.f32.mrf.mxu0 }
 0x424   : > { %v9046_v59 = vsub.f32 %v8940_v40, %v3650_v55  ;;  %9893 = vst [vmem:[#allocation27_spill] sm:$0xff] %v9049_v26  ;;  %3745 = vadd.xlane.f32.xlu0 %v3713_v51  ;;  %v3528_v61 = vadd.f32 %v6641_v52, %v3298_v33  ;;  %v6644_v51 = vld [vmem:[%s7147_s2 + $0xc0] sm:$0xff] }
 0x425   : > { %v5893_v10 = vpop.f32.mrf.mxu0 }
 0x426   : > { %v3714_v42 = vmul.f32 %v9046_v59, %v9046_v59  ;;  %v9055_v60 = vadd.f32 %v8937_v21, %v3528_v61 }
 0x428   : > { %9894 = vst [vmem:[#allocation29_spill] sm:$0xff] %v9055_v60  ;;  %3625 = vadd.xlane.f32.xlu0 %v9049_v26  ;;  %3747 = vadd.xlane.f32.xlu1 %v3714_v42 }
 0x429   : > { %v3590_v15 = vpop.xlane.xlu0 %3589 }
 0x42a   : > { %v3651_v23 = vmul.f32 0.0078125, %v3590_v15  ;;  %v3336_v56 = vpop.f32.mrf.mxu1  ;;  %v6076_v15 = vld [vmem:[%s9767_s9 + $0x40] ss:$8 sps:$4 sm:$0xff]  }
 0x42b   : > { %v3529_v3 = vadd.f32 %v6642_v47, %v3336_v56 }
 0x42c   : > { %v9059_v7 = vsub.f32 %v8945_v1, %v3651_v23  ;;  %v5904_v31 = vpop.f32.mrf.mxu1  ;;  %3627 = vadd.xlane.f32.xlu1 %v9055_v60  ;;  %v6078_v23 = vld [vmem:[%s9767_s9 + $0x44] ss:$8 sps:$4 sm:$0xff]  }
 0x42d   : > { %v3592_v14 = vpop.xlane.xlu1 %3591  ;;  %v9069_v57 = vadd.f32 %v8930_v13, %v3529_v3  ;;  %v6645_v3 = vld [vmem:[%s7147_s2 + $0xc8] sm:$0xff]  ;;  %4143 = vmatprep.subr.bf16.mxu0 %v6078_v23 }
 0x42e   : > { %v3652_v5 = vmul.f32 0.0078125, %v3592_v14  ;;  %v3715_v43 = vmul.f32 %v9059_v7, %v9059_v7  ;;  %v3339_v58 = vpop.f32.mrf.mxu1  ;;  %4144 = vmatpush1.bf16.msra.mxu0 %v6076_v15  ;;  %v6082_v23 = vld [vmem:[%s9767_s9 + $0x20] ss:$8 sps:$4 sm:$0xff]  }
 0x42f   : > { %9895 = vst [vmem:[#allocation22_spill] sm:$0xff] %v9069_v57  ;;  %v3530_v35 = vadd.f32 %v6643_v24, %v3339_v58  ;;  %v3377_v20 = vpop.f32.mrf.mxu0  ;;  %v6079_v24 = vld [vmem:[%s9767_s9 + $0x30] ss:$8 sps:$4 sm:$0xff]  }
 0x430   : > { %v9066_v25 = vsub.f32 %v8950_v2, %v3652_v5  ;;  %3749 = vadd.xlane.f32.xlu0 %v3715_v43  ;;  %v5905_v17 = vpop.f32.mrf.mxu1  ;;  %v3531_v22 = vadd.f32 %v6644_v51, %v3377_v20 }
 0x431   : > { %v9075_v37 = vadd.f32 %v8937_v21, %v3530_v35  ;;  %v5916_v53 = vpop.f32.mrf.mxu0  ;;  %v6081_v35 = vld [vmem:[%s9767_s9 + $0x34] ss:$8 sps:$4 sm:$0xff]  }
 0x432   : > { %v3716_v48 = vmul.f32 %v9066_v25, %v9066_v25  ;;  %v9107_v47 = vadd.f32 %v8930_v13, %v3531_v22  ;;  %4145 = vmatprep.subr.bf16.mxu0 %v6081_v35  ;;  %v6647_v22 = vld [vmem:[%s7147_s2 + $0xd8] sm:$0xff]  ;;  %v6648_v35 = vld [vmem:[%s7147_s2 + $0xe0] sm:$0xff] }
 0x433   : > { %9896 = vst [vmem:[#allocation28_spill] sm:$0xff] %v9075_v37  ;;  %v3380_v49 = vpop.f32.mrf.mxu0  ;;  %4146 = vmatpush1.bf16.msra.mxu0 %v6079_v24 }
 0x434   : > { %3751 = vadd.xlane.f32.xlu1 %v3716_v48  ;;  %3629 = vadd.xlane.f32.xlu0 %v9069_v57  ;;  %v3532_v31 = vadd.f32 %v6645_v3, %v3380_v49 }
 0x435   : > { %v5917_v38 = vpop.f32.mrf.mxu0 }
 0x436   : > { %v9119_v48 = vadd.f32 %v8937_v21, %v3532_v31 }
 0x437   : > { %v3594_v19 = vpop.xlane.xlu0 %3593 }
 0x438   : > { %3631 = vadd.xlane.f32.xlu1 %v9075_v37  ;;  %v3653_v44 = vmul.f32 0.0078125, %v3594_v19  ;;  %9897 = vst [vmem:[#allocation21_spill] sm:$0xff] %v9119_v48 }
 0x43a   : > { %v3418_v11 = vpop.f32.mrf.mxu1  ;;  %v9092_v55 = vsub.f32 %v8955_v8, %v3653_v44 }
 0x43b   : > { %v3596_v52 = vpop.xlane.xlu1 %3595  ;;  %v3533_v34 = vadd.f32 %v6646_v45, %v3418_v11 }
 0x43c   : > { %v5928_v33 = vpop.f32.mrf.mxu1  ;;  %v3654_v61 = vmul.f32 0.0078125, %v3596_v52  ;;  %v3717_v42 = vmul.f32 %v9092_v55, %v9092_v55 }
 0x43d   : > { %v9133_v51 = vadd.f32 %v8930_v13, %v3533_v34 }
 0x43e   : > { %v3421_v10 = vpop.f32.mrf.mxu1  ;;  %v9104_v56 = vsub.f32 %v8960_v30, %v3654_v61  ;;  %3753 = vadd.xlane.f32.xlu0 %v3717_v42 }
 0x43f   : > { %v3459_v58 = vpop.f32.mrf.mxu0  ;;  %9898 = vst [vmem:[#allocation30_spill] sm:$0xff] %v9133_v51  ;;  %v3534_v11 = vadd.f32 %v6647_v22, %v3421_v10  ;;  %v6084_v10 = vld [vmem:[%s9767_s9 + $0x24] ss:$8 sps:$4 sm:$0xff]  }
 0x440   : > { %v5929_v14 = vpop.f32.mrf.mxu1  ;;  %v3718_v43 = vmul.f32 %v9104_v56, %v9104_v56  ;;  %4147 = vmatprep.subr.bf16.mxu0 %v6084_v10 }
 0x441   : > { %v5940_v20 = vpop.f32.mrf.mxu0  ;;  %v9139_v42 = vadd.f32 %v8937_v21, %v3534_v11  ;;  %4148 = vmatpush1.bf16.msra.mxu0 %v6082_v23  ;;  %v6090_v11 = vld [vmem:[%s9767_s9 + $0x4] ss:$8 sps:$4 sm:$0xff]  }
 0x442   : > { %v3598_v5 = vpop.xlane.xlu0 %3597  ;;  %3755 = vadd.xlane.f32.xlu1 %v3718_v43  ;;  %3633 = vadd.xlane.f32.xlu0 %v9107_v47  ;;  %v6087_v43 = vld [vmem:[%s9767_s9 + $0x14] ss:$8 sps:$4 sm:$0xff]  }
 0x443   : > { %v3655_v17 = vmul.f32 0.0078125, %v3598_v5  ;;  %v3462_v38 = vpop.f32.mrf.mxu0  ;;  %9899 = vst [vmem:[#allocation32_spill] sm:$0xff] %v9139_v42  ;;  %v6085_v5 = vld [vmem:[%s9767_s9 + $0x10] ss:$8 sps:$4 sm:$0xff]   ;;  %4149 = vmatprep.subr.bf16.mxu0 %v6087_v43 }
 0x445   : > { %v9123_v53 = vsub.f32 %v8965_v36, %v3655_v17  ;;  %v5941_v19 = vpop.f32.mrf.mxu0  ;;  %v3535_v17 = vadd.f32 %v6648_v35, %v3459_v58  ;;  %4150 = vmatpush1.bf16.msra.mxu0 %v6085_v5  ;;  %v6088_v58 = vld [vmem:[%s9767_s9] ss:$8 sps:$4 sm:$0xff]  }
 0x446   : > { %v3600_v49 = vpop.xlane.xlu1 %3599  ;;  %3635 = vadd.xlane.f32.xlu1 %v9119_v48  ;;  %v6649_v19 = vld [vmem:[%s7147_s2 + $0xe8] sm:$0xff]  ;;  %4151 = vmatprep.subr.bf16.mxu0 %v6090_v11 }
 0x447   : > { %v3656_v12 = vmul.f32 0.0078125, %v3600_v49  ;;  %v3719_v29 = vmul.f32 %v9123_v53, %v9123_v53  ;;  %v3536_v22 = vadd.f32 %v6649_v19, %v3462_v38 }
 0x449   : > { %v9130_v44 = vsub.f32 %v8970_v6, %v3656_v12  ;;  %3757 = vadd.xlane.f32.xlu0 %v3719_v29  ;;  %v9165_v12 = vadd.f32 %v8930_v13, %v3535_v17  ;;  %4152 = vmatpush1.bf16.msra.mxu0 %v6088_v58  ;;  %v9180_v38 = vadd.f32 %v8937_v21, %v3536_v22  ;;  %v6651_v17 = vld [vmem:[%s7147_s2 + $0xf8] sm:$0xff] }
 0x44a   : > { %v3500_v33 = vpop.f32.mrf.mxu1 }
 0x44b   : > { %v3720_v52 = vmul.f32 %v9130_v44, %v9130_v44 }
 0x44c   : > { %v5952_v61 = vpop.f32.mrf.mxu1 }
 0x44d   : > { %3759 = vadd.xlane.f32.xlu1 %v3720_v52  ;;  %3637 = vadd.xlane.f32.xlu0 %v9133_v51 }
 0x44e   : > { %v3503_v15 = vpop.f32.mrf.mxu1 }
 0x450   : > { %v3602_v3 = vpop.xlane.xlu0 %3601  ;;  %v5953_v31 = vpop.f32.mrf.mxu1 }
 0x451   : > { %v3657_v14 = vmul.f32 0.0078125, %v3602_v3  ;;  %3639 = vadd.xlane.f32.xlu1 %v9139_v42  ;;  %v6650_v3 = vld [vmem:[%s7147_s2 + $0xf0] sm:$0xff] }
 0x452   : > { %v3537_v31 = vadd.f32 %v6650_v3, %v3500_v33 }
 0x453   : > { %v9156_v24 = vsub.f32 %v8975_v9, %v3657_v14 }
 0x454   : > { %v3604_v20 = vpop.xlane.xlu1 %3603  ;;  %v9190_v35 = vadd.f32 %v8930_v13, %v3537_v31 }
 0x455   : > { %v3658_v45 = vmul.f32 0.0078125, %v3604_v20  ;;  %v3721_v34 = vmul.f32 %v9156_v24, %v9156_v24  ;;  %v3538_v20 = vadd.f32 %v6651_v17, %v3503_v15 }
 0x457   : > { %v9162_v49 = vsub.f32 %v8980_v4, %v3658_v45  ;;  %3761 = vadd.xlane.f32.xlu0 %v3721_v34  ;;  %v9200_v19 = vadd.f32 %v8937_v21, %v3538_v20 }
 0x458   : > { %v3606_v29 = vpop.xlane.xlu0 %3605 }
 0x459   : > { %v3659_v52 = vmul.f32 0.0078125, %v3606_v29  ;;  %v3722_v61 = vmul.f32 %v9162_v49, %v9162_v49 }
 0x45b   : > { %v9177_v23 = vsub.f32 %v8985_v18, %v3659_v52  ;;  %3763 = vadd.xlane.f32.xlu1 %v3722_v61  ;;  %3641 = vadd.xlane.f32.xlu0 %v9165_v12 }
 0x45c   : > { %v3608_v10 = vpop.xlane.xlu1 %3607 }
 0x45d   : > { %v3660_v14 = vmul.f32 0.0078125, %v3608_v10  ;;  %v3723_v5 = vmul.f32 %v9177_v23, %v9177_v23 }
 0x45f   : > { %v9187_v43 = vsub.f32 %v8990_v46, %v3660_v14  ;;  %3643 = vadd.xlane.f32.xlu1 %v9180_v38  ;;  %3765 = vadd.xlane.f32.xlu0 %v3723_v5 }
 0x461   : > { %v3610_v45 = vpop.xlane.xlu0 %3609  ;;  %v3724_v34 = vmul.f32 %v9187_v43, %v9187_v43 }
 0x462   : > { %v3661_v33 = vmul.f32 0.0078125, %v3610_v45 }
 0x463   : > { %3767 = vadd.xlane.f32.xlu1 %v3724_v34  ;;  %3645 = vadd.xlane.f32.xlu0 %v9190_v35 }
 0x464   : > { %v9197_v29 = vsub.f32 %v8995_v27, %v3661_v33 }
 0x465   : > { %v3612_v13 = vpop.xlane.xlu1 %3611 }
 0x466   : > { %v3662_v22 = vmul.f32 0.0078125, %v3612_v13  ;;  %v3725_v58 = vmul.f32 %v9197_v29, %v9197_v29 }
 0x467   : > { %3647 = vadd.xlane.f32.xlu1 %v9200_v19 }
 0x468   : > { %v9206_v15 = vsub.f32 %v9000_v62, %v3662_v22  ;;  %3769 = vadd.xlane.f32.xlu0 %v3725_v58  ;;  %v3614_v11 = vpop.xlane.xlu0 %3613 }
 0x469   : > { %v3663_v52 = vmul.f32 0.0078125, %v3614_v11 }
 0x46a   : > { %v3726_v21 = vmul.f32 %v9206_v15, %v9206_v15 }
 0x46b   : > { %v9212_v61 = vsub.f32 %v9005_v41, %v3663_v52 }
 0x46c   : > { %3771 = vadd.xlane.f32.xlu1 %v3726_v21  ;;  %v3616_v10 = vpop.xlane.xlu1 %3615 }
 0x46d   : > { %v3664_v3 = vmul.f32 0.0078125, %v3616_v10  ;;  %v3727_v31 = vmul.f32 %v9212_v61, %v9212_v61 }
 0x46f   : > { %v9217_v14 = vsub.f32 %v9010_v28, %v3664_v3  ;;  %3773 = vadd.xlane.f32.xlu0 %v3727_v31 }
 0x471   : > { %v3618_v5 = vpop.xlane.xlu0 %3617  ;;  %v3728_v17 = vmul.f32 %v9217_v14, %v9217_v14 }
 0x472   : > { %v3665_v20 = vmul.f32 0.0078125, %v3618_v5 }
 0x473   : > { %3775 = vadd.xlane.f32.xlu1 %v3728_v17 }
 0x474   : > { %v9222_v45 = vsub.f32 %v9015_v63, %v3665_v20 }
 0x475   : > { %v3620_v34 = vpop.xlane.xlu1 %3619 }
 0x476   : > { %v3666_v33 = vmul.f32 0.0078125, %v3620_v34  ;;  %v3729_v13 = vmul.f32 %v9222_v45, %v9222_v45 }
 0x478   : > { %v9227_v22 = vsub.f32 %v9020_v50, %v3666_v33  ;;  %3777 = vadd.xlane.f32.xlu0 %v3729_v13  ;;  %v3622_v58 = vpop.xlane.xlu0 %3621 }
 0x479   : > { %v3667_v11 = vmul.f32 0.0078125, %v3622_v58 }
 0x47a   : > { %v3730_v52 = vmul.f32 %v9227_v22, %v9227_v22 }
 0x47b   : > { %v9232_v21 = vsub.f32 %v9025_v39, %v3667_v11 }
 0x47c   : > { %3779 = vadd.xlane.f32.xlu1 %v3730_v52  ;;  %v3624_v10 = vpop.xlane.xlu1 %3623 }
 0x47d   : > { %v3668_v3 = vmul.f32 0.0078125, %v3624_v10  ;;  %v3731_v31 = vmul.f32 %v9232_v21, %v9232_v21 }
 0x47f   : > { %v9237_v5 = vsub.f32 %v9030_v16, %v3668_v3  ;;  %3781 = vadd.xlane.f32.xlu0 %v3731_v31 }
 0x481   : > { %v3732_v17 = vmul.f32 %v9237_v5, %v9237_v5 }
 0x483   : > { %3783 = vadd.xlane.f32.xlu1 %v3732_v17 }
 0x4ad   : > { %v3746_v20 = vpop.xlane.xlu0 %3745 }
 0x4ae   : > { %v3809_v34 = vmul.f32 0.0078125, %v3746_v20 }
 0x4b0   : > { %v3841_v33 = vadd.f32 1e-05, %v3809_v34 }
 0x4b1   : > { %v3748_v13 = vpop.xlane.xlu1 %3747  ;;  %v3626_v58 = vpop.xlane.xlu0 %3625 }
 0x4b2   : > { %6427 = vrsqrt.f32 %v3841_v33  ;;  %v3810_v11 = vmul.f32 0.0078125, %v3748_v13  ;;  %v3669_v52 = vmul.f32 0.0078125, %v3626_v58 }
 0x4b4   : > { %v3842_v10 = vadd.f32 1e-05, %v3810_v11  ;;  %v9242_v39 = vsub.f32 %v9049_v26, %v3669_v52 }
 0x4b5   : > { %v3628_v50 = vpop.xlane.xlu1 %3627 }
 0x4b6   : > { %6429 = vrsqrt.f32 %v3842_v10  ;;  %v3670_v3 = vmul.f32 0.0078125, %v3628_v50  ;;  %v3733_v31 = vmul.f32 %v9242_v39, %v9242_v39 }
 0x4b8   : > { %v9247_v17 = vsub.f32 %v9055_v60, %v3670_v3  ;;  %3785 = vadd.xlane.f32.xlu0 %v3733_v31 }
 0x4b9   : > { %v3750_v16 = vpop.xlane.xlu0 %3749 }
 0x4ba   : > { %v3811_v20 = vmul.f32 0.0078125, %v3750_v16  ;;  %v3734_v33 = vmul.f32 %v9247_v17, %v9247_v17 }
 0x4bc   : > { %v3843_v34 = vadd.f32 1e-05, %v3811_v20  ;;  %3787 = vadd.xlane.f32.xlu1 %v3734_v33  ;;  %v9257_v20 = vld [vmem:[#allocation8] ss:$0 sm:$0xff] }
 0x4bd   : > { %v3752_v13 = vpop.xlane.xlu1 %3751  ;;  %v3630_v58 = vpop.xlane.xlu0 %3629 }
 0x4be   : > { %6431 = vrsqrt.f32 %v3843_v34  ;;  %v3812_v11 = vmul.f32 0.0078125, %v3752_v13  ;;  %v3671_v52 = vmul.f32 0.0078125, %v3630_v58 }
 0x4bf   : > { %v6428_v26 = vpop.eup %6427 }
 0x4c0   : > { %v3844_v50 = vadd.f32 1e-05, %v3812_v11  ;;  %v9252_v10 = vsub.f32 %v9069_v57, %v3671_v52  ;;  %v3905_v31 = vmul.f32 %v6428_v26, %v9040_v32 }
 0x4c1   : > { %v3632_v63 = vpop.xlane.xlu1 %3631 }
 0x4c2   : > { %6433 = vrsqrt.f32 %v3844_v50  ;;  %v3672_v3 = vmul.f32 0.0078125, %v3632_v63  ;;  %v3735_v16 = vmul.f32 %v9252_v10, %v9252_v10  ;;  %v3943_v11 = vmul.f32 %v9257_v20, %v3905_v31  ;;  %v9266_v63 = vld [vmem:[#allocation10] ss:$0 sm:$0xff] }
 0x4c3   : > { %v6430_v33 = vpop.eup %6429 }
 0x4c4   : > { %v9260_v34 = vsub.f32 %v9075_v37, %v3672_v3  ;;  %3789 = vadd.xlane.f32.xlu0 %v3735_v16  ;;  %v3906_v58 = vmul.f32 %v6430_v33, %v9046_v59  ;;  %v3981_v50 = vadd.f32 %v9266_v63, %v3943_v11 }
 0x4c6   : > { %v3736_v13 = vmul.f32 %v9260_v34, %v9260_v34  ;;  %v3944_v52 = vmul.f32 %v9257_v20, %v3906_v58 }
 0x4c7   : > { %v3754_v32 = vpop.xlane.xlu0 %3753 }
 0x4c8   : > { %3791 = vadd.xlane.f32.xlu1 %v3736_v13  ;;  %v3813_v26 = vmul.f32 0.0078125, %v3754_v32  ;;  %v3982_v3 = vadd.f32 %v9266_v63, %v3944_v52 }
 0x4ca   : > { %v3845_v37 = vadd.f32 1e-05, %v3813_v26  ;;  %v4013_v57 = vpack.c.bf16 %v3982_v3, %v3981_v50 }
 0x4cb   : > { %v6432_v16 = vpop.eup %6431  ;;  %v3756_v28 = vpop.xlane.xlu1 %3755 }
 0x4cc   : > { %v3907_v60 = vmul.f32 %v6432_v16, %v9059_v7  ;;  %v3634_v59 = vpop.xlane.xlu0 %3633  ;;  %6435 = vrsqrt.f32 %v3845_v37  ;;  %v3814_v31 = vmul.f32 0.0078125, %v3756_v28  ;;  %4170 = vmatmul.mubr.bf16.vlgmr.msra.gmra.mxu0 %v4013_v57 }
 0x4cd   : > { %v3673_v33 = vmul.f32 0.0078125, %v3634_v59  ;;  %4179 = vmatprep.mubr.bf16.mxu0 %v9887_v54 }
 0x4ce   : > { %v3846_v58 = vadd.f32 1e-05, %v3814_v31  ;;  %v3945_v52 = vmul.f32 %v9257_v20, %v3907_v60 }
 0x4cf   : > { %v6434_v13 = vpop.eup %6433  ;;  %v9274_v32 = vsub.f32 %v9107_v47, %v3673_v33  ;;  %v3636_v26 = vpop.xlane.xlu1 %3635 }
 0x4d0   : > { %v3908_v11 = vmul.f32 %v6434_v13, %v9066_v25  ;;  %6437 = vrsqrt.f32 %v3846_v58  ;;  %v3674_v7 = vmul.f32 0.0078125, %v3636_v26  ;;  %v3983_v16 = vadd.f32 %v9266_v63, %v3945_v52 }
 0x4d1   : > { %v3737_v28 = vmul.f32 %v9274_v32, %v9274_v32 }
 0x4d2   : > { %v3758_v50 = vpop.xlane.xlu0 %3757  ;;  %v3946_v57 = vmul.f32 %v9257_v20, %v3908_v11  ;;  %v9282_v3 = vsub.f32 %v9119_v48, %v3674_v7 }
 0x4d3   : > { %v3815_v37 = vmul.f32 0.0078125, %v3758_v50  ;;  %3793 = vadd.xlane.f32.xlu0 %v3737_v28 }
 0x4d4   : > { %v3984_v25 = vadd.f32 %v9266_v63, %v3946_v57  ;;  %v3738_v33 = vmul.f32 %v9282_v3, %v9282_v3 }
 0x4d5   : > { %v3847_v59 = vadd.f32 1e-05, %v3815_v37 }
 0x4d6   : > { %v3760_v60 = vpop.xlane.xlu1 %3759  ;;  %v3638_v31 = vpop.xlane.xlu0 %3637  ;;  %v4014_v13 = vpack.c.bf16 %v3984_v25, %v3983_v16  ;;  %3795 = vadd.xlane.f32.xlu1 %v3738_v33 }
 0x4d7   : > { %6439 = vrsqrt.f32 %v3847_v59  ;;  %v3816_v58 = vmul.f32 0.0078125, %v3760_v60  ;;  %v3675_v26 = vmul.f32 0.0078125, %v3638_v31 }
 0x4d8   : > { %4180 = vmatmul.mubr.bf16.gmra.mxu0 %v4014_v13 }
 0x4d9   : > { %v3848_v11 = vadd.f32 1e-05, %v3816_v58  ;;  %v9289_v7 = vsub.f32 %v9133_v51, %v3675_v26  ;;  %4189 = vmatprep.mubr.bf16.mxu0 %v9887_v54  ;;  %v6436_v50 = vpop.eup %6435 }
 0x4da   : > { %v3640_v52 = vpop.xlane.xlu1 %3639  ;;  %v3909_v37 = vmul.f32 %v6436_v50, %v9092_v55 }
 0x4db   : > { %6441 = vrsqrt.f32 %v3848_v11  ;;  %v3676_v28 = vmul.f32 0.0078125, %v3640_v52  ;;  %v3739_v57 = vmul.f32 %v9289_v7, %v9289_v7 }
 0x4dc   : > { %v3947_v33 = vmul.f32 %v9257_v20, %v3909_v37 }
 0x4dd   : > { %v9296_v16 = vsub.f32 %v9139_v42, %v3676_v28  ;;  %3797 = vadd.xlane.f32.xlu0 %v3739_v57  ;;  %v6438_v25 = vpop.eup %6437 }
 0x4de   : > { %v3910_v31 = vmul.f32 %v6438_v25, %v9104_v56  ;;  %v3985_v50 = vadd.f32 %v9266_v63, %v3947_v33 }
 0x4df   : > { %v3740_v59 = vmul.f32 %v9296_v16, %v9296_v16 }
 0x4e0   : > { %v3762_v60 = vpop.xlane.xlu0 %3761  ;;  %v3948_v58 = vmul.f32 %v9257_v20, %v3910_v31 }
 0x4e1   : > { %v3817_v13 = vmul.f32 0.0078125, %v3762_v60  ;;  %3799 = vadd.xlane.f32.xlu1 %v3740_v59 }
 0x4e2   : > { %v3986_v28 = vadd.f32 %v9266_v63, %v3948_v58 }
 0x4e3   : > { %v3849_v26 = vadd.f32 1e-05, %v3817_v13 }
 0x4e4   : > { %v6440_v11 = vpop.eup %6439  ;;  %v3764_v55 = vpop.xlane.xlu1 %3763  ;;  %v4015_v51 = vpack.c.bf16 %v3986_v28, %v3985_v50 }
 0x4e5   : > { %v3642_v52 = vpop.xlane.xlu0 %3641  ;;  %6443 = vrsqrt.f32 %v3849_v26  ;;  %v3818_v57 = vmul.f32 0.0078125, %v3764_v55  ;;  %v3911_v56 = vmul.f32 %v6440_v11, %v9123_v53 }
 0x4e6   : > { %v3677_v42 = vmul.f32 0.0078125, %v3642_v52  ;;  %4190 = vmatmul.mubr.bf16.gmra.mxu0 %v4015_v51 }
 0x4e7   : > { %v3850_v25 = vadd.f32 1e-05, %v3818_v57  ;;  %4199 = vmatprep.mubr.bf16.mxu0 %v9887_v54  ;;  %v3949_v53 = vmul.f32 %v9257_v20, %v3911_v56 }
 0x4e8   : > { %v9307_v37 = vsub.f32 %v9165_v12, %v3677_v42  ;;  %v6442_v59 = vpop.eup %6441  ;;  %v3644_v60 = vpop.xlane.xlu1 %3643 }
 0x4e9   : > { %v3766_v31 = vpop.xlane.xlu0 %3765  ;;  %6445 = vrsqrt.f32 %v3850_v25  ;;  %v3678_v13 = vmul.f32 0.0078125, %v3644_v60  ;;  %v3912_v58 = vmul.f32 %v6442_v59, %v9130_v44  ;;  %v3987_v57 = vadd.f32 %v9266_v63, %v3949_v53 }
 0x4ea   : > { %v3819_v48 = vmul.f32 0.0078125, %v3766_v31  ;;  %v3741_v33 = vmul.f32 %v9307_v37, %v9307_v37 }
 0x4eb   : > { %v9315_v26 = vsub.f32 %v9180_v38, %v3678_v13  ;;  %v3950_v51 = vmul.f32 %v9257_v20, %v3912_v58 }
 0x4ec   : > { %v3851_v42 = vadd.f32 1e-05, %v3819_v48  ;;  %3801 = vadd.xlane.f32.xlu0 %v3741_v33  ;;  %v3768_v11 = vpop.xlane.xlu1 %3767 }
 0x4ed   : > { %v3646_v55 = vpop.xlane.xlu0 %3645  ;;  %v3820_v52 = vmul.f32 0.0078125, %v3768_v11  ;;  %v3742_v28 = vmul.f32 %v9315_v26, %v9315_v26  ;;  %v3988_v44 = vadd.f32 %v9266_v63, %v3950_v51 }
 0x4ee   : > { %6447 = vrsqrt.f32 %v3851_v42  ;;  %v3679_v50 = vmul.f32 0.0078125, %v3646_v55 }
 0x4ef   : > { %v3852_v56 = vadd.f32 1e-05, %v3820_v52  ;;  %3803 = vadd.xlane.f32.xlu1 %v3742_v28  ;;  %v4016_v60 = vpack.c.bf16 %v3988_v44, %v3987_v57 }
 0x4f0   : > { %v9323_v25 = vsub.f32 %v9190_v35, %v3679_v50  ;;  %v3648_v48 = vpop.xlane.xlu1 %3647 }
 0x4f1   : > { %v3770_v59 = vpop.xlane.xlu0 %3769  ;;  %6449 = vrsqrt.f32 %v3852_v56  ;;  %v3680_v31 = vmul.f32 0.0078125, %v3648_v48  ;;  %4200 = vmatmul.mubr.bf16.gmra.mxu0 %v4016_v60 }
 0x4f2   : > { %v3821_v13 = vmul.f32 0.0078125, %v3770_v59  ;;  %v3743_v33 = vmul.f32 %v9323_v25, %v9323_v25  ;;  %v6444_v58 = vpop.eup %6443  ;;  %4209 = vmatprep.mubr.bf16.mxu0 %v9887_v54 }
 0x4f3   : > { %v9328_v53 = vsub.f32 %v9200_v19, %v3680_v31  ;;  %v3913_v11 = vmul.f32 %v6444_v58, %v9156_v24 }
 0x4f4   : > { %v3853_v42 = vadd.f32 1e-05, %v3821_v13  ;;  %3805 = vadd.xlane.f32.xlu0 %v3743_v33 }
 0x4f5   : > { %v3772_v55 = vpop.xlane.xlu1 %3771  ;;  %v3744_v52 = vmul.f32 %v9328_v53, %v9328_v53  ;;  %v3951_v56 = vmul.f32 %v9257_v20, %v3913_v11 }
 0x4f6   : > { %6451 = vrsqrt.f32 %v3853_v42  ;;  %v3822_v51 = vmul.f32 0.0078125, %v3772_v55  ;;  %v6446_v50 = vpop.eup %6445 }
 0x4f7   : > { %3807 = vadd.xlane.f32.xlu1 %v3744_v52  ;;  %v3914_v44 = vmul.f32 %v6446_v50, %v9162_v49  ;;  %v3989_v13 = vadd.f32 %v9266_v63, %v3951_v56 }
 0x4f8   : > { %v3854_v28 = vadd.f32 1e-05, %v3822_v51  ;;  %v3774_v57 = vpop.xlane.xlu0 %3773 }
 0x4f9   : > { %v3823_v48 = vmul.f32 0.0078125, %v3774_v57  ;;  %v3952_v59 = vmul.f32 %v9257_v20, %v3914_v44 }
 0x4fa   : > { %6453 = vrsqrt.f32 %v3854_v28 }
 0x4fb   : > { %v6448_v60 = vpop.eup %6447  ;;  %v3855_v24 = vadd.f32 1e-05, %v3823_v48  ;;  %v3990_v33 = vadd.f32 %v9266_v63, %v3952_v59 }
 0x4fc   : > { %v3776_v31 = vpop.xlane.xlu1 %3775  ;;  %v3915_v58 = vmul.f32 %v6448_v60, %v9177_v23 }
 0x4fd   : > { %6455 = vrsqrt.f32 %v3855_v24  ;;  %v3824_v42 = vmul.f32 0.0078125, %v3776_v31  ;;  %v4017_v55 = vpack.c.bf16 %v3990_v33, %v3989_v13 }
 0x4fe   : > { %v6450_v51 = vpop.eup %6449  ;;  %v3953_v52 = vmul.f32 %v9257_v20, %v3915_v58 }
 0x4ff   : > { %v3856_v49 = vadd.f32 1e-05, %v3824_v42  ;;  %4210 = vmatmul.mubr.bf16.gmra.mxu0 %v4017_v55  ;;  %v3916_v11 = vmul.f32 %v6450_v51, %v9187_v43 }
 0x500   : > { %4219 = vmatprep.mubr.bf16.mxu0 %v9887_v54  ;;  %v3991_v23 = vadd.f32 %v9266_v63, %v3953_v52 }
 0x501   : > { %6457 = vrsqrt.f32 %v3856_v49  ;;  %v3778_v50 = vpop.xlane.xlu0 %3777  ;;  %v3954_v57 = vmul.f32 %v9257_v20, %v3916_v11 }
 0x502   : > { %v3825_v28 = vmul.f32 0.0078125, %v3778_v50 }
 0x503   : > { %v6452_v44 = vpop.eup %6451  ;;  %v3992_v48 = vadd.f32 %v9266_v63, %v3954_v57 }
 0x504   : > { %v3857_v56 = vadd.f32 1e-05, %v3825_v28  ;;  %v3917_v59 = vmul.f32 %v6452_v44, %v9197_v29 }
 0x505   : > { %v3780_v60 = vpop.xlane.xlu1 %3779  ;;  %v4018_v24 = vpack.c.bf16 %v3992_v48, %v3991_v23 }
 0x506   : > { %6459 = vrsqrt.f32 %v3857_v56  ;;  %v3826_v43 = vmul.f32 0.0078125, %v3780_v60  ;;  %v3955_v42 = vmul.f32 %v9257_v20, %v3917_v59 }
 0x507   : > { %v6454_v31 = vpop.eup %6453  ;;  %4220 = vmatmul.mubr.bf16.gmra.mxu0 %v4018_v24 }
 0x508   : > { %v3858_v13 = vadd.f32 1e-05, %v3826_v43  ;;  %v3782_v33 = vpop.xlane.xlu0 %3781  ;;  %v3918_v58 = vmul.f32 %v6454_v31, %v9206_v15  ;;  %4229 = vmatprep.mubr.bf16.mxu0 %v9887_v54  ;;  %v3993_v50 = vadd.f32 %v9266_v63, %v3955_v42 }
 0x509   : > { %v3827_v55 = vmul.f32 0.0078125, %v3782_v33 }
 0x50a   : > { %v6456_v51 = vpop.eup %6455  ;;  %6461 = vrsqrt.f32 %v3858_v13  ;;  %v3956_v49 = vmul.f32 %v9257_v20, %v3918_v58 }
 0x50b   : > { %v3859_v29 = vadd.f32 1e-05, %v3827_v55  ;;  %v3919_v11 = vmul.f32 %v6456_v51, %v9212_v61 }
 0x50c   : > { %v3784_v52 = vpop.xlane.xlu1 %3783  ;;  %v3994_v28 = vadd.f32 %v9266_v63, %v3956_v49 }
 0x50d   : > { %6463 = vrsqrt.f32 %v3859_v29  ;;  %v3828_v57 = vmul.f32 0.0078125, %v3784_v52  ;;  %v3957_v48 = vmul.f32 %v9257_v20, %v3919_v11 }
 0x50e   : > { %v6458_v15 = vpop.eup %6457  ;;  %v4019_v44 = vpack.c.bf16 %v3994_v28, %v3993_v50 }
 0x50f   : > { %v3860_v56 = vadd.f32 1e-05, %v3828_v57  ;;  %v3920_v23 = vmul.f32 %v6458_v15, %v9217_v14  ;;  %v3995_v60 = vadd.f32 %v9266_v63, %v3957_v48  ;;  %v6092_v57 = vld [vmem:[#allocation11 + $0x38] sm:$0xff]   ;;  %v6097_v48 = vld [vmem:[#allocation11 + $0x60] sm:$0xff]  }
 0x510   : > { %4230 = vmatmul.mubr.bf16.gmra.mxu0 %v4019_v44  ;;  %v6094_v44 = vld [vmem:[#allocation11 + $0x30] sm:$0xff]  }
 0x511   : > { %6465 = vrsqrt.f32 %v3860_v56  ;;  %4239 = vmatprep.mubr.bf16.mxu0 %v9887_v54  ;;  %v3958_v61 = vmul.f32 %v9257_v20, %v3920_v23  ;;  %v6095_v56 = vld [vmem:[#allocation11 + $0x68] sm:$0xff]  }
 0x512   : > { %v6096_v23 = vld [vmem:[#allocation11 + $0x28] sm:$0xff]  }
 0x513   : > { %v6460_v59 = vpop.eup %6459  ;;  %v3996_v43 = vadd.f32 %v9266_v63, %v3958_v61  ;;  %v6098_v61 = vld [vmem:[#allocation11 + $0x20] sm:$0xff]  }
 0x514   : > { %v3921_v24 = vmul.f32 %v6460_v59, %v9222_v45  ;;  %v6099_v59 = vld [vmem:[#allocation11 + $0x58] sm:$0xff]  }
 0x515   : > { %v4020_v31 = vpack.c.bf16 %v3996_v43, %v3995_v60  ;;  %v6100_v60 = vld [vmem:[#allocation11 + $0x18] sm:$0xff]   ;;  %v6101_v43 = vld [vmem:[#allocation11 + $0x50] sm:$0xff]  }
 0x516   : > { %v3959_v33 = vmul.f32 %v9257_v20, %v3921_v24  ;;  %v6102_v24 = vld [vmem:[#allocation11 + $0x10] sm:$0xff]  }
 0x517   : > { %v6462_v13 = vpop.eup %6461 }
 0x518   : > { %4240 = vmatmul.mubr.bf16.gmra.mxu0 %v4020_v31  ;;  %v3922_v14 = vmul.f32 %v6462_v13, %v9227_v22  ;;  %v3997_v51 = vadd.f32 %v9266_v63, %v3959_v33  ;;  %v6103_v33 = vld [vmem:[#allocation11 + $0x48] sm:$0xff]  }
 0x519   : > { %4249 = vmatprep.mubr.bf16.mxu0 %v9887_v54 }
 0x51a   : > { %v6464_v58 = vpop.eup %6463  ;;  %v3960_v42 = vmul.f32 %v9257_v20, %v3922_v14 }
 0x51b   : > { %v3923_v55 = vmul.f32 %v6464_v58, %v9232_v21  ;;  %v6091_v21 = vld [vmem:[#allocation11 + $0x78] sm:$0xff]  }
 0x51c   : > { %v3998_v49 = vadd.f32 %v9266_v63, %v3960_v42  ;;  %5490 = vmatprep.subr.bf16.mxu1 %v6091_v21  ;;  %v6104_v42 = vld [vmem:[#allocation11 + $0x8] sm:$0xff]  }
 0x51d   : > { %v3961_v52 = vmul.f32 %v9257_v20, %v3923_v55  ;;  %5491 = vmatpush3.bf16.msra.mxu1 %v6092_v57 }
 0x51e   : > { %v6466_v29 = vpop.eup %6465  ;;  %v4021_v45 = vpack.c.bf16 %v3998_v49, %v3997_v51  ;;  %v6105_v49 = vld [vmem:[#allocation11 + $0x40] sm:$0xff]  }
 0x51f   : > { %v3924_v11 = vmul.f32 %v6466_v29, %v9237_v5  ;;  %v3999_v50 = vadd.f32 %v9266_v63, %v3961_v52  ;;  %v6093_v5 = vld [vmem:[#allocation11 + $0x70] sm:$0xff]   ;;  %v6106_v29 = vld [vmem:[#allocation11] sm:$0xff]  }
 0x520   : > { %4250 = vmatmul.mubr.bf16.gmra.mxu0 %v4021_v45  ;;  %5492 = vmatprep.subr.bf16.mxu1 %v6093_v5 }
 0x521   : > { %4259 = vmatprep.mubr.bf16.mxu0 %v9887_v54  ;;  %v3962_v22 = vmul.f32 %v9257_v20, %v3924_v11  ;;  %5493 = vmatpush3.bf16.msra.mxu1 %v6094_v44 }
 0x522   : > { %5494 = vmatprep.subr.bf16.mxu1 %v6095_v56 }
 0x523   : > { %v4000_v28 = vadd.f32 %v9266_v63, %v3962_v22 }
 0x525   : > { %v4022_v15 = vpack.c.bf16 %v4000_v28, %v3999_v50  ;;  %5495 = vmatpush3.bf16.msra.mxu1 %v6096_v23 }
 0x526   : > { %5496 = vmatprep.subr.bf16.mxu1 %v6097_v48 }
 0x528   : > { %4260 = vmatmul.mubr.bf16.gmra.mxu0 %v4022_v15 }
 0x529   : > { %4269 = vmatprep.mubr.bf16.mxu0 %v9887_v54  ;;  %5497 = vmatpush3.bf16.msra.mxu1 %v6098_v61 }
 0x52a   : > { %5498 = vmatprep.subr.bf16.mxu1 %v6099_v59 }
 0x52d   : > { %5499 = vmatpush3.bf16.msra.mxu1 %v6100_v60 }
 0x52e   : > { %5500 = vmatprep.subr.bf16.mxu1 %v6101_v43 }
 0x531   : > { %5501 = vmatpush3.bf16.msra.mxu1 %v6102_v24 }
 0x532   : > { %5502 = vmatprep.subr.bf16.mxu1 %v6103_v33 }
 0x535   : > { %5503 = vmatpush3.bf16.msra.mxu1 %v6104_v42 }
 0x536   : > { %5504 = vmatprep.subr.bf16.mxu1 %v6105_v49 }
 0x539   : > { %5505 = vmatpush3.bf16.msra.mxu1 %v6106_v29 }
 0x541   : > { %v3786_v31 = vpop.xlane.xlu0 %3785 }
 0x542   : > { %v3829_v13 = vmul.f32 0.0078125, %v3786_v31 }
 0x544   : > { %v3861_v14 = vadd.f32 1e-05, %v3829_v13 }
 0x545   : > { %v3788_v58 = vpop.xlane.xlu1 %3787 }
 0x546   : > { %6467 = vrsqrt.f32 %v3861_v14  ;;  %v3830_v55 = vmul.f32 0.0078125, %v3788_v58 }
 0x548   : > { %v3862_v51 = vadd.f32 1e-05, %v3830_v55 }
 0x54a   : > { %6469 = vrsqrt.f32 %v3862_v51 }
 0x54d   : > { %v3790_v45 = vpop.xlane.xlu0 %3789 }
 0x54e   : > { %v3831_v11 = vmul.f32 0.0078125, %v3790_v45 }
 0x550   : > { %v3863_v52 = vadd.f32 1e-05, %v3831_v11 }
 0x551   : > { %v3792_v22 = vpop.xlane.xlu1 %3791 }
 0x552   : > { %6471 = vrsqrt.f32 %v3863_v52  ;;  %v3832_v50 = vmul.f32 0.0078125, %v3792_v22 }
 0x553   : > { %v6468_v21 = vpop.eup %6467 }
 0x554   : > { %v3864_v28 = vadd.f32 1e-05, %v3832_v50  ;;  %v3925_v57 = vmul.f32 %v6468_v21, %v9242_v39 }
 0x556   : > { %6473 = vrsqrt.f32 %v3864_v28  ;;  %v3963_v44 = vmul.f32 %v9257_v20, %v3925_v57 }
 0x557   : > { %v6470_v15 = vpop.eup %6469 }
 0x558   : > { %v3926_v5 = vmul.f32 %v6470_v15, %v9247_v17  ;;  %v4001_v61 = vadd.f32 %v9266_v63, %v3963_v44 }
 0x55a   : > { %v3964_v56 = vmul.f32 %v9257_v20, %v3926_v5 }
 0x55c   : > { %v3794_v23 = vpop.xlane.xlu0 %3793  ;;  %v4002_v59 = vadd.f32 %v9266_v63, %v3964_v56 }
 0x55d   : > { %v3833_v48 = vmul.f32 0.0078125, %v3794_v23 }
 0x55e   : > { %v4023_v24 = vpack.c.bf16 %v4002_v59, %v4001_v61 }
 0x55f   : > { %v6472_v60 = vpop.eup %6471  ;;  %v3865_v43 = vadd.f32 1e-05, %v3833_v48  ;;  %v3796_v13 = vpop.xlane.xlu1 %3795 }
 0x560   : > { %v3927_v31 = vmul.f32 %v6472_v60, %v9252_v10  ;;  %v3834_v39 = vmul.f32 0.0078125, %v3796_v13  ;;  %4270 = vmatmul.mubr.bf16.gmra.mxu0 %v4023_v24 }
 0x561   : > { %6475 = vrsqrt.f32 %v3865_v43  ;;  %4279 = vmatprep.mubr.bf16.mxu0 %v9887_v54 }
 0x562   : > { %v3866_v14 = vadd.f32 1e-05, %v3834_v39  ;;  %v3965_v58 = vmul.f32 %v9257_v20, %v3927_v31 }
 0x563   : > { %v6474_v17 = vpop.eup %6473 }
 0x564   : > { %v3928_v33 = vmul.f32 %v6474_v17, %v9260_v34  ;;  %6477 = vrsqrt.f32 %v3866_v14  ;;  %v4003_v49 = vadd.f32 %v9266_v63, %v3965_v58  ;;  %v4047_v58 = vlaneseq }
 0x566   : > { %v3798_v42 = vpop.xlane.xlu0 %3797  ;;  %v3966_v55 = vmul.f32 %v9257_v20, %v3928_v33 }
 0x567   : > { %v3835_v51 = vmul.f32 0.0078125, %v3798_v42 }
 0x568   : > { %v4004_v10 = vadd.f32 %v9266_v63, %v3966_v55 }
 0x569   : > { %v3867_v29 = vadd.f32 1e-05, %v3835_v51 }
 0x56a   : > { %v3800_v45 = vpop.xlane.xlu1 %3799  ;;  %v4024_v11 = vpack.c.bf16 %v4004_v10, %v4003_v49 }
 0x56b   : > { %6479 = vrsqrt.f32 %v3867_v29  ;;  %v3836_v52 = vmul.f32 0.0078125, %v3800_v45  ;;  %v4048_v29 = vshrl.u32 %v4047_v58, 7 }
 0x56c   : > { %4280 = vmatmul.mubr.bf16.gmra.mxu0 %v4024_v11 }
 0x56d   : > { %v3868_v22 = vadd.f32 1e-05, %v3836_v52  ;;  %4289 = vmatprep.mubr.bf16.mxu0 %v9887_v54  ;;  %v4049_v11 = vsub.s32 0, %v4048_v29  ;;  %v4045_v52 = vld [vmem:[%s9768_s10] sm:$0x3] }
 0x56e   : > { %v6476_v34 = vpop.eup %6475 }
 0x56f   : > { %6481 = vrsqrt.f32 %v3868_v22  ;;  %v3929_v50 = vmul.f32 %v6476_v34, %v9274_v32  ;;  %v4053_v34 = vsub.s32 1, %v4048_v29 }
 0x571   : > { %v6478_v28 = vpop.eup %6477  ;;  %v3967_v15 = vmul.f32 %v9257_v20, %v3929_v50 }
 0x572   : > { %v3930_v57 = vmul.f32 %v6478_v28, %v9282_v3 }
 0x573   : > { %v4005_v61 = vadd.f32 %v9266_v63, %v3967_v15 }
 0x574   : > { %v3968_v44 = vmul.f32 %v9257_v20, %v3930_v57 }
 0x575   : > { %v3802_v21 = vpop.xlane.xlu0 %3801 }
 0x576   : > { %v3837_v5 = vmul.f32 0.0078125, %v3802_v21  ;;  %v4006_v59 = vadd.f32 %v9266_v63, %v3968_v44  ;;  %v9409_v21 = vrot.slane %v4045_v52, %v4049_v11  ;;  %v9412_v44 = vrot.slane %v4045_v52, %v4053_v34 }
 0x578   : > { %v3869_v56 = vadd.f32 1e-05, %v3837_v5  ;;  %v6480_v23 = vpop.eup %6479  ;;  %v3804_v48 = vpop.xlane.xlu1 %3803  ;;  %v4025_v43 = vpack.c.bf16 %v4006_v59, %v4005_v61 }
 0x579   : > { %v3838_v60 = vmul.f32 0.0078125, %v3804_v48  ;;  %v3931_v32 = vmul.f32 %v6480_v23, %v9289_v7 }
 0x57a   : > { %6483 = vrsqrt.f32 %v3869_v56  ;;  %4290 = vmatmul.mubr.bf16.gmra.mxu0 %v4025_v43 }
 0x57b   : > { %v3870_v24 = vadd.f32 1e-05, %v3838_v60  ;;  %4299 = vmatprep.mubr.bf16.mxu0 %v9887_v54  ;;  %v3969_v17 = vmul.f32 %v9257_v20, %v3931_v32 }
 0x57c   : > { %v6482_v31 = vpop.eup %6481 }
 0x57d   : > { %v3806_v3 = vpop.xlane.xlu0 %3805  ;;  %6485 = vrsqrt.f32 %v3870_v24  ;;  %v3932_v39 = vmul.f32 %v6482_v31, %v9296_v16  ;;  %v4007_v55 = vadd.f32 %v9266_v63, %v3969_v17 }
 0x57e   : > { %v3839_v13 = vmul.f32 0.0078125, %v3806_v3 }
 0x57f   : > { %v3970_v33 = vmul.f32 %v9257_v20, %v3932_v39 }
 0x580   : > { %v3871_v14 = vadd.f32 1e-05, %v3839_v13  ;;  %v3808_v42 = vpop.xlane.xlu1 %3807 }
 0x581   : > { %v3840_v7 = vmul.f32 0.0078125, %v3808_v42  ;;  %v4008_v51 = vadd.f32 %v9266_v63, %v3970_v33 }
 0x582   : > { %6487 = vrsqrt.f32 %v3871_v14 }
 0x583   : > { %v3872_v49 = vadd.f32 1e-05, %v3840_v7  ;;  %v4026_v10 = vpack.c.bf16 %v4008_v51, %v4007_v55 }
 0x585   : > { %6489 = vrsqrt.f32 %v3872_v49  ;;  %4300 = vmatmul.mubr.bf16.gmra.mxu0 %v4026_v10 }
 0x586   : > { %4309 = vmatprep.mubr.bf16.mxu0 %v9887_v54 }
 0x587   : > { %v6484_v45 = vpop.eup %6483 }
 0x588   : > { %v3933_v16 = vmul.f32 %v6484_v45, %v9307_v37 }
 0x58a   : > { %v6486_v22 = vpop.eup %6485  ;;  %v3971_v28 = vmul.f32 %v9257_v20, %v3933_v16 }
 0x58b   : > { %v3934_v50 = vmul.f32 %v6486_v22, %v9315_v26 }
 0x58c   : > { %v4171_v5 = vpop.f32.mrf.mxu0  ;;  %v4009_v37 = vadd.f32 %v9266_v63, %v3971_v28 }
 0x58d   : > { %v3972_v57 = vmul.f32 %v9257_v20, %v3934_v50  ;;  %v4172_v48 = vadd.f32 %v4171_v5, %v9409_v21 }
 0x58e   : > { %v4173_v61 = vpop.f32.mrf.mxu0 }
 0x58f   : > { %v6488_v15 = vpop.eup %6487  ;;  %v4010_v56 = vadd.f32 %v9266_v63, %v3972_v57  ;;  %v4394_v59 = vmul.f32 0.70710677, %v4172_v48  ;;  %v4174_v32 = vadd.f32 %v4173_v61, %v9412_v44 }
 0x590   : > { %v3935_v23 = vmul.f32 %v6488_v15, %v9323_v25  ;;  %v4175_v43 = vpop.f32.mrf.mxu0 }
 0x591   : > { %v4027_v26 = vpack.c.bf16 %v4010_v56, %v4009_v37  ;;  %v4176_v3 = vadd.f32 %v4175_v43, %v9409_v21  ;;  %v4395_v13 = vmul.f32 0.70710677, %v4174_v32  ;;  %6491 = verf.f32 %v4394_v59 }
 0x592   : > { %v6490_v60 = vpop.eup %6489  ;;  %v3973_v31 = vmul.f32 %v9257_v20, %v3935_v23  ;;  %v4177_v25 = vpop.f32.mrf.mxu0  ;;  %v4331_v23 = vmul.f32 0.5, %v4174_v32 }
 0x593   : > { %4310 = vmatmul.mubr.bf16.gmra.mxu0 %v4027_v26  ;;  %v3936_v24 = vmul.f32 %v6490_v60, %v9328_v53  ;;  %v4396_v17 = vmul.f32 0.70710677, %v4176_v3  ;;  %v4178_v14 = vadd.f32 %v4177_v25, %v9412_v44  ;;  %6493 = verf.f32 %v4395_v13 }
 0x594   : > { %4319 = vmatprep.mubr.bf16.mxu0 %v9887_v54  ;;  %v4011_v33 = vadd.f32 %v9266_v63, %v3973_v31  ;;  %v4332_v5 = vmul.f32 0.5, %v4176_v3  ;;  %v4330_v26 = vmul.f32 0.5, %v4172_v48 }
 0x595   : > { %v3974_v39 = vmul.f32 %v9257_v20, %v3936_v24  ;;  %6495 = verf.f32 %v4396_v17  ;;  %v4397_v53 = vmul.f32 0.70710677, %v4178_v14  ;;  %v4333_v37 = vmul.f32 0.5, %v4178_v14 }
 0x597   : > { %v4012_v58 = vadd.f32 %v9266_v63, %v3974_v39  ;;  %6497 = verf.f32 %v4397_v53 }
 0x598   : > { %v4181_v42 = vpop.f32.mrf.mxu0 }
 0x599   : > { %v4028_v7 = vpack.c.bf16 %v4012_v58, %v4011_v33  ;;  %v4182_v54 = vadd.f32 %v4181_v42, %v9409_v21 }
 0x59a   : > { %v4183_v55 = vpop.f32.mrf.mxu0 }
 0x59b   : > { %4320 = vmatmul.mubr.bf16.gmra.mxu0 %v4028_v7  ;;  %v4184_v20 = vadd.f32 %v4183_v55, %v9412_v44  ;;  %v4398_v51 = vmul.f32 0.70710677, %v4182_v54 }
 0x59c   : > { %v4185_v49 = vpop.f32.mrf.mxu0 }
 0x59d   : > { %v4399_v10 = vmul.f32 0.70710677, %v4184_v20  ;;  %v4186_v29 = vadd.f32 %v4185_v49, %v9409_v21 }
 0x59e   : > { %v4187_v45 = vpop.f32.mrf.mxu0  ;;  %v6492_v52 = vpop.eup %6491 }
 0x59f   : > { %6499 = verf.f32 %v4399_v10  ;;  %v4400_v16 = vmul.f32 0.70710677, %v4186_v29  ;;  %v4188_v63 = vadd.f32 %v4187_v45, %v9412_v44  ;;  %v4522_v15 = vadd.f32 1.0, %v6492_v52 }
 0x5a0   : > { %6501 = verf.f32 %v4398_v51  ;;  %v6494_v22 = vpop.eup %6493  ;;  %v4336_v45 = vmul.f32 0.5, %v4186_v29 }
 0x5a1   : > { %6503 = verf.f32 %v4400_v16  ;;  %v4401_v11 = vmul.f32 0.70710677, %v4188_v63  ;;  %v4523_v57 = vadd.f32 1.0, %v6494_v22  ;;  %v4586_v13 = vmul.f32 %v4522_v15, %v4330_v26 }
 0x5a2   : > { %v6496_v34 = vpop.eup %6495  ;;  %v4337_v52 = vmul.f32 0.5, %v4188_v63 }
 0x5a3   : > { %6505 = verf.f32 %v4401_v11  ;;  %v4524_v50 = vadd.f32 1.0, %v6496_v34  ;;  %v4587_v24 = vmul.f32 %v4523_v57, %v4331_v23  ;;  %v4335_v11 = vmul.f32 0.5, %v4184_v20 }
 0x5a4   : > { %v6498_v28 = vpop.eup %6497 }
 0x5a5   : > { %v4525_v56 = vadd.f32 1.0, %v6498_v28  ;;  %v4588_v59 = vmul.f32 %v4524_v50, %v4332_v5  ;;  %v4334_v50 = vmul.f32 0.5, %v4182_v54 }
 0x5a6   : > { %v4191_v61 = vpop.f32.mrf.mxu0 }
 0x5a7   : > { %v4589_v60 = vmul.f32 %v4525_v56, %v4333_v37  ;;  %v9432_v43 = vadd.f32 %v4191_v61, %v9409_v21  ;;  %v4650_v58 = vpack.c.bf16 %v4588_v59, %v4586_v13 }
 0x5a8   : > { %v4193_v31 = vpop.f32.mrf.mxu0 }
 0x5a9   : > { %v4402_v25 = vmul.f32 0.70710677, %v9432_v43  ;;  %v4194_v39 = vadd.f32 %v4193_v31, %v9412_v44  ;;  %v4651_v3 = vpack.c.bf16 %v4589_v60, %v4587_v24 }
 0x5aa   : > { %v4195_v33 = vpop.f32.mrf.mxu0 }
 0x5ab   : > { %v4403_v53 = vmul.f32 0.70710677, %v4194_v39  ;;  %v4196_v48 = vadd.f32 %v4195_v33, %v9409_v21  ;;  %4849 = vmatprep.mubr.bf16.mxu1 %v4651_v3  ;;  %6507 = verf.f32 %v4402_v25 }
 0x5ac   : > { %v6500_v17 = vpop.eup %6499  ;;  %v4197_v42 = vpop.f32.mrf.mxu0  ;;  %4850 = vmatmul.mubr.bf16.vlgmr.msra.gmra.mxu1 %v4650_v58 }
 0x5ad   : > { %v6502_v14 = vpop.eup %6501  ;;  %v4527_v7 = vadd.f32 1.0, %v6500_v17  ;;  %v4198_v51 = vadd.f32 %v4197_v42, %v9412_v44  ;;  %6509 = verf.f32 %v4403_v53  ;;  %v4404_v16 = vmul.f32 0.70710677, %v4196_v48 }
 0x5ae   : > { %v6504_v32 = vpop.eup %6503  ;;  %v4526_v10 = vadd.f32 1.0, %v6502_v14  ;;  %v4340_v53 = vmul.f32 0.5, %v4196_v48 }
 0x5af   : > { %v4528_v55 = vadd.f32 1.0, %v6504_v32  ;;  %v4405_v34 = vmul.f32 0.70710677, %v4198_v51  ;;  %6511 = verf.f32 %v4404_v16  ;;  %v4591_v15 = vmul.f32 %v4527_v7, %v4335_v11 }
 0x5b0   : > { %v6506_v49 = vpop.eup %6505  ;;  %v4590_v56 = vmul.f32 %v4526_v10, %v4334_v50  ;;  %v4338_v16 = vmul.f32 0.5, %v9432_v43 }
 0x5b1   : > { %v4529_v22 = vadd.f32 1.0, %v6506_v49  ;;  %v4592_v28 = vmul.f32 %v4528_v55, %v4336_v45  ;;  %v4201_v57 = vpop.f32.mrf.mxu0  ;;  %6513 = verf.f32 %v4405_v34  ;;  %v4339_v55 = vmul.f32 0.5, %v4194_v39 }
 0x5b2   : > { %v9439_v37 = vadd.f32 %v4201_v57, %v9409_v21  ;;  %v4341_v49 = vmul.f32 0.5, %v4198_v51 }
 0x5b3   : > { %v4593_v5 = vmul.f32 %v4529_v22, %v4337_v52  ;;  %v4203_v23 = vpop.f32.mrf.mxu0  ;;  %v4652_v26 = vpack.c.bf16 %v4592_v28, %v4590_v56 }
 0x5b4   : > { %v9442_v29 = vadd.f32 %v4203_v23, %v9412_v44  ;;  %v4406_v20 = vmul.f32 0.70710677, %v9439_v37 }
 0x5b5   : > { %v4653_v61 = vpack.c.bf16 %v4593_v5, %v4591_v15  ;;  %v4205_v63 = vpop.f32.mrf.mxu0 }
 0x5b6   : > { %v4407_v54 = vmul.f32 0.70710677, %v9442_v29  ;;  %v4206_v59 = vadd.f32 %v4205_v63, %v9409_v21 }
 0x5b7   : > { %4857 = vmatprep.mubr.bf16.mxu1 %v4653_v61  ;;  %v4207_v60 = vpop.f32.mrf.mxu0 }
 0x5b8   : > { %4858 = vmatmul.mubr.bf16.gmra.mxu1 %v4652_v26  ;;  %6515 = verf.f32 %v4407_v54  ;;  %v4408_v24 = vmul.f32 0.70710677, %v4206_v59  ;;  %v4208_v31 = vadd.f32 %v4207_v60, %v9412_v44  ;;  %v6508_v25 = vpop.eup %6507 }
 0x5b9   : > { %6517 = verf.f32 %v4406_v20  ;;  %v4530_v32 = vadd.f32 1.0, %v6508_v25 }
 0x5ba   : > { %6519 = verf.f32 %v4408_v24  ;;  %v4409_v13 = vmul.f32 0.70710677, %v4208_v31  ;;  %v6510_v17 = vpop.eup %6509 }
 0x5bb   : > { %v4531_v3 = vadd.f32 1.0, %v6510_v17  ;;  %v4594_v48 = vmul.f32 %v4530_v32, %v4338_v16 }
 0x5bc   : > { %6521 = verf.f32 %v4409_v13  ;;  %v6512_v33 = vpop.eup %6511 }
 0x5bd   : > { %v4532_v42 = vadd.f32 1.0, %v6512_v33  ;;  %v4595_v22 = vmul.f32 %v4531_v3, %v4339_v55  ;;  %v4344_v33 = vmul.f32 0.5, %v4206_v59  ;;  %v4342_v55 = vmul.f32 0.5, %v9439_v37 }
 0x5be   : > { %v6514_v58 = vpop.eup %6513 }
 0x5bf   : > { %v4211_v14 = vpop.f32.mrf.mxu0  ;;  %v4533_v10 = vadd.f32 1.0, %v6514_v58  ;;  %v4596_v11 = vmul.f32 %v4532_v42, %v4340_v53  ;;  %v4345_v58 = vmul.f32 0.5, %v4208_v31 }
 0x5c0   : > { %v9449_v7 = vadd.f32 %v4211_v14, %v9409_v21  ;;  %v4343_v14 = vmul.f32 0.5, %v9442_v29 }
 0x5c1   : > { %v4213_v45 = vpop.f32.mrf.mxu0  ;;  %v4597_v34 = vmul.f32 %v4533_v10, %v4341_v49  ;;  %v4654_v23 = vpack.c.bf16 %v4596_v11, %v4594_v48 }
 0x5c2   : > { %v9453_v52 = vadd.f32 %v4213_v45, %v9412_v44  ;;  %v4410_v50 = vmul.f32 0.70710677, %v9449_v7 }
 0x5c3   : > { %v4215_v28 = vpop.f32.mrf.mxu0  ;;  %v4655_v51 = vpack.c.bf16 %v4597_v34, %v4595_v22 }
 0x5c4   : > { %v4411_v57 = vmul.f32 0.70710677, %v9453_v52  ;;  %v9458_v15 = vadd.f32 %v4215_v28, %v9409_v21 }
 0x5c5   : > { %v4217_v39 = vpop.f32.mrf.mxu0  ;;  %v6516_v5 = vpop.eup %6515  ;;  %4865 = vmatprep.mubr.bf16.mxu1 %v4655_v51 }
 0x5c6   : > { %6523 = verf.f32 %v4411_v57  ;;  %v4412_v43 = vmul.f32 0.70710677, %v9458_v15  ;;  %v9462_v56 = vadd.f32 %v4217_v39, %v9412_v44  ;;  %v6518_v61 = vpop.eup %6517  ;;  %4866 = vmatmul.mubr.bf16.gmra.mxu1 %v4654_v23  ;;  %v4535_v60 = vadd.f32 1.0, %v6516_v5 }
 0x5c7   : > { %6525 = verf.f32 %v4410_v50  ;;  %v4221_v20 = vpop.f32.mrf.mxu0  ;;  %v6520_v63 = vpop.eup %6519  ;;  %v4534_v17 = vadd.f32 1.0, %v6518_v61 }
 0x5c8   : > { %6527 = verf.f32 %v4412_v43  ;;  %v4413_v26 = vmul.f32 0.70710677, %v9462_v56  ;;  %v9466_v54 = vadd.f32 %v4221_v20, %v9409_v21  ;;  %v4536_v24 = vadd.f32 1.0, %v6520_v63 }
 0x5c9   : > { %v4223_v13 = vpop.f32.mrf.mxu0  ;;  %v6522_v25 = vpop.eup %6521  ;;  %v4599_v59 = vmul.f32 %v4535_v60, %v4343_v14  ;;  %v4598_v22 = vmul.f32 %v4534_v17, %v4342_v55  ;;  %v4347_v63 = vmul.f32 0.5, %v9453_v52  ;;  %v4348_v14 = vmul.f32 0.5, %v9458_v15 }
 0x5ca   : > { %6529 = verf.f32 %v4413_v26  ;;  %v9469_v3 = vadd.f32 %v4223_v13, %v9412_v44  ;;  %v4537_v32 = vadd.f32 1.0, %v6522_v25  ;;  %v4414_v53 = vmul.f32 0.70710677, %v9466_v54 }
 0x5cb   : > { %v4225_v42 = vpop.f32.mrf.mxu0  ;;  %v4600_v49 = vmul.f32 %v4536_v24, %v4344_v33  ;;  %v4346_v55 = vmul.f32 0.5, %v9449_v7 }
 0x5cc   : > { %v4415_v10 = vmul.f32 0.70710677, %v9469_v3  ;;  %v9476_v45 = vadd.f32 %v4225_v42, %v9409_v21  ;;  %v4601_v16 = vmul.f32 %v4537_v32, %v4345_v58 }
 0x5cd   : > { %v4227_v11 = vpop.f32.mrf.mxu0  ;;  %v4656_v48 = vpack.c.bf16 %v4600_v49, %v4598_v22 }
 0x5ce   : > { %6531 = verf.f32 %v4415_v10  ;;  %v4416_v29 = vmul.f32 0.70710677, %v9476_v45  ;;  %v9480_v31 = vadd.f32 %v4227_v11, %v9412_v44  ;;  %v4657_v50 = vpack.c.bf16 %v4601_v16, %v4599_v59 }
 0x5cf   : > { %6533 = verf.f32 %v4414_v53  ;;  %v4349_v53 = vmul.f32 0.5, %v9462_v56 }
 0x5d0   : > { %v4231_v34 = vpop.f32.mrf.mxu0  ;;  %6535 = verf.f32 %v4416_v29  ;;  %v4417_v37 = vmul.f32 0.70710677, %v9480_v31  ;;  %4873 = vmatprep.mubr.bf16.mxu1 %v4657_v50 }
 0x5d1   : > { %v9484_v28 = vadd.f32 %v4231_v34, %v9409_v21  ;;  %4874 = vmatmul.mubr.bf16.gmra.mxu1 %v4656_v48 }
 0x5d2   : > { %v4233_v57 = vpop.f32.mrf.mxu0  ;;  %6537 = verf.f32 %v4417_v37 }
 0x5d3   : > { %v4418_v39 = vmul.f32 0.70710677, %v9484_v28  ;;  %v6524_v51 = vpop.eup %6523  ;;  %v9488_v5 = vadd.f32 %v4233_v57, %v9412_v44 }
 0x5d4   : > { %v4235_v43 = vpop.f32.mrf.mxu0  ;;  %v6526_v23 = vpop.eup %6525  ;;  %v4539_v24 = vadd.f32 1.0, %v6524_v51 }
 0x5d5   : > { %v9491_v61 = vadd.f32 %v4235_v43, %v9409_v21  ;;  %v6528_v20 = vpop.eup %6527  ;;  %v4419_v26 = vmul.f32 0.70710677, %v9488_v5  ;;  %6539 = verf.f32 %v4418_v39  ;;  %v4538_v33 = vadd.f32 1.0, %v6526_v23 }
 0x5d6   : > { %v4237_v60 = vpop.f32.mrf.mxu0  ;;  %v4540_v13 = vadd.f32 1.0, %v6528_v20  ;;  %v4603_v16 = vmul.f32 %v4539_v24, %v4347_v63  ;;  %v4351_v39 = vmul.f32 0.5, %v9469_v3  ;;  %v4352_v24 = vmul.f32 0.5, %v9476_v45 }
 0x5d7   : > { %v4420_v25 = vmul.f32 0.70710677, %v9491_v61  ;;  %v6530_v17 = vpop.eup %6529  ;;  %6541 = verf.f32 %v4419_v26  ;;  %v9498_v58 = vadd.f32 %v4237_v60, %v9412_v44  ;;  %v4602_v22 = vmul.f32 %v4538_v33, %v4346_v55 }
 0x5d8   : > { %v4241_v32 = vpop.f32.mrf.mxu0  ;;  %v4541_v52 = vadd.f32 1.0, %v6530_v17  ;;  %v4604_v49 = vmul.f32 %v4540_v13, %v4348_v14  ;;  %v4353_v3 = vmul.f32 0.5, %v9480_v31  ;;  %v4350_v14 = vmul.f32 0.5, %v9466_v54 }
 0x5d9   : > { %6543 = verf.f32 %v4420_v25  ;;  %v9502_v42 = vadd.f32 %v4241_v32, %v9409_v21  ;;  %v4421_v10 = vmul.f32 0.70710677, %v9498_v58 }
 0x5da   : > { %v4243_v59 = vpop.f32.mrf.mxu0  ;;  %v4605_v15 = vmul.f32 %v4541_v52, %v4349_v53  ;;  %v4658_v57 = vpack.c.bf16 %v4604_v49, %v4602_v22 }
 0x5db   : > { %v6532_v11 = vpop.eup %6531  ;;  %6545 = verf.f32 %v4421_v10  ;;  %v4422_v29 = vmul.f32 0.70710677, %v9502_v42  ;;  %v9508_v56 = vadd.f32 %v4243_v59, %v9412_v44 }
 0x5dc   : > { %v4245_v34 = vpop.f32.mrf.mxu0  ;;  %v6534_v50 = vpop.eup %6533  ;;  %v4659_v7 = vpack.c.bf16 %v4605_v15, %v4603_v16  ;;  %v4543_v23 = vadd.f32 1.0, %v6532_v11 }
 0x5dd   : > { %v9511_v37 = vadd.f32 %v4245_v34, %v9409_v21  ;;  %v6536_v48 = vpop.eup %6535  ;;  %v4423_v51 = vmul.f32 0.70710677, %v9508_v56  ;;  %6547 = verf.f32 %v4422_v29  ;;  %v4542_v60 = vadd.f32 1.0, %v6534_v50 }
 0x5de   : > { %v4247_v43 = vpop.f32.mrf.mxu0  ;;  %v4544_v20 = vadd.f32 1.0, %v6536_v48  ;;  %4881 = vmatprep.mubr.bf16.mxu1 %v4659_v7  ;;  %v4607_v45 = vmul.f32 %v4543_v23, %v4351_v39 }
 0x5df   : > { %v4424_v63 = vmul.f32 0.70710677, %v9511_v37  ;;  %v6538_v26 = vpop.eup %6537  ;;  %6549 = verf.f32 %v4423_v51  ;;  %v9518_v13 = vadd.f32 %v4247_v43, %v9412_v44  ;;  %4882 = vmatmul.mubr.bf16.gmra.mxu1 %v4658_v57  ;;  %v4606_v10 = vmul.f32 %v4542_v60, %v4350_v14 }
 0x5e0   : > { %v4251_v25 = vpop.f32.mrf.mxu0  ;;  %v4545_v17 = vadd.f32 1.0, %v6538_v26  ;;  %v4608_v32 = vmul.f32 %v4544_v20, %v4352_v24  ;;  %v4356_v20 = vmul.f32 0.5, %v9491_v61  ;;  %v4355_v26 = vmul.f32 0.5, %v9488_v5 }
 0x5e1   : > { %6551 = verf.f32 %v4424_v63  ;;  %v9522_v33 = vadd.f32 %v4251_v25, %v9409_v21  ;;  %v4425_v53 = vmul.f32 0.70710677, %v9518_v13  ;;  %v4357_v60 = vmul.f32 0.5, %v9498_v58 }
 0x5e2   : > { %v4253_v52 = vpop.f32.mrf.mxu0  ;;  %v4609_v55 = vmul.f32 %v4545_v17, %v4353_v3  ;;  %v6540_v49 = vpop.eup %6539  ;;  %v4660_v29 = vpack.c.bf16 %v4608_v32, %v4606_v10  ;;  %v4354_v17 = vmul.f32 0.5, %v9484_v28 }
 0x5e3   : > { %6553 = verf.f32 %v4425_v53  ;;  %v4426_v59 = vmul.f32 0.70710677, %v9522_v33  ;;  %v9528_v31 = vadd.f32 %v4253_v52, %v9412_v44  ;;  %v4546_v23 = vadd.f32 1.0, %v6540_v49 }
 0x5e4   : > { %v4255_v16 = vpop.f32.mrf.mxu0  ;;  %v6542_v15 = vpop.eup %6541  ;;  %v4661_v54 = vpack.c.bf16 %v4609_v55, %v4607_v45 }
 0x5e5   : > { %v9531_v11 = vadd.f32 %v4255_v16, %v9409_v21  ;;  %v4427_v34 = vmul.f32 0.70710677, %v9528_v31  ;;  %6555 = verf.f32 %v4426_v59  ;;  %v4547_v39 = vadd.f32 1.0, %v6542_v15 }
 0x5e6   : > { %v6544_v22 = vpop.eup %6543  ;;  %v4257_v50 = vpop.f32.mrf.mxu0  ;;  %4889 = vmatprep.mubr.bf16.mxu1 %v4661_v54  ;;  %v4610_v58 = vmul.f32 %v4546_v23, %v4354_v17 }
 0x5e7   : > { %v4548_v7 = vadd.f32 1.0, %v6544_v22  ;;  %v4428_v48 = vmul.f32 0.70710677, %v9531_v11  ;;  %v9536_v57 = vadd.f32 %v4257_v50, %v9412_v44  ;;  %6557 = verf.f32 %v4427_v34  ;;  %4890 = vmatmul.mubr.bf16.gmra.mxu1 %v4660_v29 }
 0x5e8   : > { %v4261_v51 = vpop.f32.mrf.mxu0  ;;  %v6546_v43 = vpop.eup %6545  ;;  %v4611_v53 = vmul.f32 %v4547_v39, %v4355_v26  ;;  %v4359_v39 = vmul.f32 0.5, %v9508_v56  ;;  %v4363_v56 = vmul.f32 0.5, %v9528_v31 }
 0x5e9   : > { %6559 = verf.f32 %v4428_v48  ;;  %v4429_v63 = vmul.f32 0.70710677, %v9536_v57  ;;  %v4549_v24 = vadd.f32 1.0, %v6546_v43  ;;  %v9543_v25 = vadd.f32 %v4261_v51, %v9409_v21 }
 0x5ea   : > { %v4263_v3 = vpop.f32.mrf.mxu0  ;;  %v4612_v14 = vmul.f32 %v4548_v7, %v4356_v20  ;;  %v6548_v61 = vpop.eup %6547  ;;  %v4360_v48 = vmul.f32 0.5, %v9511_v37  ;;  %v4361_v51 = vmul.f32 0.5, %v9518_v13  ;;  %v4358_v20 = vmul.f32 0.5, %v9502_v42 }
 0x5eb   : > { %6561 = verf.f32 %v4429_v63  ;;  %v9547_v32 = vadd.f32 %v4263_v3, %v9412_v44  ;;  %v4613_v52 = vmul.f32 %v4549_v24, %v4357_v60  ;;  %v4430_v45 = vmul.f32 0.70710677, %v9543_v25 }
 0x5ec   : > { %v4265_v5 = vpop.f32.mrf.mxu0  ;;  %v6550_v55 = vpop.eup %6549  ;;  %v4662_v15 = vpack.c.bf16 %v4612_v14, %v4610_v58  ;;  %v4550_v7 = vadd.f32 1.0, %v6548_v61  ;;  %v4365_v42 = vmul.f32 0.5, %v9536_v57  ;;  %v4362_v58 = vmul.f32 0.5, %v9522_v33 }
 0x5ed   : > { %v4431_v49 = vmul.f32 0.70710677, %v9547_v32  ;;  %v4266_v10 = vadd.f32 %v4265_v5, %v9409_v21  ;;  %v4663_v28 = vpack.c.bf16 %v4613_v52, %v4611_v53  ;;  %6563 = verf.f32 %v4430_v45 }
 0x5ee   : > { %v6552_v59 = vpop.eup %6551  ;;  %v4267_v16 = vpop.f32.mrf.mxu0  ;;  %v4551_v29 = vadd.f32 1.0, %v6550_v55  ;;  %v4614_v17 = vmul.f32 %v4550_v7, %v4358_v20  ;;  %v4364_v5 = vmul.f32 0.5, %v9531_v11  ;;  %v4367_v57 = vmul.f32 0.5, %v9547_v32 }
 0x5ef   : > { %v4552_v54 = vadd.f32 1.0, %v6552_v59  ;;  %v4432_v22 = vmul.f32 0.70710677, %v4266_v10  ;;  %6565 = verf.f32 %v4431_v49  ;;  %v4268_v34 = vadd.f32 %v4267_v16, %v9412_v44  ;;  %4897 = vmatprep.mubr.bf16.mxu1 %v4663_v28 }
 0x5f0   : > { %v6554_v50 = vpop.eup %6553  ;;  %4898 = vmatmul.mubr.bf16.gmra.mxu1 %v4662_v15  ;;  %v4615_v60 = vmul.f32 %v4551_v29, %v4359_v39  ;;  %v4368_v39 = vmul.f32 0.5, %v4266_v10 }
 0x5f1   : > { %6567 = verf.f32 %v4432_v22  ;;  %v4553_v43 = vadd.f32 1.0, %v6554_v50  ;;  %v4433_v23 = vmul.f32 0.70710677, %v4268_v34  ;;  %v4616_v63 = vmul.f32 %v4552_v54, %v4360_v48 }
 0x5f2   : > { %v6556_v26 = vpop.eup %6555 }
 0x5f3   : > { %v4617_v24 = vmul.f32 %v4553_v43, %v4361_v51  ;;  %6569 = verf.f32 %v4433_v23  ;;  %v4664_v37 = vpack.c.bf16 %v4616_v63, %v4614_v17  ;;  %v4554_v13 = vadd.f32 1.0, %v6556_v26 }
 0x5f4   : > { %v6558_v3 = vpop.eup %6557  ;;  %v4369_v51 = vmul.f32 0.5, %v4268_v34  ;;  %v4366_v43 = vmul.f32 0.5, %v9543_v25 }
 0x5f5   : > { %v4665_v61 = vpack.c.bf16 %v4617_v24, %v4615_v60  ;;  %v4555_v53 = vadd.f32 1.0, %v6558_v3  ;;  %v4618_v54 = vmul.f32 %v4554_v13, %v4362_v58 }
 0x5f6   : > { %v6560_v14 = vpop.eup %6559 }
 0x5f7   : > { %v4556_v52 = vadd.f32 1.0, %v6560_v14  ;;  %4905 = vmatprep.mubr.bf16.mxu1 %v4665_v61  ;;  %v4619_v49 = vmul.f32 %v4555_v53, %v4363_v56 }
 0x5f8   : > { %v6562_v45 = vpop.eup %6561  ;;  %4906 = vmatmul.mubr.bf16.gmra.mxu1 %v4664_v37 }
 0x5f9   : > { %v4557_v55 = vadd.f32 1.0, %v6562_v45  ;;  %v4620_v59 = vmul.f32 %v4556_v52, %v4364_v5 }
 0x5fa   : > { %v6564_v28 = vpop.eup %6563 }
 0x5fb   : > { %v4621_v16 = vmul.f32 %v4557_v55, %v4365_v42  ;;  %v4666_v50 = vpack.c.bf16 %v4620_v59, %v4618_v54  ;;  %v4558_v11 = vadd.f32 1.0, %v6564_v28 }
 0x5fc   : > { %v6566_v15 = vpop.eup %6565 }
 0x5fd   : > { %v4667_v22 = vpack.c.bf16 %v4621_v16, %v4619_v49  ;;  %v4559_v7 = vadd.f32 1.0, %v6566_v15  ;;  %v4622_v26 = vmul.f32 %v4558_v11, %v4366_v43 }
 0x5fe   : > { %v6568_v29 = vpop.eup %6567 }
 0x5ff   : > { %v4560_v31 = vadd.f32 1.0, %v6568_v29  ;;  %4913 = vmatprep.mubr.bf16.mxu1 %v4667_v22  ;;  %v4623_v20 = vmul.f32 %v4559_v7, %v4367_v57 }
 0x600   : > { %v6570_v48 = vpop.eup %6569  ;;  %4914 = vmatmul.mubr.bf16.gmra.mxu1 %v4666_v50 }
 0x601   : > { %v4561_v33 = vadd.f32 1.0, %v6570_v48  ;;  %v4624_v23 = vmul.f32 %v4560_v31, %v4368_v39 }
 0x603   : > { %v4625_v63 = vmul.f32 %v4561_v33, %v4369_v51  ;;  %v4668_v24 = vpack.c.bf16 %v4624_v23, %v4622_v26 }
 0x605   : > { %v4669_v60 = vpack.c.bf16 %v4625_v63, %v4623_v20 }
 0x607   : > { %4921 = vmatprep.mubr.bf16.mxu1 %v4669_v60 }
 0x608   : > { %4922 = vmatmul.mubr.bf16.gmra.mxu1 %v4668_v24 }
 0x620   : > { %v4271_v3 = vpop.f32.mrf.mxu0 }
 0x621   : > { %v4272_v17 = vadd.f32 %v4271_v3, %v9409_v21 }
 0x622   : > { %v4273_v14 = vpop.f32.mrf.mxu0 }
 0x623   : > { %v4434_v10 = vmul.f32 0.70710677, %v4272_v17  ;;  %v4274_v61 = vadd.f32 %v4273_v14, %v9412_v44  ;;  %v4370_v23 = vmul.f32 0.5, %v4272_v17 }
 0x624   : > { %v4275_v32 = vpop.f32.mrf.mxu0 }
 0x625   : > { %v4435_v34 = vmul.f32 0.70710677, %v4274_v61  ;;  %v4276_v37 = vadd.f32 %v4275_v32, %v9409_v21  ;;  %6571 = verf.f32 %v4434_v10  ;;  %v4371_v33 = vmul.f32 0.5, %v4274_v61 }
 0x626   : > { %v4277_v25 = vpop.f32.mrf.mxu0 }
 0x627   : > { %v4436_v53 = vmul.f32 0.70710677, %v4276_v37  ;;  %v4278_v52 = vadd.f32 %v4277_v25, %v9412_v44  ;;  %6573 = verf.f32 %v4435_v34  ;;  %v4372_v39 = vmul.f32 0.5, %v4276_v37 }
 0x629   : > { %6575 = verf.f32 %v4436_v53  ;;  %v4437_v45 = vmul.f32 0.70710677, %v4278_v52  ;;  %v4373_v57 = vmul.f32 0.5, %v4278_v52 }
 0x62b   : > { %6577 = verf.f32 %v4437_v45 }
 0x62c   : > { %v4281_v56 = vpop.f32.mrf.mxu0 }
 0x62d   : > { %v4282_v13 = vadd.f32 %v4281_v56, %v9409_v21 }
 0x62e   : > { %v4283_v5 = vpop.f32.mrf.mxu0 }
 0x62f   : > { %v4284_v42 = vadd.f32 %v4283_v5, %v9412_v44  ;;  %v4438_v55 = vmul.f32 0.70710677, %v4282_v13 }
 0x630   : > { %v4285_v58 = vpop.f32.mrf.mxu0 }
 0x631   : > { %v4439_v49 = vmul.f32 0.70710677, %v4284_v42  ;;  %v4286_v59 = vadd.f32 %v4285_v58, %v9409_v21 }
 0x632   : > { %v4287_v16 = vpop.f32.mrf.mxu0  ;;  %v6572_v22 = vpop.eup %6571 }
 0x633   : > { %6579 = verf.f32 %v4439_v49  ;;  %v4440_v28 = vmul.f32 0.70710677, %v4286_v59  ;;  %v4288_v15 = vadd.f32 %v4287_v16, %v9412_v44  ;;  %v4562_v11 = vadd.f32 1.0, %v6572_v22 }
 0x634   : > { %6581 = verf.f32 %v4438_v55  ;;  %v6574_v29 = vpop.eup %6573  ;;  %v4376_v16 = vmul.f32 0.5, %v4286_v59 }
 0x635   : > { %6583 = verf.f32 %v4440_v28  ;;  %v4441_v54 = vmul.f32 0.70710677, %v4288_v15  ;;  %v4563_v48 = vadd.f32 1.0, %v6574_v29  ;;  %v4626_v3 = vmul.f32 %v4562_v11, %v4370_v23 }
 0x636   : > { %v6576_v50 = vpop.eup %6575  ;;  %v4377_v22 = vmul.f32 0.5, %v4288_v15 }
 0x637   : > { %6585 = verf.f32 %v4441_v54  ;;  %v4564_v31 = vadd.f32 1.0, %v6576_v50  ;;  %v4627_v60 = vmul.f32 %v4563_v48, %v4371_v33  ;;  %v4375_v54 = vmul.f32 0.5, %v4284_v42 }
 0x638   : > { %v6578_v7 = vpop.eup %6577 }
 0x639   : > { %v4565_v51 = vadd.f32 1.0, %v6578_v7  ;;  %v4628_v20 = vmul.f32 %v4564_v31, %v4372_v39  ;;  %v4374_v7 = vmul.f32 0.5, %v4282_v13 }
 0x63a   : > { %v4291_v43 = vpop.f32.mrf.mxu0 }
 0x63b   : > { %v4629_v63 = vmul.f32 %v4565_v51, %v4373_v57  ;;  %v9572_v26 = vadd.f32 %v4291_v43, %v9409_v21  ;;  %v4670_v53 = vpack.c.bf16 %v4628_v20, %v4626_v3 }
 0x63c   : > { %v4293_v24 = vpop.f32.mrf.mxu0 }
 0x63d   : > { %v4442_v14 = vmul.f32 0.70710677, %v9572_v26  ;;  %v4294_v10 = vadd.f32 %v4293_v24, %v9412_v44  ;;  %v4671_v37 = vpack.c.bf16 %v4629_v63, %v4627_v60 }
 0x63e   : > { %v4295_v34 = vpop.f32.mrf.mxu0 }
 0x63f   : > { %v4443_v52 = vmul.f32 0.70710677, %v4294_v10  ;;  %v4296_v17 = vadd.f32 %v4295_v34, %v9409_v21  ;;  %4929 = vmatprep.mubr.bf16.mxu1 %v4671_v37  ;;  %6587 = verf.f32 %v4442_v14 }
 0x640   : > { %v6580_v32 = vpop.eup %6579  ;;  %v4297_v45 = vpop.f32.mrf.mxu0  ;;  %4930 = vmatmul.mubr.bf16.gmra.mxu1 %v4670_v53 }
 0x641   : > { %v6582_v25 = vpop.eup %6581  ;;  %v4567_v56 = vadd.f32 1.0, %v6580_v32  ;;  %v4298_v55 = vadd.f32 %v4297_v45, %v9412_v44  ;;  %6589 = verf.f32 %v4443_v52  ;;  %v4444_v28 = vmul.f32 0.70710677, %v4296_v17 }
 0x642   : > { %v6584_v61 = vpop.eup %6583  ;;  %v4566_v49 = vadd.f32 1.0, %v6582_v25  ;;  %v4380_v52 = vmul.f32 0.5, %v4296_v17 }
 0x643   : > { %v4568_v5 = vadd.f32 1.0, %v6584_v61  ;;  %v4445_v50 = vmul.f32 0.70710677, %v4298_v55  ;;  %6591 = verf.f32 %v4444_v28  ;;  %v4631_v39 = vmul.f32 %v4567_v56, %v4375_v54 }
 0x644   : > { %v6586_v58 = vpop.eup %6585  ;;  %v4630_v33 = vmul.f32 %v4566_v49, %v4374_v7  ;;  %v4378_v28 = vmul.f32 0.5, %v9572_v26 }
 0x645   : > { %v4569_v29 = vadd.f32 1.0, %v6586_v58  ;;  %v4301_v31 = vpop.f32.mrf.mxu0  ;;  %v4632_v48 = vmul.f32 %v4568_v5, %v4376_v16  ;;  %6593 = verf.f32 %v4445_v50  ;;  %v4379_v5 = vmul.f32 0.5, %v4294_v10 }
 0x646   : > { %v9579_v11 = vadd.f32 %v4301_v31, %v9409_v21  ;;  %v4381_v58 = vmul.f32 0.5, %v4298_v55 }
 0x647   : > { %v4633_v57 = vmul.f32 %v4569_v29, %v4377_v22  ;;  %v4303_v51 = vpop.f32.mrf.mxu0  ;;  %v4672_v23 = vpack.c.bf16 %v4632_v48, %v4630_v33 }
 0x648   : > { %v4304_v59 = vadd.f32 %v4303_v51, %v9412_v44  ;;  %v4446_v43 = vmul.f32 0.70710677, %v9579_v11 }
 0x649   : > { %v4305_v42 = vpop.f32.mrf.mxu0  ;;  %v4673_v15 = vpack.c.bf16 %v4633_v57, %v4631_v39 }
 0x64a   : > { %v4447_v20 = vmul.f32 0.70710677, %v4304_v59  ;;  %v4306_v13 = vadd.f32 %v4305_v42, %v9409_v21 }
 0x64b   : > { %v4307_v63 = vpop.f32.mrf.mxu0  ;;  %4937 = vmatprep.mubr.bf16.mxu1 %v4673_v15 }
 0x64c   : > { %6595 = verf.f32 %v4447_v20  ;;  %v4448_v60 = vmul.f32 0.70710677, %v4306_v13  ;;  %v4308_v24 = vadd.f32 %v4307_v63, %v9412_v44  ;;  %4938 = vmatmul.mubr.bf16.gmra.mxu1 %v4672_v23  ;;  %v6588_v14 = vpop.eup %6587  ;;  %v4383_v23 = vmul.f32 0.5, %v4304_v59 }
 0x64d   : > { %6597 = verf.f32 %v4446_v43  ;;  %v4570_v61 = vadd.f32 1.0, %v6588_v14 }
 0x64e   : > { %6599 = verf.f32 %v4448_v60  ;;  %v4449_v3 = vmul.f32 0.70710677, %v4308_v24  ;;  %v6590_v32 = vpop.eup %6589 }
 0x64f   : > { %v4571_v37 = vadd.f32 1.0, %v6590_v32  ;;  %v4634_v48 = vmul.f32 %v4570_v61, %v4378_v28  ;;  %v4384_v32 = vmul.f32 0.5, %v4306_v13 }
 0x650   : > { %6601 = verf.f32 %v4449_v3  ;;  %v6592_v34 = vpop.eup %6591 }
 0x651   : > { %v4572_v45 = vadd.f32 1.0, %v6592_v34  ;;  %v4635_v50 = vmul.f32 %v4571_v37, %v4379_v5 }
 0x652   : > { %v6594_v53 = vpop.eup %6593 }
 0x653   : > { %v4311_v25 = vpop.f32.mrf.mxu0  ;;  %v4573_v49 = vadd.f32 1.0, %v6594_v53  ;;  %v4636_v54 = vmul.f32 %v4572_v45, %v4380_v52  ;;  %v4382_v52 = vmul.f32 0.5, %v9579_v11 }
 0x654   : > { %v9586_v56 = vadd.f32 %v4311_v25, %v9409_v21  ;;  %v4385_v25 = vmul.f32 0.5, %v4308_v24 }
 0x655   : > { %v4313_v16 = vpop.f32.mrf.mxu0  ;;  %v4637_v31 = vmul.f32 %v4573_v49, %v4381_v58  ;;  %v4674_v33 = vpack.c.bf16 %v4636_v54, %v4634_v48 }
 0x656   : > { %v4450_v22 = vmul.f32 0.70710677, %v9586_v56  ;;  %v4314_v29 = vadd.f32 %v4313_v16, %v9412_v44 }
 0x657   : > { %v4315_v7 = vpop.f32.mrf.mxu0  ;;  %v4675_v10 = vpack.c.bf16 %v4637_v31, %v4635_v50 }
 0x658   : > { %v4451_v39 = vmul.f32 0.70710677, %v4314_v29  ;;  %v4316_v57 = vadd.f32 %v4315_v7, %v9409_v21  ;;  %6603 = verf.f32 %v4450_v22 }
 0x659   : > { %v6596_v17 = vpop.eup %6595  ;;  %v4317_v51 = vpop.f32.mrf.mxu0  ;;  %4945 = vmatprep.mubr.bf16.mxu1 %v4675_v10 }
 0x65a   : > { %v6598_v55 = vpop.eup %6597  ;;  %v4318_v26 = vadd.f32 %v4317_v51, %v9412_v44  ;;  %6605 = verf.f32 %v4451_v39  ;;  %v4452_v42 = vmul.f32 0.70710677, %v4316_v57  ;;  %v4575_v20 = vadd.f32 1.0, %v6596_v17  ;;  %4946 = vmatmul.mubr.bf16.gmra.mxu1 %v4674_v33 }
 0x65b   : > { %v6600_v43 = vpop.eup %6599  ;;  %v4321_v15 = vpop.f32.mrf.mxu0  ;;  %v4574_v14 = vadd.f32 1.0, %v6598_v55  ;;  %v4387_v33 = vmul.f32 0.5, %v4314_v29 }
 0x65c   : > { %v4576_v63 = vadd.f32 1.0, %v6600_v43  ;;  %v4453_v60 = vmul.f32 0.70710677, %v4318_v26  ;;  %6607 = verf.f32 %v4452_v42  ;;  %v9594_v34 = vadd.f32 %v4321_v15, %v9409_v21 }
 0x65d   : > { %v6602_v3 = vpop.eup %6601  ;;  %v4323_v37 = vpop.f32.mrf.mxu0  ;;  %v4639_v58 = vmul.f32 %v4575_v20, %v4383_v23  ;;  %v4638_v13 = vmul.f32 %v4574_v14, %v4382_v52  ;;  %v4389_v43 = vmul.f32 0.5, %v4318_v26  ;;  %v4386_v42 = vmul.f32 0.5, %v9586_v56 }
 0x65e   : > { %v4577_v53 = vadd.f32 1.0, %v6602_v3  ;;  %6609 = verf.f32 %v4453_v60  ;;  %v4324_v61 = vadd.f32 %v4323_v37, %v9412_v44  ;;  %v4640_v59 = vmul.f32 %v4576_v63, %v4384_v32 }
 0x65f   : > { %v4454_v45 = vmul.f32 0.70710677, %v9594_v34  ;;  %v4325_v5 = vpop.f32.mrf.mxu0 }
 0x660   : > { %v4641_v49 = vmul.f32 %v4577_v53, %v4385_v25  ;;  %v4455_v16 = vmul.f32 0.70710677, %v4324_v61  ;;  %v4326_v28 = vadd.f32 %v4325_v5, %v9409_v21  ;;  %v4676_v50 = vpack.c.bf16 %v4640_v59, %v4638_v13  ;;  %v9605_v25 = vld [vmem:[%s9770_s12] ss:$0 sm:$0xff] }
 0x661   : > { %v4327_v54 = vpop.f32.mrf.mxu0  ;;  %v4388_v21 = vmul.f32 0.5, %v4316_v57 }
 0x662   : > { %6611 = verf.f32 %v4455_v16  ;;  %v4328_v24 = vadd.f32 %v4327_v54, %v9412_v44  ;;  %v4677_v22 = vpack.c.bf16 %v4641_v49, %v4639_v58  ;;  %v4456_v31 = vmul.f32 0.70710677, %v4326_v28 }
 0x663   : > { %6613 = verf.f32 %v4454_v45  ;;  %v4392_v59 = vmul.f32 0.5, %v4326_v28  ;;  %v4391_v58 = vmul.f32 0.5, %v4324_v61  ;;  %v4390_v54 = vmul.f32 0.5, %v9594_v34 }
 0x664   : > { %v4457_v7 = vmul.f32 0.70710677, %v4328_v24  ;;  %4953 = vmatprep.mubr.bf16.mxu1 %v4677_v22  ;;  %6615 = verf.f32 %v4456_v31  ;;  %v4393_v49 = vmul.f32 0.5, %v4328_v24 }
 0x665   : > { %4954 = vmatmul.mubr.bf16.gmra.mxu1 %v4676_v50  ;;  %v6604_v11 = vpop.eup %6603 }
 0x666   : > { %6617 = verf.f32 %v4457_v7  ;;  %v4578_v10 = vadd.f32 1.0, %v6604_v11 }
 0x667   : > { %v6606_v48 = vpop.eup %6605 }
 0x668   : > { %v4579_v39 = vadd.f32 1.0, %v6606_v48  ;;  %v4642_v60 = vmul.f32 %v4578_v10, %v4386_v42 }
 0x669   : > { %v6608_v17 = vpop.eup %6607 }
 0x66a   : > { %v4580_v55 = vadd.f32 1.0, %v6608_v17  ;;  %v4643_v23 = vmul.f32 %v4579_v39, %v4387_v33 }
 0x66b   : > { %v6610_v51 = vpop.eup %6609 }
 0x66c   : > { %v4581_v44 = vadd.f32 1.0, %v6610_v51  ;;  %v4644_v15 = vmul.f32 %v4580_v55, %v4388_v21  ;;  %v5506_v3 = vpop.f32.mrf.mxu1 }
 0x66e   : > { %v4645_v20 = vmul.f32 %v4581_v44, %v4389_v43  ;;  %v4678_v37 = vpack.c.bf16 %v4644_v15, %v4642_v60  ;;  %v5507_v57 = vpop.f32.mrf.mxu1 }
 0x66f   : > { %v6612_v63 = vpop.eup %6611  ;;  %v5508_v53 = vadd.f32 %v5507_v57, %v5506_v3 }
 0x670   : > { %v6614_v14 = vpop.eup %6613  ;;  %v4679_v32 = vpack.c.bf16 %v4645_v20, %v4643_v23  ;;  %v4583_v26 = vadd.f32 1.0, %v6612_v63  ;;  %v5509_v5 = vpop.f32.mrf.mxu1 }
 0x671   : > { %v6616_v29 = vpop.eup %6615  ;;  %v4582_v52 = vadd.f32 1.0, %v6614_v14  ;;  %v4852_v13 = vadd.f32 %v5508_v53, %v9605_v25 }
 0x672   : > { %4961 = vmatprep.mubr.bf16.mxu1 %v4679_v32  ;;  %v4584_v45 = vadd.f32 1.0, %v6616_v29  ;;  %v5510_v50 = vpop.f32.mrf.mxu1  ;;  %v4647_v31 = vmul.f32 %v4583_v26, %v4391_v58 }
 0x673   : > { %v6618_v56 = vpop.eup %6617  ;;  %4962 = vmatmul.mubr.bf16.gmra.mxu1 %v4678_v37  ;;  %v4978_v11 = vadd.f32 %v4852_v13, %v8933_v0  ;;  %v5511_v48 = vadd.f32 %v5510_v50, %v5509_v5  ;;  %v4646_v17 = vmul.f32 %v4582_v52, %v4390_v54 }
 0x674   : > { %v4585_v16 = vadd.f32 1.0, %v6618_v56  ;;  %v4648_v22 = vmul.f32 %v4584_v45, %v4392_v59 }
 0x675   : > { %5010 = vst [vmem:[%s9612_s24] sm:$0xff] %v4978_v11  ;;  %v4855_v61 = vadd.f32 %v5511_v48, %v9605_v25 }
 0x676   : > { %v4649_v7 = vmul.f32 %v4585_v16, %v4393_v49  ;;  %v4680_v34 = vpack.c.bf16 %v4648_v22, %v4646_v17 }
 0x677   : > { %v4979_v39 = vadd.f32 %v4855_v61, %v8940_v40 }
 0x678   : > { %v4681_v28 = vpack.c.bf16 %v4649_v7, %v4647_v31  ;;  %v5512_v24 = vpop.f32.mrf.mxu1 }
 0x679   : > { %5011 = vst [vmem:[%s9612_s24 + $0x8] sm:$0xff] %v4979_v39 }
 0x67a   : > { %4969 = vmatprep.mubr.bf16.mxu1 %v4681_v28  ;;  %v5513_v51 = vpop.f32.mrf.mxu1 }
 0x67b   : > { %4970 = vmatmul.mubr.bf16.gmra.mxu1 %v4680_v34  ;;  %v5514_v0 = vadd.f32 %v5513_v51, %v5512_v24 }
 0x67c   : > { %v5515_v10 = vpop.f32.mrf.mxu1 }
 0x67d   : > { %v4860_v21 = vadd.f32 %v5514_v0, %v9605_v25 }
 0x67e   : > { %v5516_v55 = vpop.f32.mrf.mxu1 }
 0x67f   : > { %v4980_v33 = vadd.f32 %v4860_v21, %v8945_v1  ;;  %v5517_v43 = vadd.f32 %v5516_v55, %v5515_v10 }
 0x681   : > { %5012 = vst [vmem:[%s9612_s24 + $0x10] sm:$0xff] %v4980_v33  ;;  %v4863_v44 = vadd.f32 %v5517_v43, %v9605_v25 }
 0x683   : > { %v4981_v42 = vadd.f32 %v4863_v44, %v8950_v2 }
 0x685   : > { %5013 = vst [vmem:[%s9612_s24 + $0x18] sm:$0xff] %v4981_v42 }
 0x686   : > { %v5518_v40 = vpop.f32.mrf.mxu1 }
 0x688   : > { %v5519_v15 = vpop.f32.mrf.mxu1 }
 0x689   : > { %v5520_v23 = vadd.f32 %v5519_v15, %v5518_v40 }
 0x68a   : > { %v5521_v20 = vpop.f32.mrf.mxu1 }
 0x68b   : > { %v4868_v63 = vadd.f32 %v5520_v23, %v9605_v25 }
 0x68c   : > { %v5522_v60 = vpop.f32.mrf.mxu1 }
 0x68d   : > { %v4982_v3 = vadd.f32 %v4868_v63, %v8955_v8  ;;  %v5523_v14 = vadd.f32 %v5522_v60, %v5521_v20  ;;  %v9900_v60 = vld [vmem:[#allocation33_spill] sm:$0xff] }
 0x68f   : > { %5014 = vst [vmem:[%s9612_s24 + $0x20] sm:$0xff] %v4982_v3  ;;  %v4871_v1 = vadd.f32 %v5523_v14, %v9605_v25 }
 0x691   : > { %v5524_v32 = vpop.f32.mrf.mxu1  ;;  %v4983_v37 = vadd.f32 %v4871_v1, %v8960_v30 }
 0x693   : > { %v5525_v2 = vpop.f32.mrf.mxu1  ;;  %5015 = vst [vmem:[%s9612_s24 + $0x28] sm:$0xff] %v4983_v37  ;;  %v9901_v37 = vld [vmem:[#allocation23_spill] sm:$0xff] }
 0x694   : > { %v5526_v57 = vadd.f32 %v5525_v2, %v5524_v32 }
 0x695   : > { %v5527_v29 = vpop.f32.mrf.mxu1 }
 0x696   : > { %v4876_v26 = vadd.f32 %v5526_v57, %v9605_v25 }
 0x697   : > { %v5528_v53 = vpop.f32.mrf.mxu1 }
 0x698   : > { %v4984_v56 = vadd.f32 %v4876_v26, %v8965_v36  ;;  %v5529_v52 = vadd.f32 %v5528_v53, %v5527_v29  ;;  %v9902_v53 = vld [vmem:[#allocation24_spill] sm:$0xff] }
 0x69a   : > { %5016 = vst [vmem:[%s9612_s24 + $0x30] sm:$0xff] %v4984_v56  ;;  %v4879_v8 = vadd.f32 %v5529_v52, %v9605_v25 }
 0x69c   : > { %v4985_v59 = vadd.f32 %v4879_v8, %v8970_v6 }
 0x69e   : > { %5017 = vst [vmem:[%s9612_s24 + $0x38] sm:$0xff] %v4985_v59 }
 0x69f   : > { %v5530_v45 = vpop.f32.mrf.mxu1 }
 0x6a1   : > { %v5531_v30 = vpop.f32.mrf.mxu1 }
 0x6a2   : > { %v5532_v5 = vadd.f32 %v5531_v30, %v5530_v45  ;;  %v9903_v30 = vld [vmem:[#allocation26_spill] sm:$0xff] }
 0x6a3   : > { %v5533_v58 = vpop.f32.mrf.mxu1 }
 0x6a4   : > { %v4884_v49 = vadd.f32 %v5532_v5, %v9605_v25 }
 0x6a5   : > { %v5534_v16 = vpop.f32.mrf.mxu1 }
 0x6a6   : > { %v4986_v13 = vadd.f32 %v4884_v49, %v8975_v9  ;;  %v5535_v54 = vadd.f32 %v5534_v16, %v5533_v58  ;;  %v9904_v16 = vld [vmem:[#allocation25_spill] sm:$0xff] }
 0x6a7   : > { %v5536_v36 = vpop.f32.mrf.mxu1 }
 0x6a8   : > { %5018 = vst [vmem:[%s9612_s24 + $0x40] sm:$0xff] %v4986_v13  ;;  %v4887_v22 = vadd.f32 %v5535_v54, %v9605_v25 }
 0x6a9   : > { %v5537_v50 = vpop.f32.mrf.mxu1 }
 0x6aa   : > { %v4987_v6 = vadd.f32 %v4887_v22, %v8980_v4  ;;  %v5538_v31 = vadd.f32 %v5537_v50, %v5536_v36 }
 0x6ab   : > { %v5539_v7 = vpop.f32.mrf.mxu1 }
 0x6ac   : > { %5019 = vst [vmem:[%s9612_s24 + $0x48] sm:$0xff] %v4987_v6  ;;  %v4892_v11 = vadd.f32 %v5538_v31, %v9605_v25 }
 0x6ad   : > { %v5540_v48 = vpop.f32.mrf.mxu1 }
 0x6ae   : > { %v4988_v17 = vadd.f32 %v4892_v11, %v8985_v18  ;;  %v5541_v28 = vadd.f32 %v5540_v48, %v5539_v7  ;;  %v9905_v7 = vld [vmem:[#allocation27_spill] sm:$0xff] }
 0x6b0   : > { %5020 = vst [vmem:[%s9612_s24 + $0x50] sm:$0xff] %v4988_v17  ;;  %v4895_v9 = vadd.f32 %v5541_v28, %v9605_v25  ;;  %v5542_v61 = vpop.f32.mrf.mxu1 }
 0x6b2   : > { %v4989_v24 = vadd.f32 %v4895_v9, %v8990_v46  ;;  %v5543_v34 = vpop.f32.mrf.mxu1  ;;  %v9906_v9 = vld [vmem:[#allocation29_spill] sm:$0xff] }
 0x6b3   : > { %v5544_v39 = vadd.f32 %v5543_v34, %v5542_v61 }
 0x6b4   : > { %5021 = vst [vmem:[%s9612_s24 + $0x58] sm:$0xff] %v4989_v24  ;;  %v5545_v4 = vpop.f32.mrf.mxu1 }
 0x6b5   : > { %v4900_v51 = vadd.f32 %v5544_v39, %v9605_v25 }
 0x6b6   : > { %v5546_v0 = vpop.f32.mrf.mxu1 }
 0x6b7   : > { %v4990_v10 = vadd.f32 %v4900_v51, %v8995_v27  ;;  %v5547_v21 = vadd.f32 %v5546_v0, %v5545_v4  ;;  %v9907_v0 = vld [vmem:[#allocation22_spill] sm:$0xff] }
 0x6b8   : > { %v5548_v18 = vpop.f32.mrf.mxu1 }
 0x6b9   : > { %5022 = vst [vmem:[%s9612_s24 + $0x60] sm:$0xff] %v4990_v10  ;;  %v4903_v55 = vadd.f32 %v5547_v21, %v9605_v25 }
 0x6ba   : > { %v5549_v33 = vpop.f32.mrf.mxu1 }
 0x6bb   : > { %v4991_v46 = vadd.f32 %v4903_v55, %v9000_v62  ;;  %v5550_v43 = vadd.f32 %v5549_v33, %v5548_v18  ;;  %v9908_v55 = vld [vmem:[#allocation28_spill] sm:$0xff] }
 0x6bc   : > { %v5551_v44 = vpop.f32.mrf.mxu1 }
 0x6bd   : > { %5023 = vst [vmem:[%s9612_s24 + $0x68] sm:$0xff] %v4991_v46  ;;  %v4908_v42 = vadd.f32 %v5550_v43, %v9605_v25 }
 0x6be   : > { %v5552_v40 = vpop.f32.mrf.mxu1 }
 0x6bf   : > { %v4992_v15 = vadd.f32 %v4908_v42, %v9005_v41  ;;  %v5553_v23 = vadd.f32 %v5552_v40, %v5551_v44 }
 0x6c0   : > { %v5554_v27 = vpop.f32.mrf.mxu1 }
 0x6c1   : > { %5024 = vst [vmem:[%s9612_s24 + $0x70] sm:$0xff] %v4992_v15  ;;  %v4911_v20 = vadd.f32 %v5553_v23, %v9605_v25 }
 0x6c2   : > { %v5555_v63 = vpop.f32.mrf.mxu1 }
 0x6c3   : > { %v4993_v3 = vadd.f32 %v4911_v20, %v9900_v60  ;;  %v5556_v14 = vadd.f32 %v5555_v63, %v5554_v27  ;;  %v9909_v60 = vld [vmem:[#allocation21_spill] sm:$0xff] }
 0x6c4   : > { %v5557_v62 = vpop.f32.mrf.mxu1 }
 0x6c5   : > { %5025 = vst [vmem:[%s9612_s24 + $0x78] sm:$0xff] %v4993_v3  ;;  %v4916_v1 = vadd.f32 %v5556_v14, %v9605_v25 }
 0x6c6   : > { %v5558_v32 = vpop.f32.mrf.mxu1 }
 0x6c7   : > { %v4994_v2 = vadd.f32 %v4916_v1, %v9901_v37  ;;  %v5559_v57 = vadd.f32 %v5558_v32, %v5557_v62 }
 0x6c8   : > { %v5560_v41 = vpop.f32.mrf.mxu1 }
 0x6c9   : > { %5026 = vst [vmem:[%s9612_s24 + $0x80] sm:$0xff] %v4994_v2  ;;  %v4919_v29 = vadd.f32 %v5559_v57, %v9605_v25  ;;  %v9910_v2 = vld [vmem:[#allocation30_spill] sm:$0xff] }
 0x6ca   : > { %v5561_v26 = vpop.f32.mrf.mxu1 }
 0x6cb   : > { %v4995_v56 = vadd.f32 %v4919_v29, %v9902_v53  ;;  %v5562_v52 = vadd.f32 %v5561_v26, %v5560_v41  ;;  %v9911_v29 = vld [vmem:[#allocation32_spill] sm:$0xff] }
 0x6cc   : > { %v5563_v8 = vpop.f32.mrf.mxu1 }
 0x6cd   : > { %5027 = vst [vmem:[%s9612_s24 + $0x88] sm:$0xff] %v4995_v56  ;;  %v4924_v59 = vadd.f32 %v5562_v52, %v9605_v25 }
 0x6ce   : > { %v5564_v45 = vpop.f32.mrf.mxu1 }
 0x6cf   : > { %v4996_v5 = vadd.f32 %v4924_v59, %v9903_v30  ;;  %v5565_v58 = vadd.f32 %v5564_v45, %v5563_v8 }
 0x6d1   : > { %5028 = vst [vmem:[%s9612_s24 + $0x90] sm:$0xff] %v4996_v5  ;;  %v4927_v49 = vadd.f32 %v5565_v58, %v9605_v25 }
 0x6d3   : > { %v4997_v13 = vadd.f32 %v4927_v49, %v9904_v16 }
 0x6d5   : > { %5029 = vst [vmem:[%s9612_s24 + $0x98] sm:$0xff] %v4997_v13 }
 0x700   : > { %v5566_v54 = vpop.f32.mrf.mxu1 }
 0x702   : > { %v5567_v36 = vpop.f32.mrf.mxu1 }
 0x703   : > { %v5568_v22 = vadd.f32 %v5567_v36, %v5566_v54 }
 0x704   : > { %v5569_v50 = vpop.f32.mrf.mxu1 }
 0x705   : > { %v4932_v6 = vadd.f32 %v5568_v22, %v9605_v25 }
 0x706   : > { %v5570_v31 = vpop.f32.mrf.mxu1 }
 0x707   : > { %v4998_v11 = vadd.f32 %v4932_v6, %v9905_v7  ;;  %v5571_v48 = vadd.f32 %v5570_v31, %v5569_v50 }
 0x709   : > { %5030 = vst [vmem:[%s9612_s24 + $0xa0] sm:$0xff] %v4998_v11  ;;  %v4935_v17 = vadd.f32 %v5571_v48, %v9605_v25 }
 0x70b   : > { %v4999_v61 = vadd.f32 %v4935_v17, %v9906_v9 }
 0x70c   : > { %v5572_v28 = vpop.f32.mrf.mxu1 }
 0x70d   : > { %5031 = vst [vmem:[%s9612_s24 + $0xa8] sm:$0xff] %v4999_v61 }
 0x70e   : > { %v5573_v24 = vpop.f32.mrf.mxu1 }
 0x70f   : > { %v5574_v34 = vadd.f32 %v5573_v24, %v5572_v28 }
 0x710   : > { %v5575_v39 = vpop.f32.mrf.mxu1 }
 0x711   : > { %v4940_v4 = vadd.f32 %v5574_v34, %v9605_v25 }
 0x712   : > { %v5576_v51 = vpop.f32.mrf.mxu1 }
 0x713   : > { %v5000_v10 = vadd.f32 %v4940_v4, %v9907_v0  ;;  %v5577_v21 = vadd.f32 %v5576_v51, %v5575_v39 }
 0x715   : > { %5032 = vst [vmem:[%s9612_s24 + $0xb0] sm:$0xff] %v5000_v10  ;;  %v4943_v18 = vadd.f32 %v5577_v21, %v9605_v25 }
 0x717   : > { %v5001_v33 = vadd.f32 %v4943_v18, %v9908_v55 }
 0x719   : > { %5033 = vst [vmem:[%s9612_s24 + $0xb8] sm:$0xff] %v5001_v33 }
 0x71a   : > { %v5578_v46 = vpop.f32.mrf.mxu1 }
 0x71c   : > { %v5579_v43 = vpop.f32.mrf.mxu1 }
 0x71d   : > { %v5580_v44 = vadd.f32 %v5579_v43, %v5578_v46 }
 0x71e   : > { %v5581_v42 = vpop.f32.mrf.mxu1 }
 0x71f   : > { %v4948_v40 = vadd.f32 %v5580_v44, %v9605_v25 }
 0x720   : > { %v5582_v15 = vpop.f32.mrf.mxu1 }
 0x721   : > { %v5002_v23 = vadd.f32 %v4948_v40, %v9107_v47  ;;  %v5583_v27 = vadd.f32 %v5582_v15, %v5581_v42 }
 0x723   : > { %5034 = vst [vmem:[%s9612_s24 + $0xc0] sm:$0xff] %v5002_v23  ;;  %v4951_v20 = vadd.f32 %v5583_v27, %v9605_v25 }
 0x725   : > { %v5584_v63 = vpop.f32.mrf.mxu1  ;;  %v5003_v3 = vadd.f32 %v4951_v20, %v9909_v60 }
 0x727   : > { %v5585_v14 = vpop.f32.mrf.mxu1  ;;  %5035 = vst [vmem:[%s9612_s24 + $0xc8] sm:$0xff] %v5003_v3 }
 0x728   : > { %v5586_v62 = vadd.f32 %v5585_v14, %v5584_v63 }
 0x729   : > { %v5587_v1 = vpop.f32.mrf.mxu1 }
 0x72a   : > { %v4956_v32 = vadd.f32 %v5586_v62, %v9605_v25 }
 0x72b   : > { %v5588_v37 = vpop.f32.mrf.mxu1 }
 0x72c   : > { %v5004_v57 = vadd.f32 %v4956_v32, %v9910_v2  ;;  %v5589_v41 = vadd.f32 %v5588_v37, %v5587_v1 }
 0x72e   : > { %5036 = vst [vmem:[%s9612_s24 + $0xd0] sm:$0xff] %v5004_v57  ;;  %v4959_v47 = vadd.f32 %v5589_v41, %v9605_v25 }
 0x730   : > { %v5005_v26 = vadd.f32 %v4959_v47, %v9911_v29 }
 0x732   : > { %5037 = vst [vmem:[%s9612_s24 + $0xd8] sm:$0xff] %v5005_v26 }
 0x733   : > { %v5590_v53 = vpop.f32.mrf.mxu1 }
 0x735   : > { %v5591_v56 = vpop.f32.mrf.mxu1 }
 0x736   : > { %v5592_v52 = vadd.f32 %v5591_v56, %v5590_v53 }
 0x737   : > { %v5593_v8 = vpop.f32.mrf.mxu1 }
 0x738   : > { %v4964_v59 = vadd.f32 %v5592_v52, %v9605_v25 }
 0x739   : > { %v5594_v45 = vpop.f32.mrf.mxu1 }
 0x73a   : > { %v5006_v30 = vadd.f32 %v4964_v59, %v9165_v12  ;;  %v5595_v5 = vadd.f32 %v5594_v45, %v5593_v8 }
 0x73b   : > { %v5596_v58 = vpop.f32.mrf.mxu1 }
 0x73c   : > { %5038 = vst [vmem:[%s9612_s24 + $0xe0] sm:$0xff] %v5006_v30  ;;  %v4967_v49 = vadd.f32 %v5595_v5, %v9605_v25 }
 0x73d   : > { %v5597_v16 = vpop.f32.mrf.mxu1 }
 0x73e   : > { %v5007_v13 = vadd.f32 %v4967_v49, %v9180_v38  ;;  %v5598_v54 = vadd.f32 %v5597_v16, %v5596_v58 }
 0x73f   : > { %v5599_v36 = vpop.f32.mrf.mxu1 }
 0x740   : > { %5039 = vst [vmem:[%s9612_s24 + $0xe8] sm:$0xff] %v5007_v13  ;;  %v4972_v22 = vadd.f32 %v5598_v54, %v9605_v25 }
 0x741   : > { %v5600_v50 = vpop.f32.mrf.mxu1 }
 0x742   : > { %v5008_v12 = vadd.f32 %v4972_v22, %v9190_v35  ;;  %v5601_v6 = vadd.f32 %v5600_v50, %v5599_v36 }
 0x744   : > { %5040 = vst [vmem:[%s9612_s24 + $0xf0] sm:$0xff] %v5008_v12  ;;  %v4975_v31 = vadd.f32 %v5601_v6, %v9605_v25 }
 0x746   : > { %v5009_v38 = vadd.f32 %v4975_v31, %v9200_v19 }
 0x748   : > { %5041 = vst [vmem:[%s9612_s24 + $0xf8] sm:$0xff] %v5009_v38 }
 0x749   : > { %6823 = shalt.err (!%p6820_p5)
}
 0x74a   : > { %s6824_s2 = scalar_lea.hbm %s9711_s23, 4096  ;;  %s6828_s21 = scalar_lea.hbm %s9771_s13, 8192 }
 0x74b   : > { %p6825_p6 = scmp.ne.s32.totalorder %s9711_s23, %s6824_s2  ;;  %p6829_p4 = scmp.lt.s32.totalorder %s9711_s23, %s9771_s13 }
 0x74c   : > { %p6830_p7 = scmp.lt.s32.totalorder %s6828_s21, %s6824_s2 }
 0x74d   : > { %p6826_p10 = pnand %p6825_p6, %p9912_p2 }
 0x74e   : > { %p6831_p13 = por %p6830_p7, %p6829_p4 }
 0x74f   : > { %p6827_p11 = pneg %p6826_p10 }
 0x751   : > { %p6832_p0 = pnand %p6831_p13, %p6827_p11 }
 0x753   : > { %6835 = shalt.err (!%p6832_p0)
}
 0x754   : > { %s6902_s11 = smov 128   ;;  %s6903_s18 = smov 8  }
 0x755   : > { %5976 = dma.vmem_to_hbm [thread:$0]  (%p9912_p2), %s9713_s17, 4096, %s9711_s23, %s5043_s1, %s6902_s11, %s6902_s11, %s6903_s18  }
 0x756 PF: > { %s5072_s7 = sand.u32 1, %s6874_s25   ;;  %p9913_p8 = scmp.ne.s32.totalorder %s9818_s22, 0 }
 0x757   : > { %p9914_p9 = scmp.ge.s32.totalorder %s6886_s28, 2  ;;  %s5073_s14 = scalar_lea.sflag [#allocation4], %s5072_s7 }
 0x759   : > { %p5999_p12 = pnand %p9914_p9, %p9913_p8 }
 0x75b   : > { %p6000_p3 = pneg %p5999_p12 }
 0x75d   : > { %6869 = dma.done.wait (%p6000_p3), %s5073_s14, 4096  }
 0x75e   : > { %6871 = vsyncadd (%p6000_p3), %s5073_s14, 4294963200  ;;  %s9915_s8 = sld [smem:[#allocation19_spill]]  ;;  %p29_p1 = scmp.ge.s32.totalorder %s7075_s30, 4  }
 0x75f   : > { %s9916_s27 = sld [smem:[#allocation20_spill]]  ;;  %s9917_s25 = smov %s6878_s26 }
 0x760   : > { %s9919_s28 = smov %s7075_s30  ;;  %31 = sbr.rel (!%p29_p1) target bundleno = 14 (0xe), region = 137 }
 0x764   : > { %s9918_s26 = smov %s9915_s8 }
 0x765   :  { %5078 = vsyncpa [#allocation3], 1 }
 0x766   :  { %5080 = vsyncpa [#allocation3 + $0x1], 1 }
 0x767   :  { %5081 = vsyncpa [#allocation6], 1 }
 0x768   :  { %5082 = vsyncpa [#allocation9], 1 }
 0x769   :  { %5083 = vsyncpa [#allocation12], 1 }
 0x76a   :  { %5084 = vsyncpa [#allocation4], 1 }
 0x76b   :  { %5086 = vsyncpa [#allocation4 + $0x1], 1 }

</bundles_post_ra>
